<compile_context>
chip_gen: v5e
topology: v5e:2x2
jax: 0.10.0
libtpu: 0.0.40
codegen_flags: <defaults>
</compile_context>

<pallas_src>
import jax
import jax.numpy as jnp
import numpy as np
from jax.experimental import pallas as pl
from jax.experimental.pallas import tpu as pltpu


def _option_a_shortcut(x, planes):
    """pad(x[:, :, ::2, ::2], channel zero-pad of planes//4) as one Pallas call."""
    B, C, H, W = x.shape
    assert H % 2 == 0 and W % 2 == 0, "option-A shortcut assumes even H, W"
    pad = planes // 4
    C_out = C + 2 * pad
    H2, W2 = H // 2, W // 2
    D = C * H2 * W2          # flattened data elements per batch row
    P = pad * H2 * W2        # flattened zeros per pad band per batch row
    D_out = C_out * H2 * W2

    itemsize = jnp.dtype(x.dtype).itemsize
    per_row_bytes = (C * H * W + D_out) * itemsize
    # ~2 MiB per (input + output) block; with double buffering this stays well
    # under every chip's scoped-VMEM default while keeping per-step overhead
    # (~0.35 us) negligible for production batch sizes.
    budget = 2 << 20
    bb = max(1, min(B, budget // per_row_bytes))
    if bb < B and bb % 8 != 0:
        # Output block's second-minor dim must be a multiple of 8 (or full B).
        bb = min(B, max(8, (bb // 8) * 8))
    grid = (pl.cdiv(B, bb),)

    def kernel(x_ref, o_ref):
        xb = x_ref[...]                                            # (bb, C, H, W)
        # Stride-2 spatial subsample in-register: split H->(H2,2), W->(W2,2)
        # and keep the even element of each pair (dense DMA, no lane-strided
        # ref read).
        x_ds = xb.reshape(bb, C, H2, 2, W2, 2)[:, :, :, 0, :, 0]   # (bb, C, H2, W2)
        # Lane-dense data band: per-batch row flattened to C*H2*W2; both the
        # offset P and width D are multiples of 128 for option-A shapes, so
        # the stores below are unmasked full-width vector stores.
        o_ref[:, P:P + D] = x_ds.reshape(bb, D)
        if P > 0:
            z = jnp.zeros((bb, P), dtype=o_ref.dtype)
            o_ref[:, :P] = z
            o_ref[:, P + D:] = z

    out_flat = pl.pallas_call(
        kernel,
        out_shape=jax.ShapeDtypeStruct((B, D_out), x.dtype),
        grid=grid,
        in_specs=[pl.BlockSpec((bb, C, H, W), lambda i: (i, 0, 0, 0))],
        out_specs=pl.BlockSpec((bb, D_out), lambda i: (i, 0)),
        compiler_params=pltpu.CompilerParams(
            dimension_semantics=("parallel",)),
        cost_estimate=pl.CostEstimate(
            flops=0,
            transcendentals=0,
            bytes_accessed=(x.size + B * D_out) * itemsize),
    )(x)
    # Trailing-dim reshape back to NCHW in HBM is free layout plumbing.
    return out_flat.reshape(B, C_out, H2, W2)


# `planes` determines output shapes -> static argument; jit once, reuse.
lambda_shortcut = jax.jit(_option_a_shortcut, static_argnames="planes")


def _reference(x, planes):
    # Pure-JAX reference mirroring the PyTorch lambda exactly.
    pad = planes // 4
    return jnp.pad(x[:, :, ::2, ::2], ((0, 0), (pad, pad), (0, 0), (0, 0)))


if __name__ == "__main__":
    key = jax.random.PRNGKey(0)
    B, C, H, W = 2, 4, 16, 16
    planes = 8  # typical option-A shortcut: planes = 2 * in_planes

    x = jax.random.normal(key, (B, C, H, W), dtype=jnp.float32)

    out = jax.block_until_ready(lambda_shortcut(x, planes=planes))

    ref = _reference(x, planes)
    np.testing.assert_allclose(np.asarray(out), np.asarray(ref), rtol=0, atol=0)

    print("KERNEL_OK")
</pallas_src>

<mosaic_0001>
module attributes {stable_mosaic.version = 11 : i64} {
  func.func @kernel(%arg0: i32, %arg1: memref<2x4x16x16xf32, #tpu.memory_space<vmem>>, %arg2: memref<2x512xf32, #tpu.memory_space<vmem>>) attributes {dimension_semantics = [#tpu.dimension_semantics<parallel>], iteration_bounds = array<i64: 1>, scalar_prefetch = 0 : i64, scratch_operands = 0 : i64, tpu.core_type = #tpu.core_type<tc>, window_params = [{transform_indices = @transform_0, window_bounds = array<i64: 2, 4, 16, 16>}, {transform_indices = @transform_1, window_bounds = array<i64: 2, 512>}]} {
    %c0 = arith.constant 0 : index
    %c0_0 = arith.constant 0 : index
    %c0_1 = arith.constant 0 : index
    %c0_2 = arith.constant 0 : index
    %0 = vector.load %arg1[%c0, %c0_0, %c0_1, %c0_2] : memref<2x4x16x16xf32, #tpu.memory_space<vmem>>, vector<2x4x16x16xf32>
    %1 = vector.shape_cast %0 : vector<2x4x16x16xf32> to vector<2x4x8x2x8x2xf32>
    %2 = vector.extract_strided_slice %1 {offsets = [0, 0, 0, 0, 0, 0], sizes = [2, 4, 8, 1, 8, 1], strides = [1, 1, 1, 1, 1, 1]} : vector<2x4x8x2x8x2xf32> to vector<2x4x8x1x8x1xf32>
    %3 = vector.shape_cast %2 : vector<2x4x8x1x8x1xf32> to vector<2x4x8x8xf32>
    %4 = vector.shape_cast %3 : vector<2x4x8x8xf32> to vector<2x256xf32>
    %c0_3 = arith.constant 0 : index
    %c128 = arith.constant 128 : index
    %5 = vector.load %arg2[%c0_3, %c128] : memref<2x512xf32, #tpu.memory_space<vmem>>, vector<2x256xf32>
    tpu.vector_store %arg2[%c0_3, %c128], %4 {strides = array<i32>} : memref<2x512xf32, #tpu.memory_space<vmem>>, vector<2x256xf32>,
    %cst = arith.constant 0.000000e+00 : f32
    %6 = vector.broadcast %cst : f32 to vector<2x128xf32>
    %c0_4 = arith.constant 0 : index
    %c0_5 = arith.constant 0 : index
    %7 = vector.load %arg2[%c0_4, %c0_5] : memref<2x512xf32, #tpu.memory_space<vmem>>, vector<2x128xf32>
    tpu.vector_store %arg2[%c0_4, %c0_5], %6 {strides = array<i32>} : memref<2x512xf32, #tpu.memory_space<vmem>>, vector<2x128xf32>,
    %c0_6 = arith.constant 0 : index
    %c384 = arith.constant 384 : index
    %8 = vector.load %arg2[%c0_6, %c384] : memref<2x512xf32, #tpu.memory_space<vmem>>, vector<2x128xf32>
    tpu.vector_store %arg2[%c0_6, %c384], %6 {strides = array<i32>} : memref<2x512xf32, #tpu.memory_space<vmem>>, vector<2x128xf32>,
    return
  }
  func.func @transform_0(%arg0: i32) -> (i32, i32, i32, i32) {
    %c0_i32 = arith.constant 0 : i32
    %c0_i32_0 = arith.constant 0 : i32
    %c0_i32_1 = arith.constant 0 : i32
    %c0_i32_2 = arith.constant 0 : i32
    return %arg0, %c0_i32, %c0_i32_0, %c0_i32_1 : i32, i32, i32, i32
  }
  func.func @transform_1(%arg0: i32) -> (i32, i32) {
    %c0_i32 = arith.constant 0 : i32
    %c0_i32_0 = arith.constant 0 : i32
    return %arg0, %c0_i32 : i32, i32
  }
}

</mosaic_0001>

<bundles_post_ra>
// kernel: _option_a_shortcut.1
= control target key start
LH: loop header
LB: loop body
LE: loop exit
PB: predicated region body
PF: predicated region fallthrough
CT: control target
= control target key end

     0   :  { %6 = vsyncpa [#allocation3], 0  ;;  %s3046_s9 = smov [#allocation2]   ;;  %s3047_s11 = smov 128   ;;  %s5429_s0 = inlined_call_operand.hbm [shape: f32[2,4,16,16], index: 0, kind: input, shape index: {}]   ;;  %s5430_s1 = inlined_call_operand.vmem [shape: f32[2,512], index: 1, kind: output, shape index: {}]  }
   0x1   :  { %s11_s8 = sshll.u32 %s5429_s0, 4  ;;  %s13_s10 = sshll.u32 %s3046_s9, 4  ;;  %s12_s8 = int_to_ptr.hbm [resolvable:$true] %s11_s8  ;;  %s14_s10 = int_to_ptr.vmem [resolvable:$true] %s13_s10 }
   0x2   :  { %s3048_s12 = smov 8  }
   0x3   :  { %19 = dma.hbm_to_vmem [thread:$0]  %s12_s8, 2048, %s14_s10, [#allocation3], %s3047_s11, %s3047_s11, %s3048_s12  }
   0x4   :  { %3044 = dma.done.wait [#allocation3], 2048  }
   0x5   :  { %3045 = vsyncadd [#allocation3], 4294965248  ;;  %v3049_v0 = vmov 0.0   ;;  %v3079_v1 = vld [vmem:[#allocation2 + $0x20] sm:$0xff]  ;;  %v3081_v2 = vld [vmem:[#allocation2 + $0x10] sm:$0xff]  ;;  %s3050_s0 = smov 126  }
   0x6   :  { %2996 = vst [vmem:[%s5430_s1] sm:$0x3] %v3049_v0  ;;  %v3083_v3 = vld [vmem:[#allocation2] sm:$0xff]  ;;  %64 = vrot.lane.b32.xlu2 %v3079_v1, %s3050_s0  ;;  %60 = vrot.lane.b32.xlu1 %v3081_v2, %s3050_s0  ;;  %v3091_v4 = vld [vmem:[#allocation2 + $0x28] sm:$0xff]  ;;  %v3093_v5 = vld [vmem:[#allocation2 + $0x18] sm:$0xff]  ;;  %s3051_s17 = smov 124   ;;  %s3052_s18 = smov 122  }
   0x7   :  { %2997 = vst [vmem:[%s5430_s1 + $0x6] sm:$0x3] %v3049_v0  ;;  %56 = vrot.lane.b32.xlu0 %v3083_v3, %s3050_s0  ;;  %v3095_v6 = vld [vmem:[#allocation2 + $0x8] sm:$0xff]  ;;  %v3103_v7 = vld [vmem:[#allocation2 + $0x40] sm:$0xff]  ;;  %v3105_v8 = vld [vmem:[#allocation2 + $0x38] sm:$0xff]  ;;  %s3053_s19 = smov 120  }
   0x8   :  { %v3107_v9 = vld [vmem:[#allocation2 + $0x30] sm:$0xff]  ;;  %v3115_v10 = vld [vmem:[#allocation2 + $0x58] sm:$0xff]  ;;  %v3119_v12 = vld [vmem:[#allocation2 + $0x48] sm:$0xff]  ;;  %s3054_s20 = smov 118   ;;  %v3055_v54 = vmov 1983009808  }
   0x9   :  { %v3117_v11 = vld [vmem:[#allocation2 + $0x50] sm:$0xff]  ;;  %v3129_v14 = vld [vmem:[#allocation2 + $0x68] sm:$0xff]  ;;  %v3131_v15 = vld [vmem:[#allocation2 + $0x60] sm:$0xff]  ;;  %v398_v55 = vunpack.c.l.s4 %v3055_v54  ;;  %vm393_vm0 = vcmask 1047556   ;;  %s3056_s21 = smov 116   ;;  %s3057_s22 = smov 114  }
   0xa   :  { %v3127_v13 = vld [vmem:[#allocation2 + $0x70] sm:$0xff]  ;;  %v3139_v16 = vld [vmem:[#allocation2 + $0x78] sm:$0xff]  ;;  %vm2837_vm1 = vcmask 130112   ;;  %vm2841_vm2 = vcmask 195712   ;;  %vm2845_vm3 = vcmask 261312   ;;  %vm2849_vm4 = vcmask 326912  }
   0xb   :  { %v1955_v53 = vrot.slane %v3139_v16, 4  ;;  %v3309_v61 = vunpack.c.0.s8 %v398_v55  ;;  %vm2853_vm5 = vcmask 392512   ;;  %vm2857_vm6 = vcmask 458112  }
   0xc   :  { %vm2861_vm7 = vcmask 523712   ;;  %vm2865_vm8 = vcmask 589312   ;;  %vm2869_vm9 = vcmask 654912   ;;  %vm2873_vm10 = vcmask 720512  }
   0xd   :  { %vm2877_vm11 = vcmask 786112   ;;  %vm2881_vm12 = vcmask 851712   ;;  %vm2885_vm13 = vcmask 917312   ;;  %vm2889_vm14 = vcmask 982912  }
   0xe   :  { %66 = vrot.lane.b32.xlu2 %v3091_v4, %s3050_s0  ;;  %62 = vrot.lane.b32.xlu1 %v3093_v5, %s3050_s0  ;;  %vm2893_vm15 = vcmask 1048512  }
   0xf   :  { %58 = vrot.lane.b32.xlu0 %v3095_v6, %s3050_s0 }
  0x16   :  { %72 = vrot.lane.b32.xlu2 %v3103_v7, %s3050_s0  ;;  %70 = vrot.lane.b32.xlu1 %v3105_v8, %s3050_s0 }
  0x17   :  { %68 = vrot.lane.b32.xlu0 %v3107_v9, %s3050_s0 }
  0x1e   :  { %78 = vrot.lane.b32.xlu2 %v3115_v10, %s3050_s0  ;;  %76 = vrot.lane.b32.xlu1 %v3117_v11, %s3050_s0 }
  0x1f   :  { %74 = vrot.lane.b32.xlu0 %v3119_v12, %s3050_s0 }
  0x26   :  { %84 = vrot.lane.b32.xlu2 %v3127_v13, %s3050_s0  ;;  %82 = vrot.lane.b32.xlu1 %v3129_v14, %s3050_s0 }
  0x27   :  { %80 = vrot.lane.b32.xlu0 %v3131_v15, %s3050_s0 }
  0x2e   :  { %106 = vrot.lane.b32.xlu2 %v3095_v6, %s3051_s17  ;;  %104 = vrot.lane.b32.xlu1 %v3083_v3, %s3051_s17 }
  0x2f   :  { %86 = vrot.lane.b32.xlu0 %v3139_v16, %s3050_s0 }
  0x36   :  { %112 = vrot.lane.b32.xlu2 %v3079_v1, %s3051_s17  ;;  %110 = vrot.lane.b32.xlu1 %v3093_v5, %s3051_s17 }
  0x37   :  { %108 = vrot.lane.b32.xlu0 %v3081_v2, %s3051_s17 }
  0x3e   :  { %118 = vrot.lane.b32.xlu2 %v3105_v8, %s3051_s17  ;;  %116 = vrot.lane.b32.xlu1 %v3107_v9, %s3051_s17 }
  0x3f   :  { %114 = vrot.lane.b32.xlu0 %v3091_v4, %s3051_s17 }
  0x46   :  { %124 = vrot.lane.b32.xlu2 %v3117_v11, %s3051_s17  ;;  %122 = vrot.lane.b32.xlu1 %v3119_v12, %s3051_s17 }
  0x47   :  { %120 = vrot.lane.b32.xlu0 %v3103_v7, %s3051_s17 }
  0x4e   :  { %130 = vrot.lane.b32.xlu2 %v3129_v14, %s3051_s17  ;;  %128 = vrot.lane.b32.xlu1 %v3131_v15, %s3051_s17 }
  0x4f   :  { %126 = vrot.lane.b32.xlu0 %v3115_v10, %s3051_s17 }
  0x56   :  { %152 = vrot.lane.b32.xlu2 %v3083_v3, %s3052_s18  ;;  %134 = vrot.lane.b32.xlu1 %v3139_v16, %s3051_s17 }
  0x57   :  { %132 = vrot.lane.b32.xlu0 %v3127_v13, %s3051_s17 }
  0x5e   :  { %158 = vrot.lane.b32.xlu2 %v3093_v5, %s3052_s18  ;;  %156 = vrot.lane.b32.xlu1 %v3081_v2, %s3052_s18 }
  0x5f   :  { %154 = vrot.lane.b32.xlu0 %v3095_v6, %s3052_s18 }
  0x60   :  { %v3163_v17 = vpop.permute.xlu2 %64 }
  0x66   :  { %164 = vrot.lane.b32.xlu2 %v3107_v9, %s3052_s18  ;;  %162 = vrot.lane.b32.xlu1 %v3091_v4, %s3052_s18 }
  0x67   :  { %160 = vrot.lane.b32.xlu0 %v3079_v1, %s3052_s18 }
  0x68   :  { %v3168_v18 = vpop.permute.xlu2 %66 }
  0x6e   :  { %170 = vrot.lane.b32.xlu2 %v3119_v12, %s3052_s18  ;;  %168 = vrot.lane.b32.xlu1 %v3103_v7, %s3052_s18 }
  0x6f   :  { %166 = vrot.lane.b32.xlu0 %v3105_v8, %s3052_s18 }
  0x70   :  { %v3173_v19 = vpop.permute.xlu2 %72 }
  0x76   :  { %176 = vrot.lane.b32.xlu2 %v3131_v15, %s3052_s18  ;;  %174 = vrot.lane.b32.xlu1 %v3115_v10, %s3052_s18 }
  0x77   :  { %172 = vrot.lane.b32.xlu0 %v3117_v11, %s3052_s18 }
  0x78   :  { %v3178_v20 = vpop.permute.xlu2 %78  ;;  %v3180_v21 = vpop.permute.xlu1 %60 }
  0x79   :  { %v3182_v22 = vpop.permute.xlu0 %56 }
  0x7e   :  { %182 = vrot.lane.b32.xlu2 %v3139_v16, %s3052_s18  ;;  %180 = vrot.lane.b32.xlu1 %v3127_v13, %s3052_s18 }
  0x7f   :  { %178 = vrot.lane.b32.xlu0 %v3129_v14, %s3052_s18 }
  0x80   :  { %v3187_v23 = vpop.permute.xlu2 %84  ;;  %v3189_v24 = vpop.permute.xlu1 %62 }
  0x81   :  { %v3191_v25 = vpop.permute.xlu0 %58 }
  0x86   :  { %204 = vrot.lane.b32.xlu2 %v3081_v2, %s3053_s19  ;;  %202 = vrot.lane.b32.xlu1 %v3095_v6, %s3053_s19 }
  0x87   :  { %200 = vrot.lane.b32.xlu0 %v3083_v3, %s3053_s19 }
  0x88   :  { %v3199_v26 = vpop.permute.xlu1 %70  ;;  %v3201_v27 = vpop.permute.xlu2 %106 }
  0x89   :  { %v3203_v28 = vpop.permute.xlu0 %68 }
  0x8e   :  { %210 = vrot.lane.b32.xlu2 %v3091_v4, %s3053_s19  ;;  %208 = vrot.lane.b32.xlu1 %v3079_v1, %s3053_s19 }
  0x8f   :  { %206 = vrot.lane.b32.xlu0 %v3093_v5, %s3053_s19 }
  0x90   :  { %v3211_v29 = vpop.permute.xlu1 %76  ;;  %v3213_v30 = vpop.permute.xlu2 %112 }
  0x91   :  { %v3215_v31 = vpop.permute.xlu0 %74 }
  0x96   :  { %216 = vrot.lane.b32.xlu2 %v3103_v7, %s3053_s19  ;;  %214 = vrot.lane.b32.xlu1 %v3105_v8, %s3053_s19 }
  0x97   :  { %212 = vrot.lane.b32.xlu0 %v3107_v9, %s3053_s19 }
  0x98   :  { %v3223_v32 = vpop.permute.xlu1 %82  ;;  %v3225_v33 = vpop.permute.xlu2 %118 }
  0x99   :  { %5517 = vst [vmem:[#allocation5_spill] sm:$0xff] %v3223_v32  ;;  %v3227_v34 = vpop.permute.xlu0 %80 }
  0x9e   :  { %222 = vrot.lane.b32.xlu2 %v3115_v10, %s3053_s19  ;;  %220 = vrot.lane.b32.xlu1 %v3117_v11, %s3053_s19 }
  0x9f   :  { %218 = vrot.lane.b32.xlu0 %v3119_v12, %s3053_s19 }
  0xa0   :  { %v3235_v35 = vpop.permute.xlu2 %124  ;;  %v3237_v36 = vpop.permute.xlu1 %104 }
  0xa1   :  { %v87_v37 = vpop.permute.xlu0 %86 }
  0xa6   :  { %228 = vrot.lane.b32.xlu2 %v3127_v13, %s3053_s19  ;;  %226 = vrot.lane.b32.xlu1 %v3129_v14, %s3053_s19 }
  0xa7   :  { %224 = vrot.lane.b32.xlu0 %v3131_v15, %s3053_s19 }
  0xa8   :  { %v3245_v38 = vpop.permute.xlu2 %130  ;;  %v3247_v39 = vpop.permute.xlu1 %110 }
  0xa9   :  { %v3249_v40 = vpop.permute.xlu0 %108 }
  0xae   :  { %250 = vrot.lane.b32.xlu2 %v3095_v6, %s3054_s20  ;;  %248 = vrot.lane.b32.xlu1 %v3083_v3, %s3054_s20 }
  0xaf   :  { %230 = vrot.lane.b32.xlu0 %v3139_v16, %s3053_s19 }
  0xb0   :  { %v3257_v41 = vpop.permute.xlu2 %152  ;;  %v3259_v42 = vpop.permute.xlu1 %116 }
  0xb1   :  { %v3261_v43 = vpop.permute.xlu0 %114 }
  0xb6   :  { %256 = vrot.lane.b32.xlu2 %v3079_v1, %s3054_s20  ;;  %254 = vrot.lane.b32.xlu1 %v3093_v5, %s3054_s20 }
  0xb7   :  { %252 = vrot.lane.b32.xlu0 %v3081_v2, %s3054_s20 }
  0xb8   :  { %v3269_v44 = vpop.permute.xlu2 %158  ;;  %v3271_v45 = vpop.permute.xlu1 %122 }
  0xb9   :  { %5518 = vst [vmem:[#allocation6_spill] sm:$0xff] %v3271_v45  ;;  %v3273_v46 = vpop.permute.xlu0 %120 }
  0xba   :  { %5519 = vst [vmem:[#allocation7_spill] sm:$0xff] %v3273_v46 }
  0xbe   :  { %262 = vrot.lane.b32.xlu2 %v3105_v8, %s3054_s20  ;;  %260 = vrot.lane.b32.xlu1 %v3107_v9, %s3054_s20 }
  0xbf   :  { %258 = vrot.lane.b32.xlu0 %v3091_v4, %s3054_s20 }
  0xc0   :  { %v3281_v47 = vpop.permute.xlu2 %164  ;;  %v3283_v48 = vpop.permute.xlu1 %128 }
  0xc1   :  { %5520 = vst [vmem:[#allocation8_spill] sm:$0xff] %v3281_v47  ;;  %v127_v49 = vpop.permute.xlu0 %126 }
  0xc2   :  { %5521 = vst [vmem:[#allocation9_spill] sm:$0xff] %v3283_v48 }
  0xc6   :  { %268 = vrot.lane.b32.xlu2 %v3117_v11, %s3054_s20  ;;  %266 = vrot.lane.b32.xlu1 %v3119_v12, %s3054_s20 }
  0xc7   :  { %264 = vrot.lane.b32.xlu0 %v3103_v7, %s3054_s20 }
  0xc8   :  { %v3291_v50 = vpop.permute.xlu2 %170  ;;  %v135_v51 = vpop.permute.xlu1 %134 }
  0xc9   :  { %5522 = vst [vmem:[#allocation10_spill] sm:$0xff] %v3291_v50  ;;  %v3293_v52 = vpop.permute.xlu0 %132  ;;  %v1953_v56 = vrot.slane %v135_v51, 4  ;;  %v1956_v60 = vsel %vm393_vm0, %v135_v51, %v1955_v53  ;;  %v1967_v51 = vrot.slane %v87_v37, 4 }
  0xca   :  { %v1964_v63 = vperm.slane %v1956_v60, %v3309_v61 }
  0xcb   :  { %v1954_v62 = vsel %vm393_vm0, %v1953_v56, %v3139_v16 }
  0xcc   :  { %v1960_v0 = vperm.slane %v1954_v62, %v3309_v61  ;;  %v2015_v56 = vrot.slane %v1964_v63, 4 }
  0xce   :  { %274 = vrot.lane.b32.xlu2 %v3129_v14, %s3054_s20  ;;  %272 = vrot.lane.b32.xlu1 %v3131_v15, %s3054_s20 }
  0xcf   :  { %270 = vrot.lane.b32.xlu0 %v3115_v10, %s3054_s20 }
  0xd0   :  { %v3302_v57 = vpop.permute.xlu2 %176  ;;  %v3304_v58 = vpop.permute.xlu1 %156 }
  0xd1   :  { %5523 = vst [vmem:[#allocation11_spill] sm:$0xff] %v3302_v57  ;;  %v3306_v59 = vpop.permute.xlu0 %154  ;;  %v2003_v57 = vrot.slane %v1960_v0, 4 }
  0xd2   :  { %5524 = vst [vmem:[#allocation12_spill] sm:$0xff] %v3304_v58 }
  0xd3   :  { %5525 = vst [vmem:[#allocation13_spill] sm:$0xff] %v3306_v59 }
  0xd6   :  { %296 = vrot.lane.b32.xlu2 %v3083_v3, %s3056_s21  ;;  %278 = vrot.lane.b32.xlu1 %v3139_v16, %s3054_s20 }
  0xd7   :  { %276 = vrot.lane.b32.xlu0 %v3127_v13, %s3054_s20 }
  0xd8   :  { %v183_v53 = vpop.permute.xlu2 %182  ;;  %v3321_v54 = vpop.permute.xlu1 %162 }
  0xd9   :  { %5526 = vst [vmem:[#allocation14_spill] sm:$0xff] %v3321_v54  ;;  %v3323_v55 = vpop.permute.xlu0 %160  ;;  %v1965_v60 = vrot.slane %v183_v53, 4  ;;  %v1968_v59 = vsel %vm393_vm0, %v183_v53, %v1967_v51 }
  0xda   :  { %5527 = vst [vmem:[#allocation15_spill] sm:$0xff] %v3323_v55  ;;  %v1976_v58 = vperm.slane %v1968_v59, %v3309_v61 }
  0xdb   :  { %v1966_v48 = vsel %vm393_vm0, %v1965_v60, %v87_v37 }
  0xdc   :  { %v1972_v62 = vperm.slane %v1966_v48, %v3309_v61  ;;  %v2013_v50 = vrot.slane %v1976_v58, 4  ;;  %v3330_v47 = vsel %vm393_vm0, %v1976_v58, %v2015_v56 }
  0xdd   :  { %5528 = vst [vmem:[#allocation16_spill] sm:$0xff] %v3330_v47 }
  0xde   :  { %302 = vrot.lane.b32.xlu2 %v3093_v5, %s3056_s21  ;;  %v2001_v54 = vrot.slane %v1972_v62, 4  ;;  %v3335_v55 = vsel %vm393_vm0, %v1972_v62, %v2003_v57  ;;  %v3338_v51 = vsel %vm393_vm0, %v2013_v50, %v1964_v63  ;;  %300 = vrot.lane.b32.xlu1 %v3081_v2, %s3056_s21  ;;  %v1123_v57 = vrot.slane %v3115_v10, 4 }
  0xdf   :  { %5529 = vst [vmem:[#allocation17_spill] sm:$0xff] %v3335_v55  ;;  %298 = vrot.lane.b32.xlu0 %v3095_v6, %s3056_s21  ;;  %v1121_v50 = vrot.slane %v127_v49, 4  ;;  %v1849_v62 = vrot.slane %v3293_v52, 4 }
  0xe0   :  { %5530 = vst [vmem:[#allocation18_spill] sm:$0xff] %v3338_v51  ;;  %v3344_v37 = vpop.permute.xlu2 %204  ;;  %v3346_v48 = vpop.permute.xlu1 %168  ;;  %v3349_v58 = vsel %vm393_vm0, %v2001_v54, %v1960_v0  ;;  %v1124_v0 = vsel %vm393_vm0, %v127_v49, %v1123_v57  ;;  %v1135_v51 = vrot.slane %v3178_v20, 4 }
  0xe1   :  { %5531 = vst [vmem:[#allocation19_spill] sm:$0xff] %v3344_v37  ;;  %v3351_v59 = vpop.permute.xlu0 %166  ;;  %v1122_v56 = vsel %vm393_vm0, %v1121_v50, %v3115_v10  ;;  %v1132_v60 = vperm.slane %v1124_v0, %v3309_v61  ;;  %v1850_v50 = vsel %vm393_vm0, %v1849_v62, %v3127_v13  ;;  %v1863_v62 = vrot.slane %v3187_v23, 4 }
  0xe2   :  { %5532 = vst [vmem:[#allocation20_spill] sm:$0xff] %v3346_v48  ;;  %v1128_v47 = vperm.slane %v1122_v56, %v3309_v61 }
  0xe3   :  { %5533 = vst [vmem:[#allocation21_spill] sm:$0xff] %v3349_v58  ;;  %v1851_v58 = vrot.slane %v3127_v13, 4  ;;  %v1183_v57 = vrot.slane %v1132_v60, 4 }
  0xe4   :  { %5534 = vst [vmem:[#allocation22_spill] sm:$0xff] %v3351_v59  ;;  %v1171_v59 = vrot.slane %v1128_v47, 4 }
  0xe6   :  { %308 = vrot.lane.b32.xlu2 %v3107_v9, %s3056_s21  ;;  %306 = vrot.lane.b32.xlu1 %v3091_v4, %s3056_s21 }
  0xe7   :  { %304 = vrot.lane.b32.xlu0 %v3079_v1, %s3056_s21 }
  0xe8   :  { %v3360_v63 = vpop.permute.xlu2 %210  ;;  %v175_v53 = vpop.permute.xlu1 %174 }
  0xe9   :  { %5535 = vst [vmem:[#allocation23_spill] sm:$0xff] %v3360_v63  ;;  %v3363_v54 = vpop.permute.xlu0 %172  ;;  %v1133_v55 = vrot.slane %v175_v53, 4  ;;  %v1136_v49 = vsel %vm393_vm0, %v175_v53, %v1135_v51  ;;  %v1852_v63 = vsel %vm393_vm0, %v3293_v52, %v1851_v58 }
  0xea   :  { %5536 = vst [vmem:[#allocation24_spill] sm:$0xff] %v3363_v54  ;;  %v1144_v0 = vperm.slane %v1136_v49, %v3309_v61  ;;  %v1856_v49 = vperm.slane %v1850_v50, %v3309_v61  ;;  %v1860_v45 = vperm.slane %v1852_v63, %v3309_v61 }
  0xeb   :  { %v1134_v51 = vsel %vm393_vm0, %v1133_v55, %v3178_v20 }
  0xec   :  { %v1140_v37 = vperm.slane %v1134_v51, %v3309_v61  ;;  %v1181_v48 = vrot.slane %v1144_v0, 4  ;;  %v3392_v46 = vsel %vm393_vm0, %v1144_v0, %v1183_v57  ;;  %v1899_v63 = vrot.slane %v1856_v49, 4 }
  0xed   :  { %5539 = vst [vmem:[#allocation27_spill] sm:$0xff] %v3392_v46 }
  0xee   :  { %314 = vrot.lane.b32.xlu2 %v3119_v12, %s3056_s21  ;;  %312 = vrot.lane.b32.xlu1 %v3103_v7, %s3056_s21  ;;  %v1169_v52 = vrot.slane %v1140_v37, 4  ;;  %v3398_v58 = vsel %vm393_vm0, %v1140_v37, %v1171_v59  ;;  %v3401_v20 = vsel %vm393_vm0, %v1181_v48, %v1132_v60  ;;  %v1911_v37 = vrot.slane %v1860_v45, 4 }
  0xef   :  { %310 = vrot.lane.b32.xlu0 %v3105_v8, %s3056_s21  ;;  %5540 = vst [vmem:[#allocation28_spill] sm:$0xff] %v3401_v20  ;;  %v1641_v20 = vrot.slane %v3259_v42, 4 }
  0xf0   :  { %v3382_v54 = vpop.permute.xlu2 %216  ;;  %v181_v56 = vpop.permute.xlu1 %180  ;;  %v3405_v51 = vsel %vm393_vm0, %v1169_v52, %v1128_v47 }
  0xf1   :  { %5537 = vst [vmem:[#allocation25_spill] sm:$0xff] %v3382_v54  ;;  %v3388_v53 = vpop.permute.xlu0 %178  ;;  %v1861_v54 = vrot.slane %v181_v56, 4  ;;  %v1864_v55 = vsel %vm393_vm0, %v181_v56, %v1863_v62 }
  0xf2   :  { %5538 = vst [vmem:[#allocation26_spill] sm:$0xff] %v3388_v53  ;;  %v1872_v48 = vperm.slane %v1864_v55, %v3309_v61 }
  0xf3   :  { %5541 = vst [vmem:[#allocation29_spill] sm:$0xff] %v3405_v51  ;;  %v1862_v57 = vsel %vm393_vm0, %v1861_v54, %v3187_v23 }
  0xf4   :  { %v1868_v59 = vperm.slane %v1862_v57, %v3309_v61  ;;  %v1909_v54 = vrot.slane %v1872_v48, 4  ;;  %v3427_v56 = vsel %vm393_vm0, %v1872_v48, %v1911_v37 }
  0xf5   :  { %5546 = vst [vmem:[#allocation34_spill] sm:$0xff] %v3427_v56  ;;  %v1747_v56 = vrot.slane %v3105_v8, 4 }
  0xf6   :  { %320 = vrot.lane.b32.xlu2 %v3131_v15, %s3056_s21  ;;  %318 = vrot.lane.b32.xlu1 %v3115_v10, %s3056_s21  ;;  %v1897_v0 = vrot.slane %v1868_v59, 4  ;;  %v3424_v23 = vsel %vm393_vm0, %v1868_v59, %v1899_v63  ;;  %v3433_v52 = vsel %vm393_vm0, %v1909_v54, %v1860_v45  ;;  %v497_v54 = vrot.slane %v3201_v27, 4 }
  0xf7   :  { %316 = vrot.lane.b32.xlu0 %v3117_v11, %s3056_s21  ;;  %5545 = vst [vmem:[#allocation33_spill] sm:$0xff] %v3424_v23 }
  0xf8   :  { %v3417_v47 = vpop.permute.xlu2 %222  ;;  %v3419_v60 = vpop.permute.xlu1 %202  ;;  %v3430_v62 = vsel %vm393_vm0, %v1897_v0, %v1856_v49  ;;  %5548 = vst [vmem:[#allocation36_spill] sm:$0xff] %v3433_v52  ;;  %v1225_v52 = vrot.slane %v3213_v30, 4 }
  0xf9   :  { %5542 = vst [vmem:[#allocation30_spill] sm:$0xff] %v3417_v47  ;;  %v3421_v50 = vpop.permute.xlu0 %200 }
  0xfa   :  { %5543 = vst [vmem:[#allocation31_spill] sm:$0xff] %v3419_v60 }
  0xfb   :  { %5544 = vst [vmem:[#allocation32_spill] sm:$0xff] %v3421_v50  ;;  %v498_v50 = vsel %vm393_vm0, %v497_v54, %v3095_v6  ;;  %v1745_v54 = vrot.slane %v3225_v33, 4 }
  0xfc   :  { %5547 = vst [vmem:[#allocation35_spill] sm:$0xff] %v3430_v62 }
  0xfe   :  { %326 = vrot.lane.b32.xlu2 %v3139_v16, %s3056_s21  ;;  %324 = vrot.lane.b32.xlu1 %v3127_v13, %s3056_s21 }
  0xff   :  { %322 = vrot.lane.b32.xlu0 %v3129_v14, %s3056_s21 }
 0x100   :  { %v3441_v55 = vpop.permute.xlu2 %228  ;;  %v3443_v57 = vpop.permute.xlu1 %208 }
 0x101   :  { %5549 = vst [vmem:[#allocation37_spill] sm:$0xff] %v3441_v55  ;;  %v3445_v63 = vpop.permute.xlu0 %206 }
 0x102   :  { %5550 = vst [vmem:[#allocation38_spill] sm:$0xff] %v3443_v57 }
 0x106   :  { %348 = vrot.lane.b32.xlu2 %v3081_v2, %s3057_s22  ;;  %346 = vrot.lane.b32.xlu1 %v3095_v6, %s3057_s22 }
 0x107   :  { %344 = vrot.lane.b32.xlu0 %v3083_v3, %s3057_s22 }
 0x108   :  { %v3453_v45 = vpop.permute.xlu2 %250  ;;  %v3455_v49 = vpop.permute.xlu1 %214 }
 0x109   :  { %5551 = vst [vmem:[#allocation39_spill] sm:$0xff] %v3453_v45  ;;  %v3457_v37 = vpop.permute.xlu0 %212  ;;  %v1019_v45 = vrot.slane %v3117_v11, 4 }
 0x10a   :  { %5552 = vst [vmem:[#allocation40_spill] sm:$0xff] %v3455_v49  ;;  %v499_v49 = vrot.slane %v3095_v6, 4  ;;  %v3502_v6 = vperm.slane %v498_v50, %v3309_v61  ;;  %v811_v50 = vrot.slane %v3081_v2, 4 }
 0x10c   :  { %v500_v60 = vsel %vm393_vm0, %v3201_v27, %v499_v49  ;;  %v1226_v49 = vsel %vm393_vm0, %v1225_v52, %v3079_v1  ;;  %v812_v32 = vsel %vm393_vm0, %v3249_v40, %v811_v50 }
 0x10d   :  { %v3505_v27 = vperm.slane %v500_v60, %v3309_v61  ;;  %v3530_v47 = vperm.slane %v1226_v49, %v3309_v61  ;;  %v1748_v60 = vsel %vm393_vm0, %v3225_v33, %v1747_v56  ;;  %v1020_v33 = vsel %vm393_vm0, %v3235_v35, %v1019_v45 }
 0x10e   :  { %354 = vrot.lane.b32.xlu2 %v3091_v4, %s3057_s22  ;;  %352 = vrot.lane.b32.xlu1 %v3079_v1, %s3057_s22 }
 0x10f   :  { %350 = vrot.lane.b32.xlu0 %v3093_v5, %s3057_s22 }
 0x110   :  { %v3465_v59 = vpop.permute.xlu2 %256  ;;  %v3467_v48 = vpop.permute.xlu1 %220 }
 0x111   :  { %5553 = vst [vmem:[#allocation41_spill] sm:$0xff] %v3465_v59  ;;  %v3469_v0 = vpop.permute.xlu0 %218 }
 0x112   :  { %5554 = vst [vmem:[#allocation42_spill] sm:$0xff] %v3467_v48  ;;  %v1227_v48 = vrot.slane %v3079_v1, 4  ;;  %v1017_v1 = vrot.slane %v3235_v35, 4 }
 0x114   :  { %v1228_v62 = vsel %vm393_vm0, %v3213_v30, %v1227_v48  ;;  %v395_v30 = vrot.slane %v3083_v3, 4  ;;  %v1539_v48 = vrot.slane %v3129_v14, 4  ;;  %v1018_v35 = vsel %vm393_vm0, %v1017_v1, %v3117_v11 }
 0x115   :  { %v3521_v52 = vperm.slane %v1228_v62, %v3309_v61  ;;  %v392_v62 = vrot.slane %v3237_v36, 4  ;;  %v913_v1 = vrot.slane %v3247_v39, 4 }
 0x116   :  { %360 = vrot.lane.b32.xlu2 %v3103_v7, %s3057_s22  ;;  %358 = vrot.lane.b32.xlu1 %v3105_v8, %s3057_s22  ;;  %v396_v56 = vsel %vm393_vm0, %v3237_v36, %v395_v30  ;;  %v3566_v30 = vperm.slane %v1020_v33, %v3309_v61  ;;  %v3582_v33 = vperm.slane %v1018_v35, %v3309_v61  ;;  %v809_v35 = vrot.slane %v3249_v40, 4 }
 0x117   :  { %356 = vrot.lane.b32.xlu0 %v3107_v9, %s3057_s22  ;;  %v394_v36 = vsel %vm393_vm0, %v392_v62, %v3083_v3  ;;  %v1540_v62 = vsel %vm393_vm0, %v3245_v38, %v1539_v48  ;;  %v914_v48 = vsel %vm393_vm0, %v913_v1, %v3093_v5  ;;  %v3638_v1 = vperm.slane %v812_v32, %v3309_v61 }
 0x118   :  { %v3479_v57 = vpop.permute.xlu2 %262  ;;  %v3481_v59 = vpop.permute.xlu1 %226  ;;  %5559 = vst [vmem:[#allocation47_spill] sm:$0xff] %v3566_v30  ;;  %v925_v32 = vrot.slane %v3269_v44, 4 }
 0x119   :  { %5555 = vst [vmem:[#allocation43_spill] sm:$0xff] %v3479_v57  ;;  %v3484_v55 = vpop.permute.xlu0 %224 }
 0x11a   :  { %5556 = vst [vmem:[#allocation44_spill] sm:$0xff] %v3481_v59  ;;  %v3058_v59 = vmov 1934713408  }
 0x11e   :  { %366 = vrot.lane.b32.xlu2 %v3115_v10, %s3057_s22  ;;  %364 = vrot.lane.b32.xlu1 %v3117_v11, %s3057_s22  ;;  %v446_v10 = vunpack.c.l.s4 %v3058_v59  ;;  %v3551_v59 = vperm.slane %v1748_v60, %v3309_v61  ;;  %v3569_v60 = vperm.slane %v396_v56, %v3309_v61  ;;  %v1537_v11 = vrot.slane %v3245_v38, 4 }
 0x11f   :  { %362 = vrot.lane.b32.xlu0 %v3119_v12, %s3057_s22  ;;  %v3585_v56 = vperm.slane %v394_v36, %v3309_v61 }
 0x120   :  { %v3525_v57 = vpop.permute.xlu2 %268  ;;  %v3527_v23 = vpop.permute.xlu1 %248  ;;  %v3553_v53 = vunpack.c.0.s8 %v446_v10  ;;  %v1643_v10 = vrot.slane %v3107_v9, 4  ;;  %v455_v3 = vrot.slane %v3569_v60, 4  ;;  %v1538_v38 = vsel %vm393_vm0, %v1537_v11, %v3129_v14 }
 0x121   :  { %5557 = vst [vmem:[#allocation45_spill] sm:$0xff] %v3525_v57  ;;  %v3536_v51 = vpop.permute.xlu0 %230  ;;  %v1746_v57 = vsel %vm393_vm0, %v1745_v54, %v3105_v8  ;;  %v1331_v8 = vrot.slane %v3091_v4, 4  ;;  %v3635_v11 = vperm.slane %v914_v48, %v3309_v61 }
 0x122   :  { %5558 = vst [vmem:[#allocation46_spill] sm:$0xff] %v3527_v23  ;;  %v915_v23 = vrot.slane %v3093_v5, 4  ;;  %v3558_v49 = vperm.slane %v1746_v57, %v3309_v61  ;;  %v707_v57 = vrot.slane %v3119_v12, 4  ;;  %v810_v5 = vsel %vm393_vm0, %v809_v35, %v3081_v2 }
 0x123   :  { %v1644_v50 = vsel %vm393_vm0, %v3259_v42, %v1643_v10  ;;  %v1642_v2 = vsel %vm393_vm0, %v1641_v20, %v3107_v9  ;;  %v1332_v42 = vsel %vm393_vm0, %v3261_v43, %v1331_v8  ;;  %v3648_v10 = vperm.slane %v810_v5, %v3309_v61 }
 0x126   :  { %372 = vrot.lane.b32.xlu2 %v3127_v13, %s3057_s22  ;;  %370 = vrot.lane.b32.xlu1 %v3129_v14, %s3057_s22  ;;  %v405_v13 = vrot.slane %v3257_v41, 4 }
 0x127   :  { %368 = vrot.lane.b32.xlu0 %v3131_v15, %s3057_s22 }
 0x128   :  { %v3590_v45 = vpop.permute.xlu2 %274  ;;  %v3592_v54 = vpop.permute.xlu1 %254 }
 0x129   :  { %5560 = vst [vmem:[#allocation48_spill] sm:$0xff] %v3590_v45  ;;  %v3599_v36 = vpop.permute.xlu0 %252  ;;  %v916_v45 = vsel %vm393_vm0, %v3247_v39, %v915_v23  ;;  %v443_v39 = vrot.slane %v3585_v56, 4  ;;  %v3619_v23 = vperm.slane %v1540_v62, %v3309_v61  ;;  %v3651_v62 = vperm.slane %v1644_v50, %v3309_v61 }
 0x12a   :  { %5561 = vst [vmem:[#allocation49_spill] sm:$0xff] %v3592_v54  ;;  %v5562_v54 = vrot.slane %v3182_v22, 4  ;;  %v3624_v14 = vperm.slane %v916_v45, %v3309_v61  ;;  %v963_v50 = vrot.slane %v3635_v11, 4 }
 0x12b   :  { %5563 = vst [vmem:[#allocation50_spill] sm:$0xff] %v3619_v23 }
 0x12c   :  { %v408_v46 = vsel %vm393_vm0, %v3257_v41, %v5562_v54  ;;  %v406_v41 = vsel %vm393_vm0, %v405_v13, %v3182_v22  ;;  %v3632_v54 = vperm.slane %v1538_v38, %v3309_v61  ;;  %v5565_v13 = vrot.slane %v3189_v24, 4 }
 0x12d   :  { %v416_v40 = vperm.slane %v408_v46, %v3309_v61  ;;  %v412_v45 = vperm.slane %v406_v41, %v3309_v61  ;;  %v1329_v46 = vrot.slane %v3261_v43, 4  ;;  %v975_v8 = vrot.slane %v3624_v14, 4 }
 0x12e   :  { %5564 = vst [vmem:[#allocation51_spill] sm:$0xff] %v3632_v54  ;;  %v928_v35 = vsel %vm393_vm0, %v3269_v44, %v5565_v13  ;;  %v3672_v44 = vperm.slane %v1642_v2, %v3309_v61  ;;  %v1703_v2 = vrot.slane %v3651_v62, 4  ;;  %v5572_v54 = vld [vmem:[#allocation8_spill] sm:$0xff] }
 0x12f   :  { %374 = vrot.lane.b32.xlu0 %v3139_v16, %s3057_s22  ;;  %v453_v38 = vrot.slane %v416_v40, 4  ;;  %v3667_v48 = vsel %vm393_vm0, %v416_v40, %v455_v3  ;;  %v3675_v16 = vperm.slane %v1332_v42, %v3309_v61  ;;  %v441_v13 = vrot.slane %v412_v45, 4 }
 0x130   :  { %v3660_v9 = vpop.permute.xlu2 %296  ;;  %v3662_v20 = vpop.permute.xlu1 %260  ;;  %5567 = vst [vmem:[#allocation53_spill] sm:$0xff] %v3667_v48  ;;  %v1330_v43 = vsel %vm393_vm0, %v1329_v46, %v3091_v4  ;;  %v936_v30 = vperm.slane %v928_v35, %v3309_v61  ;;  %v926_v42 = vsel %vm393_vm0, %v925_v32, %v3189_v24  ;;  %v3690_v5 = vsel %vm393_vm0, %v412_v45, %v443_v39  ;;  %v5570_v46 = vld [vmem:[#allocation6_spill] sm:$0xff]  ;;  %v5571_v24 = vld [vmem:[#allocation7_spill] sm:$0xff] }
 0x131   :  { %5566 = vst [vmem:[#allocation52_spill] sm:$0xff] %v3662_v20  ;;  %v3681_v3 = vpop.permute.xlu0 %258  ;;  %v3694_v4 = vsel %vm393_vm0, %v453_v38, %v3569_v60  ;;  %v705_v35 = vrot.slane %v5570_v46, 4  ;;  %v708_v40 = vsel %vm393_vm0, %v5570_v46, %v707_v57  ;;  %v1691_v22 = vrot.slane %v3672_v44, 4 }
 0x132   :  { %5568 = vst [vmem:[#allocation54_spill] sm:$0xff] %v3690_v5  ;;  %v3701_v41 = vperm.slane %v1330_v43, %v3309_v61  ;;  %v601_v32 = vrot.slane %v5571_v24, 4  ;;  %v3707_v39 = vsel %vm393_vm0, %v441_v13, %v3585_v56  ;;  %v932_v60 = vperm.slane %v926_v42, %v3309_v61 }
 0x133   :  { %5569 = vst [vmem:[#allocation55_spill] sm:$0xff] %v3694_v4  ;;  %v973_v45 = vrot.slane %v936_v30, 4  ;;  %v939_v38 = vrot.slane %v3445_v63, 4  ;;  %v3716_v46 = vperm.slane %v708_v40, %v3309_v61  ;;  %v1653_v23 = vrot.slane %v5572_v54, 4 }
 0x134   :  { %v706_v56 = vsel %vm393_vm0, %v705_v35, %v3119_v12  ;;  %v5574_v13 = vrot.slane %v3203_v28, 4  ;;  %v3734_v4 = vsel %vm393_vm0, %v936_v30, %v975_v8  ;;  %v602_v12 = vsel %vm393_vm0, %v601_v32, %v3103_v7 }
 0x135   :  { %5575 = vst [vmem:[#allocation7_spill] sm:$0xff] %v3734_v4  ;;  %v3739_v35 = vsel %vm393_vm0, %v932_v60, %v963_v50  ;;  %v961_v40 = vrot.slane %v932_v60, 4  ;;  %v3751_v30 = vperm.slane %v706_v56, %v3309_v61  ;;  %v1654_v8 = vsel %vm393_vm0, %v1653_v23, %v3203_v28  ;;  %v5588_v4 = vld [vmem:[#allocation12_spill] sm:$0xff] }
 0x136   :  { %v1656_v42 = vsel %vm393_vm0, %v5572_v54, %v5574_v13  ;;  %5576 = vst [vmem:[#allocation8_spill] sm:$0xff] %v3739_v35  ;;  %v3743_v54 = vsel %vm393_vm0, %v973_v45, %v3624_v14  ;;  %v767_v14 = vrot.slane %v3716_v46, 4  ;;  %v5579_v45 = vrot.slane %v3103_v7, 4 }
 0x137   :  { %5577 = vst [vmem:[#allocation56_spill] sm:$0xff] %v3743_v54  ;;  %v1664_v50 = vperm.slane %v1656_v42, %v3309_v61  ;;  %v3771_v23 = vperm.slane %v602_v12, %v3309_v61  ;;  %v5581_v42 = vrot.slane %v3131_v15, 4  ;;  %v5582_v32 = vrot.slane %v3215_v31, 4 }
 0x138   :  { %v303_v20 = vpop.permute.xlu2 %302  ;;  %v3719_v48 = vpop.permute.xlu1 %266  ;;  %v1667_v28 = vrot.slane %v3457_v37, 4  ;;  %v3787_v12 = vsel %vm393_vm0, %v961_v40, %v3635_v11  ;;  %v821_v35 = vrot.slane %v5588_v4, 4 }
 0x139   :  { %5573 = vst [vmem:[#allocation6_spill] sm:$0xff] %v3719_v48  ;;  %v937_v57 = vrot.slane %v303_v20, 4  ;;  %v3728_v5 = vsel %vm393_vm0, %v303_v20, %v939_v38  ;;  %v5578_v20 = vld [vmem:[#allocation10_spill] sm:$0xff]  ;;  %v3764_v43 = vpop.permute.xlu0 %264  ;;  %v755_v48 = vrot.slane %v3751_v30, 4  ;;  %v3804_v11 = vsel %vm393_vm0, %v1664_v50, %v1703_v2 }
 0x13a   :  { %v717_v38 = vrot.slane %v5578_v20, 4  ;;  %v720_v56 = vsel %vm393_vm0, %v5578_v20, %v5582_v32  ;;  %5583 = vst [vmem:[#allocation10_spill] sm:$0xff] %v3787_v12  ;;  %v5594_v2 = vrot.slane %v3227_v34, 4 }
 0x13b   :  { %v3748_v13 = vsel %vm393_vm0, %v937_v57, %v3445_v63  ;;  %v604_v63 = vsel %vm393_vm0, %v5571_v24, %v5579_v45  ;;  %v5580_v57 = vld [vmem:[#allocation9_spill] sm:$0xff]  ;;  %v1660_v24 = vperm.slane %v1654_v8, %v3309_v61  ;;  %v1701_v8 = vrot.slane %v1664_v50, 4  ;;  %5587 = vst [vmem:[#allocation59_spill] sm:$0xff] %v3804_v11 }
 0x13c   :  { %v1433_v60 = vrot.slane %v5580_v57, 4  ;;  %v1436_v7 = vsel %vm393_vm0, %v5580_v57, %v5581_v42  ;;  %v718_v45 = vsel %vm393_vm0, %v717_v38, %v3215_v31  ;;  %v3791_v57 = vperm.slane %v604_v63, %v3309_v61 }
 0x13d   :  { %v3798_v20 = vperm.slane %v1436_v7, %v3309_v61  ;;  %v724_v40 = vperm.slane %v718_v45, %v3309_v61  ;;  %v728_v63 = vperm.slane %v720_v56, %v3309_v61  ;;  %v1689_v50 = vrot.slane %v1660_v24, 4 }
 0x13e   :  { %v1434_v31 = vsel %vm393_vm0, %v1433_v60, %v3131_v15  ;;  %v3813_v60 = vsel %vm393_vm0, %v1660_v24, %v1691_v22  ;;  %v3822_v56 = vsel %vm393_vm0, %v1701_v8, %v3651_v62 }
 0x13f   :  { %5585 = vst [vmem:[#allocation57_spill] sm:$0xff] %v3798_v20  ;;  %v3825_v7 = vperm.slane %v1434_v31, %v3309_v61  ;;  %v1495_v22 = vrot.slane %v3798_v20, 4  ;;  %v753_v62 = vrot.slane %v724_v40, 4  ;;  %v765_v8 = vrot.slane %v728_v63, 4  ;;  %v5595_v20 = vld [vmem:[#allocation13_spill] sm:$0xff] }
 0x140   :  { %v309_v42 = vpop.permute.xlu2 %308  ;;  %v3793_v54 = vpop.permute.xlu1 %272  ;;  %5589 = vst [vmem:[#allocation12_spill] sm:$0xff] %v3813_v60  ;;  %v822_v31 = vsel %vm393_vm0, %v821_v35, %v3180_v21  ;;  %v509_v11 = vrot.slane %v5595_v20, 4  ;;  %v3851_v24 = vsel %vm393_vm0, %v1689_v50, %v3672_v44  ;;  %v3855_v35 = vsel %vm393_vm0, %v728_v63, %v767_v14 }
 0x141   :  { %5584 = vst [vmem:[#allocation9_spill] sm:$0xff] %v3793_v54  ;;  %v1665_v38 = vrot.slane %v309_v42, 4  ;;  %v3801_v32 = vsel %vm393_vm0, %v309_v42, %v1667_v28  ;;  %v5592_v42 = vld [vmem:[#allocation11_spill] sm:$0xff]  ;;  %v3868_v44 = vsel %vm393_vm0, %v753_v62, %v3751_v30  ;;  %v3871_v14 = vsel %vm393_vm0, %v724_v40, %v755_v48 }
 0x142   :  { %5586 = vst [vmem:[#allocation58_spill] sm:$0xff] %v3801_v32  ;;  %v1445_v54 = vrot.slane %v5592_v42, 4  ;;  %v1448_v15 = vsel %vm393_vm0, %v5592_v42, %v5594_v2  ;;  %v828_v42 = vperm.slane %v822_v31, %v3309_v61  ;;  %v3875_v63 = vsel %vm393_vm0, %v765_v8, %v3716_v46 }
 0x143   :  { %v3817_v28 = vsel %vm393_vm0, %v1665_v38, %v3457_v37  ;;  %5590 = vst [vmem:[#allocation60_spill] sm:$0xff] %v3822_v56  ;;  %v5593_v37 = vrot.slane %v3180_v21, 4  ;;  %v1483_v21 = vrot.slane %v3825_v7, 4  ;;  %v510_v50 = vsel %vm393_vm0, %v509_v11, %v3191_v25 }
 0x144   :  { %5591 = vst [vmem:[#allocation61_spill] sm:$0xff] %v3825_v7  ;;  %v1446_v2 = vsel %vm393_vm0, %v1445_v54, %v3227_v34  ;;  %v3878_v34 = vperm.slane %v1448_v15, %v3309_v61  ;;  %v5607_v15 = vrot.slane %v3191_v25, 4  ;;  %v516_v25 = vperm.slane %v510_v50, %v3309_v61 }
 0x145   :  { %v824_v38 = vsel %vm393_vm0, %v5588_v4, %v5593_v37  ;;  %v731_v4 = vrot.slane %v3469_v0, 4  ;;  %v3847_v37 = vpop.permute.xlu0 %270  ;;  %5596 = vst [vmem:[#allocation11_spill] sm:$0xff] %v3851_v24  ;;  %v3892_v46 = vperm.slane %v1446_v2, %v3309_v61  ;;  %v5609_v2 = vld [vmem:[#allocation15_spill] sm:$0xff]  ;;  %v5610_v11 = vrot.slane %v3168_v18, 4 }
 0x146   :  { %5597 = vst [vmem:[#allocation13_spill] sm:$0xff] %v3855_v35  ;;  %v832_v45 = vperm.slane %v824_v38, %v3309_v61  ;;  %v512_v62 = vsel %vm393_vm0, %v5595_v20, %v5607_v15  ;;  %v1237_v20 = vrot.slane %v5609_v2, 4  ;;  %v1459_v31 = vrot.slane %v3484_v55, 4 }
 0x147   :  { %5600 = vst [vmem:[#allocation64_spill] sm:$0xff] %v3868_v44  ;;  %v520_v15 = vperm.slane %v512_v62, %v3309_v61 }
 0x148   :  { %v315_v56 = vpop.permute.xlu2 %314  ;;  %v3864_v32 = vpop.permute.xlu1 %278  ;;  %5601 = vst [vmem:[#allocation65_spill] sm:$0xff] %v3871_v14  ;;  %v869_v40 = vrot.slane %v832_v45, 4 }
 0x149   :  { %v729_v60 = vrot.slane %v315_v56, 4  ;;  %v3862_v12 = vsel %vm393_vm0, %v315_v56, %v731_v4  ;;  %5599 = vst [vmem:[#allocation63_spill] sm:$0xff] %v3864_v32  ;;  %v5604_v56 = vld [vmem:[#allocation14_spill] sm:$0xff]  ;;  %v3907_v4 = vsel %vm393_vm0, %v3878_v34, %v1495_v22  ;;  %v5611_v22 = vrot.slane %v3648_v10, 4 }
 0x14a   :  { %5598 = vst [vmem:[#allocation62_spill] sm:$0xff] %v3862_v12  ;;  %v1341_v38 = vrot.slane %v5604_v56, 4  ;;  %v3927_v62 = vsel %vm393_vm0, %v869_v40, %v3638_v1  ;;  %v557_v32 = vrot.slane %v520_v15, 4 }
 0x14b   :  { %5602 = vst [vmem:[#allocation66_spill] sm:$0xff] %v3875_v63  ;;  %v3887_v30 = vsel %vm393_vm0, %v729_v60, %v3469_v0  ;;  %v857_v60 = vrot.slane %v828_v42, 4  ;;  %v1344_v0 = vsel %vm393_vm0, %v5604_v56, %v5610_v11  ;;  %v3923_v50 = vsel %vm393_vm0, %v828_v42, %v5611_v22 }
 0x14c   :  { %5603 = vst [vmem:[#allocation67_spill] sm:$0xff] %v3878_v34  ;;  %v1342_v48 = vsel %vm393_vm0, %v1341_v38, %v3168_v18  ;;  %v5612_v38 = vrot.slane %v3638_v1, 4  ;;  %v5613_v11 = vrot.slane %v3163_v17, 4  ;;  %v545_v1 = vrot.slane %v516_v25, 4 }
 0x14d   :  { %5605 = vst [vmem:[#allocation14_spill] sm:$0xff] %v3887_v30  ;;  %v3936_v56 = vsel %vm393_vm0, %v857_v60, %v3648_v10  ;;  %v3942_v22 = vpop.permute.xlu0 %276  ;;  %v1238_v10 = vsel %vm393_vm0, %v1237_v20, %v3163_v17  ;;  %v3953_v60 = vsel %vm393_vm0, %v3892_v46, %v1483_v21  ;;  %v5618_v17 = vrot.slane %v3505_v27, 4  ;;  %v5619_v20 = vld [vmem:[#allocation20_spill] sm:$0xff] }
 0x14e   :  { %5606 = vst [vmem:[#allocation68_spill] sm:$0xff] %v3892_v46  ;;  %v3932_v18 = vsel %vm393_vm0, %v832_v45, %v5612_v38  ;;  %v1240_v42 = vsel %vm393_vm0, %v5609_v2, %v5613_v11  ;;  %v1348_v45 = vperm.slane %v1342_v48, %v3309_v61  ;;  %v1352_v38 = vperm.slane %v1344_v0, %v3309_v61 }
 0x14f   :  { %5608 = vst [vmem:[#allocation69_spill] sm:$0xff] %v3907_v4  ;;  %v5616_v2 = vrot.slane %v3502_v6, 4  ;;  %v1248_v21 = vperm.slane %v1240_v42, %v3309_v61  ;;  %v613_v4 = vrot.slane %v5619_v20, 4  ;;  %v3982_v0 = vsel %vm393_vm0, %v545_v1, %v3502_v6 }
 0x150   :  { %v321_v54 = vpop.permute.xlu2 %320  ;;  %5615 = vst [vmem:[#allocation70_spill] sm:$0xff] %v3953_v60  ;;  %v301_v48 = vpop.permute.xlu1 %300  ;;  %v1377_v42 = vrot.slane %v1348_v45, 4  ;;  %v5620_v60 = vld [vmem:[#allocation19_spill] sm:$0xff]  ;;  %v5621_v46 = vrot.slane %v3701_v41, 4  ;;  %v5622_v1 = vrot.slane %v3675_v16, 4  ;;  %v5625_v34 = vrot.slane %v3521_v52, 4 }
 0x151   :  { %v1457_v8 = vrot.slane %v321_v54, 4  ;;  %v3945_v40 = vsel %vm393_vm0, %v321_v54, %v1459_v31  ;;  %v3958_v11 = vsel %vm393_vm0, %v516_v25, %v5616_v2  ;;  %v3969_v31 = vsel %vm393_vm0, %v520_v15, %v5618_v17 }
 0x152   :  { %5614 = vst [vmem:[#allocation15_spill] sm:$0xff] %v3945_v40  ;;  %v1244_v2 = vperm.slane %v1238_v10, %v3309_v61  ;;  %v1389_v17 = vrot.slane %v1352_v38, 4  ;;  %v3988_v25 = vsel %vm393_vm0, %v557_v32, %v3505_v27  ;;  %v1979_v10 = vrot.slane %v3536_v51, 4 }
 0x153   :  { %v3962_v54 = vsel %vm393_vm0, %v1457_v8, %v3484_v55  ;;  %v835_v8 = vrot.slane %v5620_v60, 4  ;;  %v3997_v6 = vsel %vm393_vm0, %v1348_v45, %v5621_v46  ;;  %v4002_v15 = vsel %vm393_vm0, %v1352_v38, %v5622_v1 }
 0x154   :  { %5617 = vst [vmem:[#allocation71_spill] sm:$0xff] %v3962_v54  ;;  %v1285_v7 = vrot.slane %v1248_v21, 4  ;;  %v614_v27 = vsel %vm393_vm0, %v613_v4, %v3173_v19  ;;  %v1273_v55 = vrot.slane %v1244_v2, 4  ;;  %v833_v35 = vrot.slane %v301_v48, 4 }
 0x155   :  { %v4013_v45 = vsel %vm393_vm0, %v1377_v42, %v3701_v41  ;;  %v4017_v38 = vsel %vm393_vm0, %v1389_v17, %v3675_v16  ;;  %v5624_v4 = vrot.slane %v3173_v19, 4  ;;  %v836_v46 = vsel %vm393_vm0, %v301_v48, %v835_v8  ;;  %v4030_v41 = vpop.permute.xlu0 %298 }
 0x156   :  { %v4049_v48 = vsel %vm393_vm0, %v1273_v55, %v3530_v47  ;;  %v834_v8 = vsel %vm393_vm0, %v833_v35, %v5620_v60  ;;  %v844_v55 = vperm.slane %v836_v46, %v3309_v61  ;;  %v5629_v35 = vld [vmem:[#allocation22_spill] sm:$0xff]  ;;  %v5630_v46 = vrot.slane %v3199_v26, 4 }
 0x157   :  { %v616_v1 = vsel %vm393_vm0, %v5619_v20, %v5624_v4  ;;  %v1757_v60 = vrot.slane %v5629_v35, 4  ;;  %v840_v19 = vperm.slane %v834_v8, %v3309_v61 }
 0x158   :  { %v327_v32 = vpop.permute.xlu2 %326  ;;  %v307_v17 = vpop.permute.xlu1 %306 }
 0x159   :  { %v1977_v63 = vrot.slane %v327_v32, 4  ;;  %v4007_v44 = vsel %vm393_vm0, %v327_v32, %v1979_v10  ;;  %v4026_v10 = vsel %vm393_vm0, %v1248_v21, %v5625_v34  ;;  %v620_v32 = vperm.slane %v614_v27, %v3309_v61 }
 0x15a   :  { %5623 = vst [vmem:[#allocation20_spill] sm:$0xff] %v4007_v44  ;;  %v5627_v21 = vrot.slane %v3530_v47, 4  ;;  %v1758_v8 = vsel %vm393_vm0, %v1757_v60, %v3199_v26 }
 0x15b   :  { %v4034_v16 = vsel %vm393_vm0, %v1977_v63, %v3536_v51  ;;  %v4053_v51 = vsel %vm393_vm0, %v1285_v7, %v3521_v52  ;;  %v624_v63 = vperm.slane %v616_v1, %v3309_v61  ;;  %v5628_v7 = vrot.slane %v3771_v23, 4 }
 0x15c   :  { %5626 = vst [vmem:[#allocation19_spill] sm:$0xff] %v4034_v16  ;;  %v4045_v42 = vsel %vm393_vm0, %v1244_v2, %v5627_v21  ;;  %v847_v1 = vrot.slane %v3599_v36, 4  ;;  %v1760_v52 = vsel %vm393_vm0, %v5629_v35, %v5630_v46  ;;  %v5631_v21 = vrot.slane %v3791_v57, 4  ;;  %v5632_v35 = vld [vmem:[#allocation23_spill] sm:$0xff] }
 0x15d   :  { %v4070_v4 = vsel %vm393_vm0, %v620_v32, %v5628_v7  ;;  %v649_v7 = vrot.slane %v620_v32, 4  ;;  %v661_v27 = vrot.slane %v624_v63, 4  ;;  %v895_v16 = vrot.slane %v844_v55, 4  ;;  %v4105_v60 = vpop.permute.xlu0 %304 }
 0x15e   :  { %v4089_v47 = vsel %vm393_vm0, %v624_v63, %v5631_v21  ;;  %v1355_v32 = vrot.slane %v5632_v35, 4  ;;  %v1353_v46 = vrot.slane %v307_v17, 4  ;;  %v5633_v21 = vld [vmem:[#allocation24_spill] sm:$0xff] }
 0x15f   :  { %v4101_v63 = vsel %vm393_vm0, %v649_v7, %v3771_v23  ;;  %v1029_v26 = vrot.slane %v5633_v21, 4  ;;  %v4117_v30 = vsel %vm393_vm0, %v661_v27, %v3791_v57 }
 0x160   :  { %v349_v2 = vpop.permute.xlu2 %348  ;;  %v313_v7 = vpop.permute.xlu1 %312 }
 0x161   :  { %v845_v34 = vrot.slane %v349_v2, 4  ;;  %v848_v20 = vsel %vm393_vm0, %v349_v2, %v847_v1  ;;  %v883_v1 = vrot.slane %v840_v19, 4  ;;  %v1030_v27 = vsel %vm393_vm0, %v1029_v26, %v3211_v29 }
 0x162   :  { %v856_v14 = vperm.slane %v848_v20, %v3309_v61  ;;  %v1768_v20 = vperm.slane %v1760_v52, %v3309_v61 }
 0x163   :  { %v846_v2 = vsel %vm393_vm0, %v845_v34, %v3599_v36  ;;  %v1356_v36 = vsel %vm393_vm0, %v307_v17, %v1355_v32 }
 0x164   :  { %v852_v44 = vperm.slane %v846_v2, %v3309_v61  ;;  %v893_v40 = vrot.slane %v856_v14, 4  ;;  %v896_v54 = vsel %vm393_vm0, %v856_v14, %v895_v16  ;;  %v1354_v14 = vsel %vm393_vm0, %v1353_v46, %v5632_v35 }
 0x165   :  { %v904_v12 = vperm.slane %v896_v54, %v3553_v53  ;;  %v1805_v57 = vrot.slane %v1768_v20, 4  ;;  %v1360_v46 = vperm.slane %v1354_v14, %v3309_v61  ;;  %v5640_v14 = vrot.slane %v3551_v59, 4 }
 0x166   :  { %v881_v34 = vrot.slane %v852_v44, 4  ;;  %v884_v2 = vsel %vm393_vm0, %v852_v44, %v883_v1  ;;  %v894_v24 = vsel %vm393_vm0, %v893_v40, %v844_v55  ;;  %v1764_v44 = vperm.slane %v1758_v8, %v3309_v61 }
 0x167   :  { %v892_v23 = vperm.slane %v884_v2, %v3553_v53  ;;  %v900_v16 = vperm.slane %v894_v24, %v3553_v53  ;;  %v911_v52 = vrot.slane %v904_v12, 4  ;;  %v5634_v12 = vperm.slane %v3932_v18, %v3553_v53 }
 0x168   :  { %v882_v40 = vsel %vm393_vm0, %v881_v34, %v840_v19  ;;  %v355_v17 = vpop.permute.xlu2 %354  ;;  %v1364_v8 = vperm.slane %v1356_v36, %v3309_v61  ;;  %v5636_v1 = vperm.slane %v3923_v50, %v3553_v53  ;;  %v5638_v18 = vperm.slane %v3927_v62, %v3553_v53 }
 0x169   :  { %v888_v55 = vperm.slane %v882_v40, %v3553_v53  ;;  %v907_v35 = vrot.slane %v892_v23, 4  ;;  %v909_v32 = vrot.slane %v900_v16, 4  ;;  %v4128_v24 = vsel %vm393_vm0, %v911_v52, %v5634_v12 }
 0x16a   :  { %5635 = vst [vmem:[#allocation22_spill] sm:$0xff] %v4128_v24  ;;  %v1365_v23 = vrot.slane %v355_v17, 4  ;;  %v4153_v50 = vsel %vm393_vm0, %v1768_v20, %v5640_v14  ;;  %v1367_v16 = vrot.slane %v3681_v3, 4  ;;  %v5641_v52 = vrot.slane %v3558_v49, 4 }
 0x16b   :  { %v905_v19 = vrot.slane %v888_v55, 4  ;;  %v4138_v34 = vsel %vm393_vm0, %v907_v35, %v5636_v1  ;;  %v4144_v2 = vsel %vm393_vm0, %v909_v32, %v5638_v18  ;;  %v5642_v40 = vrot.slane %v3211_v29, 4 }
 0x16c   :  { %5637 = vst [vmem:[#allocation23_spill] sm:$0xff] %v4138_v34  ;;  %v4159_v62 = vsel %vm393_vm0, %v1764_v44, %v5641_v52  ;;  %v5643_v35 = vperm.slane %v3936_v56, %v3553_v53  ;;  %v1366_v20 = vsel %vm393_vm0, %v1365_v23, %v3681_v3  ;;  %v1793_v12 = vrot.slane %v1764_v44, 4  ;;  %v4179_v52 = vpop.permute.xlu0 %310  ;;  %v5646_v3 = vld [vmem:[#allocation25_spill] sm:$0xff] }
 0x16d   :  { %5639 = vst [vmem:[#allocation24_spill] sm:$0xff] %v4144_v2  ;;  %v1032_v55 = vsel %vm393_vm0, %v5633_v21, %v5642_v40  ;;  %v4175_v1 = vsel %vm393_vm0, %v1805_v57, %v3551_v59  ;;  %v1036_v18 = vperm.slane %v1030_v27, %v3309_v61  ;;  %v1368_v29 = vsel %vm393_vm0, %v355_v17, %v1367_v16  ;;  %v319_v40 = vpop.permute.xlu1 %318 }
 0x16e   :  { %v4169_v32 = vsel %vm393_vm0, %v905_v19, %v5643_v35  ;;  %5645 = vst [vmem:[#allocation73_spill] sm:$0xff] %v4175_v1  ;;  %v1403_v14 = vrot.slane %v1360_v46, 4  ;;  %v1415_v21 = vrot.slane %v1364_v8, 4  ;;  %v1372_v56 = vperm.slane %v1366_v20, %v3309_v61 }
 0x16f   :  { %5644 = vst [vmem:[#allocation72_spill] sm:$0xff] %v4169_v32  ;;  %v1376_v19 = vperm.slane %v1368_v29, %v3309_v61  ;;  %v1040_v59 = vperm.slane %v1032_v55, %v3309_v61  ;;  %v625_v57 = vrot.slane %v313_v7, 4  ;;  %v4192_v35 = vsel %vm393_vm0, %v1793_v12, %v3558_v49 }
 0x170   :  { %v1401_v27 = vrot.slane %v1372_v56, 4  ;;  %v1404_v17 = vsel %vm393_vm0, %v1372_v56, %v1403_v14  ;;  %v1065_v55 = vrot.slane %v1036_v18, 4  ;;  %v627_v36 = vrot.slane %v5646_v3, 4 }
 0x171   :  { %v1413_v23 = vrot.slane %v1376_v19, 4  ;;  %v1416_v16 = vsel %vm393_vm0, %v1376_v19, %v1415_v21  ;;  %v1412_v29 = vperm.slane %v1404_v17, %v3553_v53  ;;  %v361_v21 = vpop.permute.xlu2 %360  ;;  %v5647_v20 = vrot.slane %v3582_v33, 4 }
 0x172   :  { %v1424_v44 = vperm.slane %v1416_v16, %v3553_v53  ;;  %v1402_v14 = vsel %vm393_vm0, %v1401_v27, %v1360_v46  ;;  %v1077_v16 = vrot.slane %v1040_v59, 4  ;;  %v626_v54 = vsel %vm393_vm0, %v625_v57, %v5646_v3 }
 0x173   :  { %v1414_v56 = vsel %vm393_vm0, %v1413_v23, %v1364_v8  ;;  %v1408_v19 = vperm.slane %v1402_v14, %v3553_v53  ;;  %v1427_v12 = vrot.slane %v1412_v29, 4  ;;  %v4206_v17 = vsel %vm393_vm0, %v1036_v18, %v5647_v20 }
 0x174   :  { %v1420_v49 = vperm.slane %v1414_v56, %v3553_v53  ;;  %v1431_v26 = vrot.slane %v1424_v44, 4  ;;  %5648 = vst [vmem:[#allocation25_spill] sm:$0xff] %v4206_v17  ;;  %v628_v46 = vsel %vm393_vm0, %v313_v7, %v627_v36  ;;  %v5649_v8 = vperm.slane %v3997_v6, %v3553_v53  ;;  %v5653_v36 = vld [vmem:[#allocation27_spill] sm:$0xff] }
 0x175   :  { %v1425_v27 = vrot.slane %v1408_v19, 4  ;;  %v5651_v44 = vperm.slane %v4002_v15, %v3553_v53  ;;  %v637_v6 = vrot.slane %v361_v21, 4  ;;  %v632_v57 = vperm.slane %v626_v54, %v3309_v61 }
 0x176   :  { %v4215_v23 = vsel %vm393_vm0, %v1427_v12, %v5649_v8  ;;  %v1429_v29 = vrot.slane %v1420_v49, 4  ;;  %v636_v14 = vperm.slane %v628_v46, %v3309_v61  ;;  %v5654_v15 = vperm.slane %v4013_v45, %v3553_v53  ;;  %v5658_v49 = vld [vmem:[#allocation28_spill] sm:$0xff]  ;;  %v5659_v8 = vld [vmem:[#allocation26_spill] sm:$0xff]  ;;  %v4249_v45 = vpop.permute.xlu0 %316  ;;  %v5663_v12 = vld [vmem:[#allocation5_spill] sm:$0xff] }
 0x177   :  { %5650 = vst [vmem:[#allocation74_spill] sm:$0xff] %v4215_v23  ;;  %v4221_v18 = vsel %vm393_vm0, %v1431_v26, %v5651_v44  ;;  %v5656_v56 = vperm.slane %v4017_v38, %v3553_v53  ;;  %v1549_v46 = vrot.slane %v5659_v8, 4  ;;  %v639_v44 = vrot.slane %v3764_v43, 4 }
 0x178   :  { %5652 = vst [vmem:[#allocation75_spill] sm:$0xff] %v4221_v18  ;;  %v4235_v26 = vsel %vm393_vm0, %v1425_v27, %v5654_v15  ;;  %v5660_v27 = vld [vmem:[#allocation29_spill] sm:$0xff]  ;;  %v4255_v38 = vsel %vm393_vm0, %v1065_v55, %v3582_v33  ;;  %v5664_v3 = vrot.slane %v5663_v12, 4  ;;  %v1145_v18 = vrot.slane %v319_v40, 4  ;;  %v4273_v55 = vpop.permute.xlu1 %324 }
 0x179   :  { %5655 = vst [vmem:[#allocation27_spill] sm:$0xff] %v4235_v26  ;;  %v4241_v19 = vsel %vm393_vm0, %v1429_v29, %v5656_v56  ;;  %v5661_v29 = vld [vmem:[#allocation47_spill] sm:$0xff]  ;;  %v638_v15 = vsel %vm393_vm0, %v637_v6, %v3764_v43  ;;  %v640_v33 = vsel %vm393_vm0, %v361_v21, %v639_v44  ;;  %v5666_v26 = vld [vmem:[#allocation34_spill] sm:$0xff]  ;;  %v367_v21 = vpop.permute.xlu2 %366 }
 0x17a   :  { %5657 = vst [vmem:[#allocation76_spill] sm:$0xff] %v4241_v19  ;;  %v4259_v56 = vsel %vm393_vm0, %v1077_v16, %v5661_v29  ;;  %v5662_v20 = vrot.slane %v5661_v29, 4  ;;  %v1552_v7 = vsel %vm393_vm0, %v5659_v8, %v5664_v3  ;;  %v675_v16 = vrot.slane %v632_v57, 4  ;;  %v5667_v43 = vld [vmem:[#allocation30_spill] sm:$0xff] }
 0x17b   :  { %v687_v19 = vrot.slane %v636_v14, 4  ;;  %v644_v29 = vperm.slane %v638_v15, %v3309_v61  ;;  %v1550_v8 = vsel %vm393_vm0, %v1549_v46, %v5663_v12  ;;  %v1147_v6 = vrot.slane %v5667_v43, 4 }
 0x17c   :  { %v4264_v54 = vsel %vm393_vm0, %v1040_v59, %v5662_v20  ;;  %v648_v59 = vperm.slane %v640_v33, %v3309_v61  ;;  %v5665_v20 = vld [vmem:[#allocation33_spill] sm:$0xff]  ;;  %v521_v33 = vrot.slane %v4030_v41, 4  ;;  %v1146_v23 = vsel %vm393_vm0, %v1145_v18, %v5667_v43 }
 0x17d   :  { %v673_v44 = vrot.slane %v644_v29, 4  ;;  %v676_v24 = vsel %vm393_vm0, %v644_v29, %v675_v16  ;;  %v1148_v12 = vsel %vm393_vm0, %v319_v40, %v1147_v6  ;;  %v1157_v32 = vrot.slane %v367_v21, 4 }
 0x17e   :  { %v685_v2 = vrot.slane %v648_v59, 4  ;;  %v688_v15 = vsel %vm393_vm0, %v648_v59, %v687_v19  ;;  %v684_v17 = vperm.slane %v676_v24, %v3553_v53  ;;  %v4297_v1 = vperm.slane %v1552_v7, %v3309_v61  ;;  %v4314_v7 = vpop.permute.xlu0 %322 }
 0x17f   :  { %v696_v3 = vperm.slane %v688_v15, %v3553_v53  ;;  %v674_v46 = vsel %vm393_vm0, %v673_v44, %v632_v57  ;;  %v417_v24 = vrot.slane %v3660_v9, 4  ;;  %v1159_v18 = vrot.slane %v3847_v37, 4 }
 0x180   :  { %v686_v34 = vsel %vm393_vm0, %v685_v2, %v636_v14  ;;  %v680_v16 = vperm.slane %v674_v46, %v3553_v53  ;;  %v699_v29 = vrot.slane %v684_v17, 4  ;;  %v1152_v40 = vperm.slane %v1146_v23, %v3309_v61 }
 0x181   :  { %v692_v19 = vperm.slane %v686_v34, %v3553_v53  ;;  %v703_v59 = vrot.slane %v696_v3, 4  ;;  %v5668_v2 = vperm.slane %v4070_v4, %v3553_v53  ;;  %v5669_v34 = vperm.slane %v4089_v47, %v3553_v53  ;;  %v5671_v3 = vld [vmem:[#allocation31_spill] sm:$0xff] }
 0x182   :  { %v697_v43 = vrot.slane %v680_v16, 4  ;;  %v523_v6 = vrot.slane %v5671_v3, 4  ;;  %v522_v23 = vsel %vm393_vm0, %v521_v33, %v5671_v3  ;;  %v1156_v44 = vperm.slane %v1148_v12, %v3309_v61  ;;  %v347_v12 = vpop.permute.xlu1 %346 }
 0x183   :  { %v4306_v57 = vsel %vm393_vm0, %v699_v29, %v5668_v2  ;;  %v701_v14 = vrot.slane %v692_v19, 4  ;;  %v4312_v17 = vsel %vm393_vm0, %v703_v59, %v5669_v34  ;;  %v1158_v4 = vsel %vm393_vm0, %v1157_v32, %v3847_v37  ;;  %v5675_v29 = vld [vmem:[#allocation32_spill] sm:$0xff]  ;;  %v5676_v32 = vld [vmem:[#allocation39_spill] sm:$0xff]  ;;  %v5677_v59 = vld [vmem:[#allocation46_spill] sm:$0xff] }
 0x184   :  { %5670 = vst [vmem:[#allocation28_spill] sm:$0xff] %v4312_v17  ;;  %v4323_v15 = vperm.slane %v1550_v8, %v3309_v61  ;;  %v5672_v47 = vperm.slane %v4101_v63, %v3553_v53  ;;  %v5673_v16 = vperm.slane %v4117_v30, %v3553_v53  ;;  %v1160_v33 = vsel %vm393_vm0, %v367_v21, %v1159_v18 }
 0x185   :  { %v419_v37 = vrot.slane %v5675_v29, 4  ;;  %v535_v8 = vrot.slane %v5676_v32, 4  ;;  %v431_v2 = vrot.slane %v5677_v59, 4  ;;  %v524_v63 = vsel %vm393_vm0, %v4030_v41, %v523_v6 }
 0x186   :  { %v4329_v46 = vsel %vm393_vm0, %v697_v43, %v5672_v47  ;;  %v4335_v19 = vsel %vm393_vm0, %v701_v14, %v5673_v16  ;;  %v418_v43 = vsel %vm393_vm0, %v417_v24, %v5675_v29  ;;  %v528_v30 = vperm.slane %v522_v23, %v3309_v61 }
 0x187   :  { %5674 = vst [vmem:[#allocation26_spill] sm:$0xff] %v4335_v19  ;;  %v1195_v34 = vrot.slane %v1152_v40, 4  ;;  %v1164_v14 = vperm.slane %v1158_v4, %v3309_v61  ;;  %v1207_v3 = vrot.slane %v1156_v44, 4  ;;  %v1168_v21 = vperm.slane %v1160_v33, %v3309_v61 }
 0x188   :  { %v533_v18 = vrot.slane %v347_v12, 4  ;;  %v536_v47 = vsel %vm393_vm0, %v347_v12, %v535_v8  ;;  %v532_v16 = vperm.slane %v524_v63, %v3309_v61  ;;  %v571_v29 = vrot.slane %v528_v30, 4 }
 0x189   :  { %v1193_v17 = vrot.slane %v1164_v14, 4  ;;  %v1196_v19 = vsel %vm393_vm0, %v1164_v14, %v1195_v34  ;;  %v544_v41 = vperm.slane %v536_v47, %v3309_v61  ;;  %v1205_v6 = vrot.slane %v1168_v21, 4 }
 0x18a   :  { %v1204_v24 = vperm.slane %v1196_v19, %v3553_v53  ;;  %v1208_v23 = vsel %vm393_vm0, %v1168_v21, %v1207_v3  ;;  %v534_v4 = vsel %vm393_vm0, %v533_v18, %v5676_v32  ;;  %v420_v19 = vsel %vm393_vm0, %v3660_v9, %v419_v37  ;;  %v345_v18 = vpop.permute.xlu0 %344 }
 0x18b   :  { %v1194_v33 = vsel %vm393_vm0, %v1193_v17, %v1152_v40  ;;  %v1216_v12 = vperm.slane %v1208_v23, %v3553_v53  ;;  %v540_v8 = vperm.slane %v534_v4, %v3309_v61  ;;  %v1206_v34 = vsel %vm393_vm0, %v1205_v6, %v1156_v44 }
 0x18c   :  { %v1200_v63 = vperm.slane %v1194_v33, %v3553_v53  ;;  %v1219_v14 = vrot.slane %v1204_v24, 4  ;;  %v581_v47 = vrot.slane %v544_v41, 4  ;;  %v1212_v3 = vperm.slane %v1206_v34, %v3553_v53  ;;  %v5682_v34 = vld [vmem:[#allocation35_spill] sm:$0xff] }
 0x18d   :  { %v1223_v21 = vrot.slane %v1216_v12, 4  ;;  %v572_v32 = vsel %vm393_vm0, %v540_v8, %v571_v29  ;;  %v424_v40 = vperm.slane %v418_v43, %v3309_v61  ;;  %v583_v17 = vrot.slane %v532_v16, 4 }
 0x18e   :  { %v1217_v23 = vrot.slane %v1200_v63, 4  ;;  %v5678_v4 = vperm.slane %v3398_v58, %v3553_v53  ;;  %v1221_v24 = vrot.slane %v1212_v3, 4  ;;  %v5679_v9 = vperm.slane %v5653_v36, %v3553_v53  ;;  %v373_v36 = vpop.permute.xlu2 %372 }
 0x18f   :  { %v569_v6 = vrot.slane %v540_v8, 4  ;;  %v580_v29 = vperm.slane %v572_v32, %v3553_v53  ;;  %v5681_v43 = vperm.slane %v5660_v27, %v3553_v53  ;;  %v582_v58 = vsel %vm393_vm0, %v581_v47, %v532_v16  ;;  %v5684_v8 = vld [vmem:[#allocation37_spill] sm:$0xff] }
 0x190   :  { %v4370_v44 = vsel %vm393_vm0, %v1219_v14, %v5678_v4  ;;  %v4376_v37 = vsel %vm393_vm0, %v1223_v21, %v5679_v9  ;;  %v584_v12 = vsel %vm393_vm0, %v544_v41, %v583_v17  ;;  %v429_v63 = vrot.slane %v345_v18, 4  ;;  %v5683_v14 = vld [vmem:[#allocation36_spill] sm:$0xff] }
 0x191   :  { %5680 = vst [vmem:[#allocation29_spill] sm:$0xff] %v4376_v37  ;;  %v4383_v33 = vsel %vm393_vm0, %v1217_v23, %v5681_v43  ;;  %v1875_v21 = vrot.slane %v5684_v8, 4  ;;  %v5685_v32 = vperm.slane %v5658_v49, %v3553_v53  ;;  %v5687_v23 = vld [vmem:[#allocation38_spill] sm:$0xff]  ;;  %v428_v16 = vperm.slane %v420_v19, %v3309_v61 }
 0x192   :  { %v1873_v41 = vrot.slane %v4273_v55, 4  ;;  %v432_v47 = vsel %vm393_vm0, %v345_v18, %v431_v2  ;;  %v570_v17 = vsel %vm393_vm0, %v569_v6, %v528_v30  ;;  %v588_v9 = vperm.slane %v582_v58, %v3553_v53 }
 0x193   :  { %v4396_v27 = vsel %vm393_vm0, %v1221_v24, %v5685_v32  ;;  %v592_v43 = vperm.slane %v584_v12, %v3553_v53  ;;  %v595_v3 = vrot.slane %v580_v29, 4  ;;  %v467_v49 = vrot.slane %v424_v40, 4 }
 0x194   :  { %5686 = vst [vmem:[#allocation47_spill] sm:$0xff] %v4396_v27  ;;  %v1249_v24 = vrot.slane %v4105_v60, 4  ;;  %v576_v32 = vperm.slane %v570_v17, %v3553_v53  ;;  %v430_v19 = vsel %vm393_vm0, %v429_v63, %v5677_v59  ;;  %v5688_v4 = vperm.slane %v3958_v11, %v3553_v53 }
 0x195   :  { %v597_v30 = vrot.slane %v588_v9, 4  ;;  %v599_v18 = vrot.slane %v592_v43, 4  ;;  %v436_v6 = vperm.slane %v430_v19, %v3309_v61  ;;  %v1874_v29 = vsel %vm393_vm0, %v1873_v41, %v5684_v8  ;;  %v5691_v8 = vld [vmem:[#allocation40_spill] sm:$0xff]  ;;  %v5692_v43 = vld [vmem:[#allocation41_spill] sm:$0xff] }
 0x196   :  { %v4413_v2 = vsel %vm393_vm0, %v595_v3, %v5688_v4  ;;  %v593_v58 = vrot.slane %v576_v32, 4  ;;  %v440_v12 = vperm.slane %v432_v47, %v3309_v61  ;;  %v1885_v17 = vrot.slane %v373_v36, 4  ;;  %v5693_v32 = vld [vmem:[#allocation43_spill] sm:$0xff] }
 0x197   :  { %v5689_v59 = vperm.slane %v3988_v25, %v3553_v53  ;;  %v5690_v11 = vperm.slane %v3969_v31, %v3553_v53  ;;  %v465_v4 = vrot.slane %v436_v6, 4  ;;  %v468_v9 = vsel %vm393_vm0, %v436_v6, %v467_v49 }
 0x198   :  { %v5694_v25 = vperm.slane %v3982_v0, %v3553_v53  ;;  %v4443_v31 = vperm.slane %v3728_v5, %v3309_v61  ;;  %v1250_v49 = vsel %vm393_vm0, %v1249_v24, %v5687_v23  ;;  %v1876_v6 = vsel %vm393_vm0, %v4273_v55, %v1875_v21  ;;  %v353_v21 = vpop.permute.xlu1 %352 }
 0x199   :  { %v4423_v63 = vsel %vm393_vm0, %v597_v30, %v5689_v59  ;;  %v4429_v3 = vsel %vm393_vm0, %v599_v18, %v5690_v11  ;;  %v479_v59 = vrot.slane %v428_v16, 4  ;;  %v1887_v18 = vrot.slane %v3942_v22, 4 }
 0x19a   :  { %v4439_v30 = vsel %vm393_vm0, %v593_v58, %v5694_v25  ;;  %v1880_v11 = vperm.slane %v1874_v29, %v3309_v61  ;;  %v466_v0 = vsel %vm393_vm0, %v465_v4, %v424_v40  ;;  %v476_v58 = vperm.slane %v468_v9, %v3553_v53 }
 0x19b   :  { %v472_v25 = vperm.slane %v466_v0, %v3553_v53  ;;  %v477_v19 = vrot.slane %v440_v12, 4  ;;  %v480_v5 = vsel %vm393_vm0, %v440_v12, %v479_v59  ;;  %v1886_v41 = vsel %vm393_vm0, %v1885_v17, %v3942_v22  ;;  %v5695_v59 = vld [vmem:[#allocation54_spill] sm:$0xff] }
 0x19c   :  { %v488_v47 = vperm.slane %v480_v5, %v3553_v53  ;;  %v491_v24 = vrot.slane %v476_v58, 4  ;;  %v1888_v37 = vsel %vm393_vm0, %v373_v36, %v1887_v18  ;;  %v1892_v55 = vperm.slane %v1886_v41, %v3309_v61 }
 0x19d   :  { %v1884_v40 = vperm.slane %v1876_v6, %v3309_v61  ;;  %v478_v29 = vsel %vm393_vm0, %v477_v19, %v428_v16  ;;  %v489_v4 = vrot.slane %v472_v25, 4  ;;  %v1896_v9 = vperm.slane %v1888_v37, %v3309_v61  ;;  %v5698_v37 = vld [vmem:[#allocation53_spill] sm:$0xff] }
 0x19e   :  { %v484_v12 = vperm.slane %v478_v29, %v3553_v53  ;;  %v5696_v22 = vperm.slane %v5695_v59, %v3553_v53  ;;  %v495_v0 = vrot.slane %v488_v47, 4  ;;  %v1921_v58 = vrot.slane %v1892_v55, 4 }
 0x19f   :  { %v1923_v36 = vrot.slane %v1880_v11, 4  ;;  %v5697_v41 = vperm.slane %v3707_v39, %v3553_v53  ;;  %v1261_v16 = vrot.slane %v353_v21, 4  ;;  %v5699_v25 = vperm.slane %v5698_v37, %v3553_v53  ;;  %v5700_v39 = vld [vmem:[#allocation55_spill] sm:$0xff] }
 0x1a0   :  { %v492_v17 = vsel %vm393_vm0, %v491_v24, %v5696_v22  ;;  %v493_v19 = vrot.slane %v484_v12, 4  ;;  %v1935_v47 = vrot.slane %v1884_v40, 4  ;;  %v1922_v12 = vsel %vm393_vm0, %v1921_v58, %v1880_v11 }
 0x1a1   :  { %v490_v18 = vsel %vm393_vm0, %v489_v4, %v5697_v41  ;;  %v2124_v6 = vrot.slane %v492_v17, 2  ;;  %2321 = vst [vmem:[#allocation1 + $0x20] ss:$4 sm:$0xff] %v492_v17  ;;  %v4476_v5 = vsel %vm393_vm0, %v495_v0, %v5699_v25  ;;  %v2125_v22 = vrot.slane %v492_v17, 4 }
 0x1a2   :  { %v2121_v29 = vrot.slane %v490_v18, 2  ;;  %v2122_v24 = vrot.slane %v490_v18, 4  ;;  %2313 = vst [vmem:[#allocation1] ss:$4 sm:$0xff] %v490_v18  ;;  %v2123_v59 = vrot.slane %v490_v18, 6  ;;  %v2126_v27 = vrot.slane %v492_v17, 6 }
 0x1a3   :  { %2323 = vst [vmem:[#allocation1 + $0x21] ss:$4 sm:$0xff] %v2124_v6  ;;  %v5701_v4 = vperm.slane %v5700_v39, %v3553_v53  ;;  %v1924_v0 = vsel %vm393_vm0, %v1892_v55, %v1923_v36  ;;  %v1933_v37 = vrot.slane %v1896_v9, 4  ;;  %v5702_v25 = vrot.slane %v5687_v23, 4 }
 0x1a4   :  { %2315 = vst [vmem:[#allocation1 + $0x1] ss:$4 sm:$0xff] %v2121_v29  ;;  %v1256_v17 = vperm.slane %v1250_v49, %v3309_v61  ;;  %v1769_v6 = vrot.slane %v4179_v52, 4  ;;  %v1928_v39 = vperm.slane %v1922_v12, %v3553_v53  ;;  %v1936_v55 = vsel %vm393_vm0, %v1896_v9, %v1935_v47  ;;  %v351_v47 = vpop.permute.xlu0 %350 }
 0x1a5   :  { %v4482_v41 = vsel %vm393_vm0, %v493_v19, %v5701_v4  ;;  %v1252_v18 = vsel %vm393_vm0, %v4105_v60, %v5702_v25  ;;  %2317 = vst [vmem:[#allocation1 + $0x2] ss:$4 sm:$0xff] %v2122_v24  ;;  %v1932_v19 = vperm.slane %v1924_v0, %v3553_v53  ;;  %v1934_v11 = vsel %vm393_vm0, %v1933_v37, %v1884_v40  ;;  %v5704_v24 = vld [vmem:[#allocation49_spill] sm:$0xff] }
 0x1a6   :  { %2319 = vst [vmem:[#allocation1 + $0x3] ss:$4 sm:$0xff] %v2123_v59  ;;  %v1262_v23 = vsel %vm393_vm0, %v1261_v16, %v5692_v43  ;;  %v1940_v60 = vperm.slane %v1934_v11, %v3553_v53  ;;  %v1944_v49 = vperm.slane %v1936_v55, %v3553_v53  ;;  %v1945_v58 = vrot.slane %v1928_v39, 4 }
 0x1a7   :  { %2325 = vst [vmem:[#allocation1 + $0x22] ss:$4 sm:$0xff] %v2125_v22  ;;  %v5703_v36 = vrot.slane %v5692_v43, 4  ;;  %v951_v59 = vrot.slane %v5704_v24, 4  ;;  %v4506_v40 = vperm.slane %v3748_v13, %v3309_v61  ;;  %v1260_v9 = vperm.slane %v1252_v18, %v3309_v61 }
 0x1a8   :  { %2327 = vst [vmem:[#allocation1 + $0x23] ss:$4 sm:$0xff] %v2126_v27  ;;  %v1947_v16 = vrot.slane %v1932_v19, 4  ;;  %v5705_v22 = vperm.slane %v5682_v34, %v3553_v53  ;;  %v1949_v43 = vrot.slane %v1940_v60, 4  ;;  %v1951_v12 = vrot.slane %v1944_v49, 4 }
 0x1a9   :  { %v1264_v29 = vsel %vm393_vm0, %v353_v21, %v5703_v36  ;;  %v1268_v21 = vperm.slane %v1262_v23, %v3309_v61  ;;  %v999_v0 = vrot.slane %v4443_v31, 4  ;;  %v1770_v13 = vsel %vm393_vm0, %v1769_v6, %v5691_v8 }
 0x1aa   :  { %v4513_v4 = vsel %vm393_vm0, %v1945_v58, %v5705_v22  ;;  %v5706_v27 = vperm.slane %v5665_v20, %v3553_v53  ;;  %v1272_v34 = vperm.slane %v1264_v29, %v3309_v61  ;;  %v1299_v25 = vrot.slane %v1256_v17, 4 }
 0x1ab   :  { %v5707_v18 = vperm.slane %v5683_v14, %v3553_v53  ;;  %v5709_v19 = vperm.slane %v5666_v26, %v3553_v53  ;;  %v949_v11 = vrot.slane %v351_v47, 4  ;;  %v987_v20 = vrot.slane %v4506_v40, 4 }
 0x1ac   :  { %v4523_v37 = vsel %vm393_vm0, %v1947_v16, %v5706_v27  ;;  %v1311_v55 = vrot.slane %v1260_v9, 4  ;;  %v5711_v23 = vrot.slane %v5691_v8, 4  ;;  %v952_v14 = vsel %vm393_vm0, %v351_v47, %v951_v59 }
 0x1ad   :  { %v4530_v39 = vsel %vm393_vm0, %v1949_v43, %v5707_v18  ;;  %v4536_v6 = vsel %vm393_vm0, %v1951_v12, %v5709_v19  ;;  %v4545_v49 = vperm.slane %v1770_v13, %v3309_v61  ;;  %v2127_v58 = vrot.slane %v4482_v41, 2  ;;  %v4549_v36 = vld.sshfl [vmem:[#allocation1] sm:$0xff pattern:$0x73625140] }
 0x1ae   :  { %5708 = vst [vmem:[#allocation5_spill] sm:$0xff] %v4530_v39  ;;  %v1772_v60 = vsel %vm393_vm0, %v4179_v52, %v5711_v23  ;;  %v2128_v26 = vrot.slane %v4482_v41, 4  ;;  %v1300_v29 = vsel %vm393_vm0, %v1268_v21, %v1299_v25  ;;  %v1297_v16 = vrot.slane %v1268_v21, 4  ;;  %v359_v23 = vpop.permute.xlu1 %358 }
 0x1af   :  { %5710 = vst [vmem:[#allocation33_spill] sm:$0xff] %v4536_v6  ;;  %v1308_v8 = vperm.slane %v1300_v29, %v3553_v53  ;;  %v1309_v22 = vrot.slane %v1272_v34, 4  ;;  %v1312_v52 = vsel %vm393_vm0, %v1272_v34, %v1311_v55  ;;  %v2129_v59 = vrot.slane %v4482_v41, 6  ;;  %v4556_v47 = vld.sshfl [vmem:[#allocation1 + $0x20] sm:$0xff pattern:$0x73625140] }
 0x1b0   :  { %2330 = vst [vmem:[#allocation1] ss:$4 sm:$0xff] %v4482_v41  ;;  %v1320_v43 = vperm.slane %v1312_v52, %v3553_v53  ;;  %v950_v12 = vsel %vm393_vm0, %v949_v11, %v5704_v24  ;;  %v960_v13 = vperm.slane %v952_v14, %v3309_v61  ;;  %v1298_v21 = vsel %vm393_vm0, %v1297_v16, %v1256_v17 }
 0x1b1   :  { %2331 = vst [vmem:[#allocation1 + $0x1] ss:$4 sm:$0xff] %v2127_v58  ;;  %v1310_v27 = vsel %vm393_vm0, %v1309_v22, %v1260_v9  ;;  %v1323_v25 = vrot.slane %v1308_v8, 4  ;;  %v956_v34 = vperm.slane %v950_v12, %v3309_v61  ;;  %v2130_v41 = vrot.slane %v4476_v5, 2  ;;  %v5714_v8 = vld [vmem:[#allocation52_spill] sm:$0xff] }
 0x1b2   :  { %2332 = vst [vmem:[#allocation1 + $0x2] ss:$4 sm:$0xff] %v2128_v26  ;;  %v1304_v18 = vperm.slane %v1298_v21, %v3553_v53  ;;  %v1316_v19 = vperm.slane %v1310_v27, %v3553_v53  ;;  %v1327_v55 = vrot.slane %v1320_v43, 4  ;;  %v4569_v24 = vperm.slane %v1772_v60, %v3309_v61 }
 0x1b3   :  { %2333 = vst [vmem:[#allocation1 + $0x3] ss:$4 sm:$0xff] %v2129_v59  ;;  %v2131_v11 = vrot.slane %v4476_v5, 4  ;;  %v5712_v17 = vperm.slane %v4045_v42, %v3553_v53  ;;  %v985_v14 = vrot.slane %v956_v34, 4  ;;  %v2132_v58 = vrot.slane %v4476_v5, 6 }
 0x1b4   :  { %2334 = vst [vmem:[#allocation1 + $0x20] ss:$4 sm:$0xff] %v4476_v5  ;;  %v1321_v26 = vrot.slane %v1304_v18, 4  ;;  %v1325_v29 = vrot.slane %v1316_v19, 4  ;;  %v5713_v60 = vperm.slane %v4026_v10, %v3553_v53  ;;  %v1679_v22 = vrot.slane %v5714_v8, 4 }
 0x1b5   :  { %v4577_v9 = vsel %vm393_vm0, %v1323_v25, %v5712_v17  ;;  %2335 = vst [vmem:[#allocation1 + $0x21] ss:$4 sm:$0xff] %v2130_v41  ;;  %v988_v42 = vsel %vm393_vm0, %v956_v34, %v987_v20  ;;  %v997_v52 = vrot.slane %v960_v13, 4  ;;  %v1781_v59 = vrot.slane %v359_v23, 4 }
 0x1b6   :  { %v4584_v16 = vsel %vm393_vm0, %v1327_v55, %v5713_v60  ;;  %2336 = vst [vmem:[#allocation1 + $0x22] ss:$4 sm:$0xff] %v2131_v11  ;;  %v5715_v5 = vperm.slane %v4049_v48, %v3553_v53  ;;  %v5716_v10 = vperm.slane %v4053_v51, %v3553_v53  ;;  %v986_v21 = vsel %vm393_vm0, %v985_v14, %v4506_v40  ;;  %v5717_v48 = vld [vmem:[#allocation58_spill] sm:$0xff] }
 0x1b7   :  { %2337 = vst [vmem:[#allocation1 + $0x23] ss:$4 sm:$0xff] %v2132_v58  ;;  %v1000_v20 = vsel %vm393_vm0, %v960_v13, %v999_v0  ;;  %v4605_v27 = vperm.slane %v3817_v28, %v3309_v61  ;;  %v4609_v25 = vperm.slane %v5717_v48, %v3309_v61  ;;  %v1819_v34 = vrot.slane %v4545_v49, 4 }
 0x1b8   :  { %v4592_v43 = vsel %vm393_vm0, %v1321_v26, %v5715_v5  ;;  %v4598_v12 = vsel %vm393_vm0, %v1325_v29, %v5716_v10  ;;  %v1831_v51 = vrot.slane %v4569_v24, 4  ;;  %v2133_v41 = vrot.slane %v4439_v30, 2 }
 0x1b9   :  { %v2134_v18 = vrot.slane %v4439_v30, 4  ;;  %v992_v40 = vperm.slane %v986_v21, %v3553_v53  ;;  %v996_v0 = vperm.slane %v988_v42, %v3553_v53  ;;  %v998_v28 = vsel %vm393_vm0, %v997_v52, %v4443_v31  ;;  %v5721_v21 = vld [vmem:[#allocation8_spill] sm:$0xff] }
 0x1ba   :  { %v4617_v13 = vld.sshfl [vmem:[#allocation1] sm:$0xff pattern:$0x73625140]  ;;  %v1008_v19 = vperm.slane %v1000_v20, %v3553_v53  ;;  %v1782_v55 = vsel %vm393_vm0, %v1781_v59, %v5693_v32  ;;  %v5718_v11 = vrot.slane %v5693_v32, 4  ;;  %v1004_v14 = vperm.slane %v998_v28, %v3553_v53  ;;  %v357_v59 = vpop.permute.xlu0 %356 }
 0x1bb   :  { %2340 = vst [vmem:[#allocation1] ss:$4 sm:$0xff] %v4439_v30  ;;  %v1009_v58 = vrot.slane %v992_v40, 4  ;;  %v1011_v26 = vrot.slane %v996_v0, 4  ;;  %v1788_v29 = vperm.slane %v1782_v55, %v3309_v61  ;;  %v2135_v60 = vrot.slane %v4439_v30, 6  ;;  %v5723_v0 = vld [vmem:[#allocation7_spill] sm:$0xff]  ;;  %v365_v40 = vpop.permute.xlu1 %364 }
 0x1bc   :  { %v1784_v17 = vsel %vm393_vm0, %v359_v23, %v5718_v11  ;;  %v2136_v31 = vrot.slane %v4413_v2, 2  ;;  %2341 = vst [vmem:[#allocation1 + $0x1] ss:$4 sm:$0xff] %v2133_v41  ;;  %v1015_v42 = vrot.slane %v1008_v19, 4  ;;  %v2137_v32 = vrot.slane %v4413_v2, 4  ;;  %v5719_v23 = vld [vmem:[#allocation10_spill] sm:$0xff] }
 0x1bd   :  { %v1792_v52 = vperm.slane %v1784_v17, %v3309_v61  ;;  %2342 = vst [vmem:[#allocation1 + $0x2] ss:$4 sm:$0xff] %v2134_v18  ;;  %v5720_v5 = vperm.slane %v5719_v23, %v3553_v53  ;;  %v5722_v20 = vperm.slane %v5721_v21, %v3553_v53  ;;  %v1013_v48 = vrot.slane %v1004_v14, 4  ;;  %v5725_v11 = vld [vmem:[#allocation56_spill] sm:$0xff] }
 0x1be   :  { %v4650_v18 = vld.sshfl [vmem:[#allocation1 + $0x20] sm:$0xff pattern:$0x73625140]  ;;  %2343 = vst [vmem:[#allocation1 + $0x3] ss:$4 sm:$0xff] %v2135_v60  ;;  %v5724_v28 = vperm.slane %v5723_v0, %v3553_v53  ;;  %v1817_v55 = vrot.slane %v1788_v29, 4  ;;  %v5726_v17 = vperm.slane %v5725_v11, %v3553_v53  ;;  %v1680_v21 = vsel %vm393_vm0, %v357_v59, %v1679_v22 }
 0x1bf   :  { %v4638_v10 = vsel %vm393_vm0, %v1009_v58, %v5720_v5  ;;  %v4644_v30 = vsel %vm393_vm0, %v1011_v26, %v5722_v20  ;;  %2344 = vst [vmem:[#allocation1 + $0x20] ss:$4 sm:$0xff] %v4413_v2  ;;  %v1820_v58 = vsel %vm393_vm0, %v1788_v29, %v1819_v34  ;;  %v1832_v26 = vsel %vm393_vm0, %v1792_v52, %v1831_v51  ;;  %v5727_v0 = vld [vmem:[#allocation50_spill] sm:$0xff] }
 0x1c0   :  { %v4656_v19 = vsel %vm393_vm0, %v1015_v42, %v5724_v28  ;;  %v4663_v14 = vsel %vm393_vm0, %v1013_v48, %v5726_v17  ;;  %v1677_v60 = vrot.slane %v357_v59, 4  ;;  %v1597_v42 = vrot.slane %v4297_v1, 4  ;;  %2345 = vst [vmem:[#allocation1 + $0x21] ss:$4 sm:$0xff] %v2136_v31 }
 0x1c1   :  { %v2138_v5 = vrot.slane %v4413_v2, 6  ;;  %v5728_v48 = vrot.slane %v5727_v0, 4  ;;  %v1715_v51 = vrot.slane %v4605_v27, 4  ;;  %v1727_v29 = vrot.slane %v4609_v25, 4  ;;  %2346 = vst [vmem:[#allocation1 + $0x22] ss:$4 sm:$0xff] %v2137_v32 }
 0x1c2   :  { %v1818_v2 = vsel %vm393_vm0, %v1817_v55, %v4545_v49  ;;  %v1828_v31 = vperm.slane %v1820_v58, %v3553_v53  ;;  %v1829_v22 = vrot.slane %v1792_v52, 4  ;;  %v1840_v59 = vperm.slane %v1832_v26, %v3553_v53 }
 0x1c3   :  { %v4677_v34 = vsel %vm393_vm0, %v4297_v1, %v5728_v48  ;;  %2347 = vst [vmem:[#allocation1 + $0x23] ss:$4 sm:$0xff] %v2138_v5  ;;  %v1041_v28 = vrot.slane %v4249_v45, 4  ;;  %v1824_v11 = vperm.slane %v1818_v2, %v3553_v53  ;;  %v1678_v17 = vsel %vm393_vm0, %v1677_v60, %v5714_v8 }
 0x1c4   :  { %v1688_v48 = vperm.slane %v1680_v21, %v3309_v61  ;;  %v1830_v32 = vsel %vm393_vm0, %v1829_v22, %v4569_v24  ;;  %v1843_v5 = vrot.slane %v1828_v31, 4  ;;  %v1847_v41 = vrot.slane %v1840_v59, 4 }
 0x1c5   :  { %v1684_v49 = vperm.slane %v1678_v17, %v3309_v61  ;;  %v2139_v52 = vrot.slane %v4423_v63, 2  ;;  %v2140_v55 = vrot.slane %v4423_v63, 4  ;;  %v4695_v58 = vld.sshfl [vmem:[#allocation1] sm:$0xff pattern:$0x73625140]  ;;  %v1836_v26 = vperm.slane %v1830_v32, %v3553_v53 }
 0x1c6   :  { %v1841_v2 = vrot.slane %v1824_v11, 4  ;;  %2350 = vst [vmem:[#allocation1] ss:$4 sm:$0xff] %v4423_v63  ;;  %v5729_v8 = vperm.slane %v4159_v62, %v3553_v53  ;;  %v5730_v60 = vperm.slane %v4153_v50, %v3553_v53  ;;  %v2141_v59 = vrot.slane %v4423_v63, 6 }
 0x1c7   :  { %v1713_v31 = vrot.slane %v1684_v49, 4  ;;  %v1716_v22 = vsel %vm393_vm0, %v1684_v49, %v1715_v51  ;;  %2351 = vst [vmem:[#allocation1 + $0x1] ss:$4 sm:$0xff] %v2139_v52  ;;  %v5731_v11 = vperm.slane %v4192_v35, %v3553_v53  ;;  %v1845_v17 = vrot.slane %v1836_v26, 4  ;;  %v5735_v51 = vld [vmem:[#allocation45_spill] sm:$0xff] }
 0x1c8   :  { %v4703_v24 = vsel %vm393_vm0, %v1843_v5, %v5729_v8  ;;  %v4709_v21 = vsel %vm393_vm0, %v1847_v41, %v5730_v60  ;;  %v1725_v32 = vrot.slane %v1688_v48, 4  ;;  %v5732_v5 = vld [vmem:[#allocation51_spill] sm:$0xff]  ;;  %v5734_v41 = vld [vmem:[#allocation42_spill] sm:$0xff]  ;;  %v1055_v49 = vrot.slane %v5735_v51, 4  ;;  %2352 = vst [vmem:[#allocation1 + $0x2] ss:$4 sm:$0xff] %v2140_v55 }
 0x1c9   :  { %v4717_v62 = vsel %vm393_vm0, %v1841_v2, %v5731_v11  ;;  %v5733_v8 = vrot.slane %v5732_v5, 4  ;;  %v1043_v60 = vrot.slane %v5734_v41, 4  ;;  %v1728_v63 = vsel %vm393_vm0, %v1688_v48, %v1727_v29  ;;  %2353 = vst [vmem:[#allocation1 + $0x3] ss:$4 sm:$0xff] %v2141_v59  ;;  %v5736_v26 = vld [vmem:[#allocation73_spill] sm:$0xff]  ;;  %v5738_v55 = vld [vmem:[#allocation14_spill] sm:$0xff] }
 0x1ca   :  { %v2142_v35 = vrot.slane %v4429_v3, 2  ;;  %v4729_v52 = vld.sshfl [vmem:[#allocation1 + $0x20] sm:$0xff pattern:$0x73625140]  ;;  %v5737_v2 = vperm.slane %v5736_v26, %v3553_v53  ;;  %v1724_v23 = vperm.slane %v1716_v22, %v3553_v53  ;;  %v4742_v29 = vperm.slane %v5738_v55, %v3309_v61 }
 0x1cb   :  { %v4723_v50 = vsel %vm393_vm0, %v4323_v15, %v5733_v8  ;;  %v1714_v8 = vsel %vm393_vm0, %v1713_v31, %v4605_v27  ;;  %v1042_v48 = vsel %vm393_vm0, %v1041_v28, %v5734_v41  ;;  %v1044_v59 = vsel %vm393_vm0, %v4249_v45, %v1043_v60  ;;  %2354 = vst [vmem:[#allocation1 + $0x20] ss:$4 sm:$0xff] %v4429_v3 }
 0x1cc   :  { %v4735_v11 = vsel %vm393_vm0, %v1845_v17, %v5737_v2  ;;  %v2143_v26 = vrot.slane %v4429_v3, 4  ;;  %v2144_v17 = vrot.slane %v4429_v3, 6  ;;  %2355 = vst [vmem:[#allocation1 + $0x21] ss:$4 sm:$0xff] %v2142_v35  ;;  %v1720_v27 = vperm.slane %v1714_v8, %v3553_v53  ;;  %v363_v2 = vpop.permute.xlu0 %362 }
 0x1cd   :  { %v1726_v31 = vsel %vm393_vm0, %v1725_v32, %v4609_v25  ;;  %v1736_v22 = vperm.slane %v1728_v63, %v3553_v53  ;;  %v1739_v41 = vrot.slane %v1724_v23, 4  ;;  %v1053_v45 = vrot.slane %v365_v40, 4  ;;  %v5739_v32 = vld [vmem:[#allocation12_spill] sm:$0xff] }
 0x1ce   :  { %2356 = vst [vmem:[#allocation1 + $0x22] ss:$4 sm:$0xff] %v2143_v26  ;;  %v1732_v28 = vperm.slane %v1726_v31, %v3553_v53  ;;  %v1052_v60 = vperm.slane %v1044_v59, %v3309_v61  ;;  %v1737_v55 = vrot.slane %v1720_v27, 4  ;;  %v3059_v3 = vmov 0   ;;  %v5741_v26 = vld [vmem:[#allocation11_spill] sm:$0xff] }
 0x1cf   :  { %2357 = vst [vmem:[#allocation1 + $0x23] ss:$4 sm:$0xff] %v2144_v17  ;;  %v1743_v20 = vrot.slane %v1736_v22, 4  ;;  %3018 = vset.pattern.permute.xlu2 %v3059_v3  ;;  %3017 = vset.pattern.permute.xlu1 %v3059_v3  ;;  %v1056_v35 = vsel %vm393_vm0, %v365_v40, %v1055_v49  ;;  %v1048_v25 = vperm.slane %v1042_v48, %v3309_v61  ;;  %v741_v59 = vrot.slane %v363_v2, 4  ;;  %v5743_v40 = vld [vmem:[#allocation59_spill] sm:$0xff]  ;;  %v5745_v22 = vld [vmem:[#allocation6_spill] sm:$0xff] }
 0x1d0   :  { %v5740_v63 = vperm.slane %v5739_v32, %v3553_v53  ;;  %v1741_v23 = vrot.slane %v1732_v28, 4  ;;  %2644 = vperm.xlu2 %3018, %v4556_v47   ;;  %2641 = vperm.xlu1 %3017, %v4549_v36   ;;  %v5742_v17 = vperm.slane %v5741_v26, %v3553_v53  ;;  %v5744_v49 = vperm.slane %v5743_v40, %v3553_v53  ;;  %v4790_v32 = vld.sshfl [vmem:[#allocation1] sm:$0xff pattern:$0x73625140] }
 0x1d1   :  { %v1054_v31 = vsel %vm393_vm0, %v1053_v45, %v5735_v51  ;;  %v1064_v47 = vperm.slane %v1056_v35, %v3309_v61  ;;  %3019 = vset.pattern.permute.xlu0 %v3059_v3  ;;  %v4786_v36 = vsel %vm393_vm0, %v1597_v42, %v5727_v0  ;;  %v743_v28 = vrot.slane %v5745_v22, 4  ;;  %v5749_v42 = vld [vmem:[#allocation23_spill] sm:$0xff] }
 0x1d2   :  { %v4763_v8 = vsel %vm393_vm0, %v1739_v41, %v5740_v63  ;;  %v4771_v27 = vsel %vm393_vm0, %v1737_v55, %v5742_v17  ;;  %v4777_v48 = vsel %vm393_vm0, %v1743_v20, %v5744_v49  ;;  %v5746_v41 = vld [vmem:[#allocation72_spill] sm:$0xff]  ;;  %2647 = vperm.xlu0 %3019, %v4617_v13   ;;  %v779_v45 = vrot.slane %v4742_v29, 4 }
 0x1d3   :  { %v2145_v55 = vrot.slane %v5746_v41, 2  ;;  %v5747_v20 = vld [vmem:[#allocation60_spill] sm:$0xff]  ;;  %v2146_v1 = vrot.slane %v5746_v41, 4  ;;  %v2148_v0 = vrot.slane %v5749_v42, 2  ;;  %v1103_v3 = vrot.slane %v1052_v60, 4 }
 0x1d4   :  { %v5748_v63 = vperm.slane %v5747_v20, %v3553_v53  ;;  %2360 = vst [vmem:[#allocation1] ss:$4 sm:$0xff] %v5746_v41  ;;  %v2147_v35 = vrot.slane %v5746_v41, 6  ;;  %v2149_v26 = vrot.slane %v5749_v42, 4  ;;  %v1091_v17 = vrot.slane %v1048_v25, 4 }
 0x1d5   :  { %2361 = vst [vmem:[#allocation1 + $0x1] ss:$4 sm:$0xff] %v2145_v55  ;;  %v1101_v40 = vrot.slane %v1064_v47, 4  ;;  %v1104_v13 = vsel %vm393_vm0, %v1064_v47, %v1103_v3  ;;  %v742_v49 = vsel %vm393_vm0, %v741_v59, %v5745_v22  ;;  %v744_v20 = vsel %vm393_vm0, %v363_v2, %v743_v28 }
 0x1d6   :  { %v4796_v51 = vsel %vm393_vm0, %v1741_v23, %v5748_v63  ;;  %v1060_v23 = vperm.slane %v1054_v31, %v3309_v61  ;;  %2362 = vst [vmem:[#allocation1 + $0x2] ss:$4 sm:$0xff] %v2146_v1  ;;  %v2359_v63 = vld.sshfl [vmem:[#allocation1 + $0x20] sm:$0xff pattern:$0x73625140]  ;;  %v1112_v39 = vperm.slane %v1104_v13, %v3553_v53  ;;  %v748_v55 = vperm.slane %v742_v49, %v3309_v61 }
 0x1d7   :  { %2363 = vst [vmem:[#allocation1 + $0x3] ss:$4 sm:$0xff] %v2147_v35  ;;  %v2150_v31 = vrot.slane %v5749_v42, 6  ;;  %v1102_v1 = vsel %vm393_vm0, %v1101_v40, %v1052_v60  ;;  %v752_v59 = vperm.slane %v744_v20, %v3309_v61  ;;  %v5750_v35 = vld [vmem:[#allocation62_spill] sm:$0xff]  ;;  %v5753_v40 = vld [vmem:[#allocation25_spill] sm:$0xff]  ;;  %v5755_v49 = vld [vmem:[#allocation44_spill] sm:$0xff] }
 0x1d8   :  { %v1089_v6 = vrot.slane %v1060_v23, 4  ;;  %v1092_v41 = vsel %vm393_vm0, %v1060_v23, %v1091_v17  ;;  %2364 = vst [vmem:[#allocation1 + $0x20] ss:$4 sm:$0xff] %v5749_v42  ;;  %v1108_v22 = vperm.slane %v1102_v1, %v3553_v53  ;;  %v1119_v28 = vrot.slane %v1112_v39, 4  ;;  %2650 = vperm.xlu1 %3017, %v4650_v18   ;;  %2653 = vperm.xlu2 %3018, %v4695_v58  }
 0x1d9   :  { %v1100_v47 = vperm.slane %v1092_v41, %v3553_v53  ;;  %2365 = vst [vmem:[#allocation1 + $0x21] ss:$4 sm:$0xff] %v2148_v0  ;;  %v777_v3 = vrot.slane %v748_v55, 4  ;;  %v740_v42 = vperm.slane %v5750_v35, %v3309_v61  ;;  %v780_v23 = vsel %vm393_vm0, %v748_v55, %v779_v45  ;;  %v5756_v41 = vld [vmem:[#allocation24_spill] sm:$0xff] }
 0x1da   :  { %v1090_v2 = vsel %vm393_vm0, %v1089_v6, %v1048_v25  ;;  %2366 = vst [vmem:[#allocation1 + $0x22] ss:$4 sm:$0xff] %v2149_v26  ;;  %v5751_v6 = vrot.slane %v4323_v15, 4  ;;  %v1561_v39 = vrot.slane %v4314_v7, 4  ;;  %v1117_v18 = vrot.slane %v1108_v22, 4  ;;  %2662 = vperm.xlu0 %3019, %v2359_v63  }
 0x1db   :  { %v1096_v17 = vperm.slane %v1090_v2, %v3553_v53  ;;  %v1115_v60 = vrot.slane %v1100_v47, 4  ;;  %2367 = vst [vmem:[#allocation1 + $0x23] ss:$4 sm:$0xff] %v2150_v31  ;;  %v5752_v58 = vperm.slane %v4264_v54, %v3553_v53  ;;  %v5754_v45 = vperm.slane %v5753_v40, %v3553_v53  ;;  %v5758_v47 = vld [vmem:[#allocation48_spill] sm:$0xff] }
 0x1dc   :  { %v4830_v25 = vsel %vm393_vm0, %v5751_v6, %v5732_v5  ;;  %v788_v5 = vperm.slane %v780_v23, %v3553_v53  ;;  %v789_v13 = vrot.slane %v752_v59, 4  ;;  %v1563_v20 = vrot.slane %v5755_v49, 4 }
 0x1dd   :  { %v4837_v0 = vsel %vm393_vm0, %v1119_v28, %v5752_v58  ;;  %v1113_v26 = vrot.slane %v1096_v17, 4  ;;  %v4843_v15 = vsel %vm393_vm0, %v1115_v60, %v5754_v45  ;;  %v2151_v55 = vrot.slane %v5756_v41, 2  ;;  %v5760_v60 = vld [vmem:[#allocation22_spill] sm:$0xff] }
 0x1de   :  { %v5757_v54 = vperm.slane %v4259_v56, %v3553_v53  ;;  %v778_v63 = vsel %vm393_vm0, %v777_v3, %v4742_v29  ;;  %v1575_v1 = vrot.slane %v5758_v47, 4  ;;  %v791_v2 = vrot.slane %v740_v42, 4  ;;  %v2368_v28 = vld.sshfl [vmem:[#allocation1] sm:$0xff pattern:$0x73625140] }
 0x1df   :  { %v2152_v22 = vrot.slane %v5756_v41, 4  ;;  %v5759_v35 = vperm.slane %v4255_v38, %v3553_v53  ;;  %v2153_v56 = vrot.slane %v5756_v41, 6  ;;  %v2154_v23 = vrot.slane %v5760_v60, 2  ;;  %2371 = vst [vmem:[#allocation1 + $0x1] ss:$4 sm:$0xff] %v2151_v55 }
 0x1e0   :  { %v4852_v31 = vsel %vm393_vm0, %v1117_v18, %v5757_v54  ;;  %v1562_v6 = vsel %vm393_vm0, %v1561_v39, %v5755_v49  ;;  %v1564_v29 = vsel %vm393_vm0, %v4314_v7, %v1563_v20  ;;  %v784_v3 = vperm.slane %v778_v63, %v3553_v53  ;;  %2656 = vperm.xlu1 %3017, %v4729_v52   ;;  %v5761_v7 = vld [vmem:[#allocation71_spill] sm:$0xff]  ;;  %v5763_v20 = vld [vmem:[#allocation65_spill] sm:$0xff] }
 0x1e1   :  { %v4862_v17 = vsel %vm393_vm0, %v1113_v26, %v5759_v35  ;;  %2372 = vst [vmem:[#allocation1 + $0x2] ss:$4 sm:$0xff] %v2152_v22  ;;  %v790_v18 = vsel %vm393_vm0, %v789_v13, %v740_v42  ;;  %v792_v38 = vsel %vm393_vm0, %v752_v59, %v791_v2  ;;  %v803_v58 = vrot.slane %v788_v5, 4  ;;  %2659 = vperm.xlu2 %3018, %v4790_v32   ;;  %v5762_v59 = vld [vmem:[#allocation15_spill] sm:$0xff]  ;;  %v371_v22 = vpop.permute.xlu1 %370  ;;  %v5765_v35 = vld [vmem:[#allocation57_spill] sm:$0xff] }
 0x1e2   :  { %v2155_v26 = vrot.slane %v5760_v60, 4  ;;  %v2156_v40 = vrot.slane %v5760_v60, 6  ;;  %2373 = vst [vmem:[#allocation1 + $0x3] ss:$4 sm:$0xff] %v2153_v56  ;;  %v796_v45 = vperm.slane %v790_v18, %v3553_v53  ;;  %v800_v39 = vperm.slane %v792_v38, %v3553_v53  ;;  %v5766_v56 = vld [vmem:[#allocation67_spill] sm:$0xff]  ;;  %v5768_v38 = vld [vmem:[#allocation64_spill] sm:$0xff] }
 0x1e3   :  { %v4881_v49 = vperm.slane %v5761_v7, %v3309_v61  ;;  %v4885_v42 = vperm.slane %v5762_v59, %v3309_v61  ;;  %v2369_v5 = vld.sshfl [vmem:[#allocation1 + $0x20] sm:$0xff pattern:$0x73625140]  ;;  %2370 = vst [vmem:[#allocation1] ss:$4 sm:$0xff] %v5756_v41  ;;  %v801_v13 = vrot.slane %v784_v3, 4  ;;  %v5764_v55 = vperm.slane %v5763_v20, %v3553_v53 }
 0x1e4   :  { %v1568_v52 = vperm.slane %v1562_v6, %v3309_v61  ;;  %v1572_v32 = vperm.slane %v1564_v29, %v3309_v61  ;;  %2375 = vst [vmem:[#allocation1 + $0x21] ss:$4 sm:$0xff] %v2154_v23  ;;  %v805_v63 = vrot.slane %v796_v45, 4  ;;  %v807_v2 = vrot.slane %v800_v39, 4  ;;  %v5770_v45 = vld [vmem:[#allocation66_spill] sm:$0xff]  ;;  %v5772_v59 = vld [vmem:[#allocation13_spill] sm:$0xff] }
 0x1e5   :  { %v4892_v54 = vsel %vm393_vm0, %v803_v58, %v5764_v55  ;;  %v5767_v18 = vrot.slane %v5766_v56, 4  ;;  %2376 = vst [vmem:[#allocation1 + $0x22] ss:$4 sm:$0xff] %v2155_v26  ;;  %v5769_v58 = vperm.slane %v5768_v38, %v3553_v53  ;;  %v1573_v23 = vrot.slane %v371_v22, 4  ;;  %v369_v55 = vpop.permute.xlu0 %368 }
 0x1e6   :  { %v1596_v29 = vperm.slane %v4723_v50, %v3553_v53  ;;  %2377 = vst [vmem:[#allocation1 + $0x23] ss:$4 sm:$0xff] %v2156_v40  ;;  %v5771_v39 = vperm.slane %v5770_v45, %v3553_v53  ;;  %v5773_v26 = vperm.slane %v5772_v59, %v3553_v53  ;;  %v1604_v50 = vperm.slane %v4786_v36, %v3553_v53  ;;  %v5774_v40 = vld [vmem:[#allocation9_spill] sm:$0xff] }
 0x1e7   :  { %v4900_v41 = vsel %vm393_vm0, %v5767_v18, %v5765_v35  ;;  %v4908_v6 = vsel %vm393_vm0, %v801_v13, %v5769_v58  ;;  %v1576_v13 = vsel %vm393_vm0, %v371_v22, %v1575_v1  ;;  %v1592_v35 = vperm.slane %v4830_v25, %v3553_v53  ;;  %2374 = vst [vmem:[#allocation1 + $0x20] ss:$4 sm:$0xff] %v5760_v60 }
 0x1e8   :  { %v4916_v7 = vsel %vm393_vm0, %v805_v63, %v5771_v39  ;;  %v4922_v20 = vsel %vm393_vm0, %v807_v2, %v5773_v26  ;;  %v1471_v56 = vrot.slane %v5774_v40, 4  ;;  %v1519_v63 = vrot.slane %v4885_v42, 4  ;;  %2665 = vperm.xlu1 %3017, %v2368_v28  }
 0x1e9   :  { %v1507_v18 = vrot.slane %v4881_v49, 4  ;;  %v1611_v38 = vrot.slane %v1568_v52, 4  ;;  %v1623_v2 = vrot.slane %v1572_v32, 4  ;;  %v1574_v1 = vsel %vm393_vm0, %v1573_v23, %v5758_v47  ;;  %2668 = vperm.xlu2 %3018, %v2369_v5  }
 0x1ea   :  { %v1580_v22 = vperm.slane %v1574_v1, %v3309_v61  ;;  %v1584_v25 = vperm.slane %v1576_v13, %v3309_v61  ;;  %v1469_v58 = vrot.slane %v369_v55, 4  ;;  %v1472_v36 = vsel %vm393_vm0, %v369_v55, %v1471_v56  ;;  %v2378_v59 = vld.sshfl [vmem:[#allocation1] sm:$0xff pattern:$0x73625140] }
 0x1eb   :  { %v2157_v45 = vrot.slane %v4638_v10, 2  ;;  %v2158_v39 = vrot.slane %v4638_v10, 4  ;;  %v2159_v60 = vrot.slane %v4638_v10, 6  ;;  %v1480_v26 = vperm.slane %v1472_v36, %v3309_v61  ;;  %2380 = vst [vmem:[#allocation1] ss:$4 sm:$0xff] %v4638_v10  ;;  %2671 = vperm.xlu0 %3019, %v2378_v59  }
 0x1ec   :  { %v1609_v47 = vrot.slane %v1580_v22, 4  ;;  %v1612_v23 = vsel %vm393_vm0, %v1580_v22, %v1611_v38  ;;  %v1621_v13 = vrot.slane %v1584_v25, 4  ;;  %v1624_v1 = vsel %vm393_vm0, %v1584_v25, %v1623_v2 }
 0x1ed   :  { %2381 = vst [vmem:[#allocation1 + $0x1] ss:$4 sm:$0xff] %v2157_v45  ;;  %v1620_v55 = vperm.slane %v1612_v23, %v3553_v53  ;;  %v1632_v56 = vperm.slane %v1624_v1, %v3553_v53  ;;  %v1470_v3 = vsel %vm393_vm0, %v1469_v58, %v5774_v40  ;;  %v1517_v36 = vrot.slane %v1480_v26, 4  ;;  %v5775_v23 = vld [vmem:[#allocation61_spill] sm:$0xff] }
 0x1ee   :  { %v2160_v28 = vrot.slane %v4644_v30, 2  ;;  %2382 = vst [vmem:[#allocation1 + $0x2] ss:$4 sm:$0xff] %v2158_v39  ;;  %v1610_v10 = vsel %vm393_vm0, %v1609_v47, %v1568_v52  ;;  %v1622_v5 = vsel %vm393_vm0, %v1621_v13, %v1572_v32  ;;  %v1476_v38 = vperm.slane %v1470_v3, %v3309_v61  ;;  %v2379_v2 = vld.sshfl [vmem:[#allocation1 + $0x20] sm:$0xff pattern:$0x73625140] }
 0x1ef   :  { %2383 = vst [vmem:[#allocation1 + $0x3] ss:$4 sm:$0xff] %v2159_v60  ;;  %v1616_v22 = vperm.slane %v1610_v10, %v3553_v53  ;;  %v1628_v25 = vperm.slane %v1622_v5, %v3553_v53  ;;  %v1635_v45 = vrot.slane %v1620_v55, 4  ;;  %v1518_v40 = vsel %vm393_vm0, %v1517_v36, %v4885_v42  ;;  %v5776_v13 = vld [vmem:[#allocation68_spill] sm:$0xff]  ;;  %v5779_v10 = vld [vmem:[#allocation70_spill] sm:$0xff] }
 0x1f0   :  { %v2161_v58 = vrot.slane %v4644_v30, 4  ;;  %v2162_v39 = vrot.slane %v4644_v30, 6  ;;  %2384 = vst [vmem:[#allocation1 + $0x20] ss:$4 sm:$0xff] %v4644_v30  ;;  %v1639_v52 = vrot.slane %v1632_v56, 4  ;;  %v1508_v32 = vsel %vm393_vm0, %v1476_v38, %v1507_v18  ;;  %2674 = vperm.xlu1 %3017, %v2379_v2  }
 0x1f1   :  { %2385 = vst [vmem:[#allocation1 + $0x21] ss:$4 sm:$0xff] %v2160_v28  ;;  %v1633_v3 = vrot.slane %v1616_v22, 4  ;;  %v4962_v60 = vsel %vm393_vm0, %v1635_v45, %v1596_v29  ;;  %v1637_v59 = vrot.slane %v1628_v25, 4  ;;  %v1505_v47 = vrot.slane %v1476_v38, 4  ;;  %v5780_v38 = vld [vmem:[#allocation69_spill] sm:$0xff]  ;;  %v375_v25 = vpop.permute.xlu0 %374 }
 0x1f2   :  { %v5777_v1 = vrot.slane %v5776_v13, 4  ;;  %2386 = vst [vmem:[#allocation1 + $0x22] ss:$4 sm:$0xff] %v2161_v58  ;;  %v5778_v55 = vperm.slane %v4677_v34, %v3553_v53  ;;  %v1516_v18 = vperm.slane %v1508_v32, %v3553_v53  ;;  %v1524_v56 = vperm.slane %v1518_v40, %v3553_v53 }
 0x1f3   :  { %2387 = vst [vmem:[#allocation1 + $0x23] ss:$4 sm:$0xff] %v2162_v39  ;;  %v4977_v29 = vsel %vm393_vm0, %v1633_v3, %v1592_v35  ;;  %v4980_v36 = vsel %vm393_vm0, %v1637_v59, %v1604_v50  ;;  %v1520_v28 = vsel %vm393_vm0, %v1480_v26, %v1519_v63  ;;  %v1492_v34 = vperm.slane %v5779_v10, %v3553_v53  ;;  %v5781_v35 = vld [vmem:[#allocation63_spill] sm:$0xff] }
 0x1f4   :  { %v1482_v42 = vsel %vm393_vm0, %v5777_v1, %v5775_v23  ;;  %v4972_v30 = vsel %vm393_vm0, %v1639_v52, %v5778_v55  ;;  %v1500_v5 = vperm.slane %v4900_v41, %v3553_v53  ;;  %v1504_v22 = vperm.slane %v5780_v38, %v3553_v53  ;;  %v5782_v52 = vld [vmem:[#allocation19_spill] sm:$0xff] }
 0x1f5   :  { %v1488_v45 = vperm.slane %v1482_v42, %v3553_v53  ;;  %v1991_v40 = vrot.slane %v5781_v35, 4  ;;  %v2163_v50 = vrot.slane %v4663_v14, 2  ;;  %v1506_v63 = vsel %vm393_vm0, %v1505_v47, %v4881_v49  ;;  %v5783_v42 = vld [vmem:[#allocation20_spill] sm:$0xff] }
 0x1f6   :  { %v2388_v26 = vld.sshfl [vmem:[#allocation1] sm:$0xff pattern:$0x73625140]  ;;  %v1512_v2 = vperm.slane %v1506_v63, %v3553_v53  ;;  %v1528_v58 = vperm.slane %v1520_v28, %v3553_v53  ;;  %v1531_v39 = vrot.slane %v1516_v18, 4  ;;  %v1533_v41 = vrot.slane %v1524_v56, 4 }
 0x1f7   :  { %v1984_v32 = vperm.slane %v5782_v52, %v3309_v61  ;;  %v2164_v3 = vrot.slane %v4663_v14, 4  ;;  %v2165_v59 = vrot.slane %v4663_v14, 6  ;;  %2390 = vst [vmem:[#allocation1] ss:$4 sm:$0xff] %v4663_v14  ;;  %v1989_v23 = vrot.slane %v375_v25, 4  ;;  %2677 = vperm.xlu2 %3018, %v2388_v26  }
 0x1f8   :  { %2391 = vst [vmem:[#allocation1 + $0x1] ss:$4 sm:$0xff] %v2163_v50  ;;  %v1529_v49 = vrot.slane %v1512_v2, 4  ;;  %v5002_v47 = vsel %vm393_vm0, %v1531_v39, %v1492_v34  ;;  %v5005_v13 = vsel %vm393_vm0, %v1533_v41, %v1500_v5  ;;  %v1535_v1 = vrot.slane %v1528_v58, 4  ;;  %v5784_v58 = vld [vmem:[#allocation17_spill] sm:$0xff] }
 0x1f9   :  { %v1988_v55 = vperm.slane %v5783_v42, %v3309_v61  ;;  %v2166_v18 = vrot.slane %v4656_v19, 2  ;;  %2392 = vst [vmem:[#allocation1 + $0x2] ss:$4 sm:$0xff] %v2164_v3  ;;  %v1990_v10 = vsel %vm393_vm0, %v1989_v23, %v5781_v35  ;;  %v1992_v34 = vsel %vm393_vm0, %v375_v25, %v1991_v40 }
 0x1fa   :  { %v2389_v56 = vld.sshfl [vmem:[#allocation1 + $0x20] sm:$0xff pattern:$0x73625140]  ;;  %2393 = vst [vmem:[#allocation1 + $0x3] ss:$4 sm:$0xff] %v2165_v59  ;;  %v5011_v14 = vsel %vm393_vm0, %v1529_v49, %v1488_v45  ;;  %v5014_v28 = vsel %vm393_vm0, %v1535_v1, %v1504_v22  ;;  %v2167_v5 = vrot.slane %v4656_v19, 4  ;;  %v1996_v45 = vperm.slane %v1990_v10, %v3309_v61 }
 0x1fb   :  { %2394 = vst [vmem:[#allocation1 + $0x20] ss:$4 sm:$0xff] %v4656_v19  ;;  %2680 = vperm.xlu0 %3019, %v2389_v56   ;;  %v2027_v38 = vrot.slane %v1984_v32, 4  ;;  %v2168_v50 = vrot.slane %v4656_v19, 6  ;;  %v2039_v63 = vrot.slane %v1988_v55, 4  ;;  %v2000_v22 = vperm.slane %v1992_v34, %v3309_v61  ;;  %v5785_v49 = vld [vmem:[#allocation16_spill] sm:$0xff] }
 0x1fc   :  { %2395 = vst [vmem:[#allocation1 + $0x21] ss:$4 sm:$0xff] %v2166_v18  ;;  %v2025_v26 = vrot.slane %v1996_v45, 4  ;;  %v2012_v39 = vperm.slane %v5784_v58, %v3553_v53  ;;  %v2169_v52 = vrot.slane %v4592_v43, 2  ;;  %v2024_v1 = vperm.slane %v5785_v49, %v3553_v53  ;;  %v5786_v56 = vld [vmem:[#allocation21_spill] sm:$0xff]  ;;  %v5789_v49 = vld [vmem:[#allocation74_spill] sm:$0xff] }
 0x1fd   :  { %2396 = vst [vmem:[#allocation1 + $0x22] ss:$4 sm:$0xff] %v2167_v5  ;;  %v2028_v35 = vsel %vm393_vm0, %v1996_v45, %v2027_v38  ;;  %v2037_v40 = vrot.slane %v2000_v22, 4  ;;  %v2040_v2 = vsel %vm393_vm0, %v2000_v22, %v2039_v63  ;;  %v2170_v42 = vrot.slane %v4592_v43, 4  ;;  %v5787_v38 = vld [vmem:[#allocation18_spill] sm:$0xff] }
 0x1fe   :  { %2397 = vst [vmem:[#allocation1 + $0x23] ss:$4 sm:$0xff] %v2168_v50  ;;  %v2036_v25 = vperm.slane %v2028_v35, %v3553_v53  ;;  %v2026_v19 = vsel %vm393_vm0, %v2025_v26, %v1984_v32  ;;  %v2048_v41 = vperm.slane %v2040_v2, %v3553_v53  ;;  %v2008_v10 = vperm.slane %v5786_v56, %v3553_v53 }
 0x1ff   :  { %v2032_v61 = vperm.slane %v2026_v19, %v3553_v53  ;;  %v2038_v59 = vsel %vm393_vm0, %v2037_v40, %v1988_v55  ;;  %v2171_v34 = vrot.slane %v4592_v43, 6  ;;  %v2020_v50 = vperm.slane %v5787_v38, %v3553_v53  ;;  %v5791_v38 = vld [vmem:[#allocation75_spill] sm:$0xff] }
 0x200   :  { %v2051_v23 = vrot.slane %v2036_v25, 4  ;;  %v2044_v18 = vperm.slane %v2038_v59, %v3553_v53  ;;  %v2055_v32 = vrot.slane %v2048_v41, 4  ;;  %v2172_v22 = vrot.slane %v4577_v9, 2 }
 0x201   :  { %v2398_v3 = vld.sshfl [vmem:[#allocation1] sm:$0xff pattern:$0x73625140]  ;;  %v2049_v5 = vrot.slane %v2032_v61, 4  ;;  %v2174_v53 = vrot.slane %v4577_v9, 6  ;;  %v2175_v40 = vrot.slane %v4598_v12, 2 }
 0x202   :  { %2400 = vst [vmem:[#allocation1] ss:$4 sm:$0xff] %v4592_v43  ;;  %2683 = vperm.xlu1 %3017, %v2398_v3   ;;  %v5043_v55 = vsel %vm393_vm0, %v2051_v23, %v2012_v39  ;;  %v2053_v45 = vrot.slane %v2044_v18, 4  ;;  %v5048_v63 = vsel %vm393_vm0, %v2055_v32, %v2024_v1  ;;  %v2173_v43 = vrot.slane %v4577_v9, 4  ;;  %v5788_v3 = vld [vmem:[#allocation27_spill] sm:$0xff]  ;;  %v5790_v32 = vld [vmem:[#allocation76_spill] sm:$0xff] }
 0x203   :  { %2401 = vst [vmem:[#allocation1 + $0x1] ss:$4 sm:$0xff] %v2169_v52  ;;  %v5052_v35 = vsel %vm393_vm0, %v2049_v5, %v2008_v10  ;;  %v2176_v58 = vrot.slane %v4598_v12, 4  ;;  %v2177_v39 = vrot.slane %v4598_v12, 6  ;;  %v2178_v19 = vrot.slane %v4584_v16, 2 }
 0x204   :  { %2402 = vst [vmem:[#allocation1 + $0x2] ss:$4 sm:$0xff] %v2170_v42  ;;  %v5057_v25 = vsel %vm393_vm0, %v2053_v45, %v2020_v50  ;;  %v2180_v52 = vrot.slane %v4584_v16, 6  ;;  %v2181_v61 = vrot.slane %v5788_v3, 2  ;;  %v2183_v23 = vrot.slane %v5788_v3, 6 }
 0x205   :  { %v2399_v26 = vld.sshfl [vmem:[#allocation1 + $0x20] sm:$0xff pattern:$0x73625140]  ;;  %2403 = vst [vmem:[#allocation1 + $0x3] ss:$4 sm:$0xff] %v2171_v34  ;;  %v2184_v1 = vrot.slane %v5789_v49, 2 }
 0x206   :  { %2404 = vst [vmem:[#allocation1 + $0x20] ss:$4 sm:$0xff] %v4577_v9  ;;  %2686 = vperm.xlu2 %3018, %v2399_v26   ;;  %v2179_v9 = vrot.slane %v4584_v16, 4  ;;  %v2186_v18 = vrot.slane %v5789_v49, 6  ;;  %v2187_v56 = vrot.slane %v5790_v32, 2  ;;  %v2188_v34 = vrot.slane %v5790_v32, 4 }
 0x207   :  { %2405 = vst [vmem:[#allocation1 + $0x21] ss:$4 sm:$0xff] %v2172_v22  ;;  %v2189_v5 = vrot.slane %v5790_v32, 6  ;;  %v2190_v50 = vrot.slane %v5791_v38, 2  ;;  %v2191_v22 = vrot.slane %v5791_v38, 4  ;;  %v2192_v26 = vrot.slane %v5791_v38, 6 }
 0x208   :  { %2406 = vst [vmem:[#allocation1 + $0x22] ss:$4 sm:$0xff] %v2173_v43  ;;  %v2193_v43 = vrot.slane %v4771_v27, 2  ;;  %vm2988_vm0 = vcmask 1041409  }
 0x209   :  { %2407 = vst [vmem:[#allocation1 + $0x23] ss:$4 sm:$0xff] %v2174_v53 }
 0x20c   :  { %v2408_v2 = vld.sshfl [vmem:[#allocation1] sm:$0xff pattern:$0x73625140] }
 0x20d   :  { %2410 = vst [vmem:[#allocation1] ss:$4 sm:$0xff] %v4598_v12  ;;  %2689 = vperm.xlu0 %3019, %v2408_v2   ;;  %v2182_v12 = vrot.slane %v5788_v3, 4  ;;  %v2195_v2 = vrot.slane %v4771_v27, 6 }
 0x20e   :  { %2411 = vst [vmem:[#allocation1 + $0x1] ss:$4 sm:$0xff] %v2175_v40  ;;  %v2194_v40 = vrot.slane %v4771_v27, 4 }
 0x20f   :  { %2412 = vst [vmem:[#allocation1 + $0x2] ss:$4 sm:$0xff] %v2176_v58  ;;  %v2196_v58 = vrot.slane %v4763_v8, 2 }
 0x210   :  { %v2409_v41 = vld.sshfl [vmem:[#allocation1 + $0x20] sm:$0xff pattern:$0x73625140]  ;;  %2413 = vst [vmem:[#allocation1 + $0x3] ss:$4 sm:$0xff] %v2177_v39 }
 0x211   :  { %2414 = vst [vmem:[#allocation1 + $0x20] ss:$4 sm:$0xff] %v4584_v16  ;;  %2692 = vperm.xlu1 %3017, %v2409_v41   ;;  %v2185_v16 = vrot.slane %v5789_v49, 4  ;;  %v2198_v41 = vrot.slane %v4763_v8, 6 }
 0x212   :  { %2415 = vst [vmem:[#allocation1 + $0x21] ss:$4 sm:$0xff] %v2178_v19  ;;  %v2197_v19 = vrot.slane %v4763_v8, 4 }
 0x213   :  { %2416 = vst [vmem:[#allocation1 + $0x22] ss:$4 sm:$0xff] %v2179_v9  ;;  %v2199_v9 = vrot.slane %v4796_v51, 2 }
 0x214   :  { %2417 = vst [vmem:[#allocation1 + $0x23] ss:$4 sm:$0xff] %v2180_v52 }
 0x217   :  { %v2418_v59 = vld.sshfl [vmem:[#allocation1] sm:$0xff pattern:$0x73625140] }
 0x218   :  { %2420 = vst [vmem:[#allocation1] ss:$4 sm:$0xff] %v5788_v3  ;;  %2695 = vperm.xlu2 %3018, %v2418_v59   ;;  %v2201_v3 = vrot.slane %v4796_v51, 6 }
 0x219   :  { %2421 = vst [vmem:[#allocation1 + $0x1] ss:$4 sm:$0xff] %v2181_v61  ;;  %v2202_v61 = vrot.slane %v4777_v48, 2 }
 0x21a   :  { %2422 = vst [vmem:[#allocation1 + $0x2] ss:$4 sm:$0xff] %v2182_v12  ;;  %v2204_v12 = vrot.slane %v4777_v48, 6 }
 0x21b   :  { %v2419_v42 = vld.sshfl [vmem:[#allocation1 + $0x20] sm:$0xff pattern:$0x73625140]  ;;  %2423 = vst [vmem:[#allocation1 + $0x3] ss:$4 sm:$0xff] %v2183_v23  ;;  %v2205_v23 = vrot.slane %v4717_v62, 2 }
 0x21c   :  { %2424 = vst [vmem:[#allocation1 + $0x20] ss:$4 sm:$0xff] %v5789_v49  ;;  %2698 = vperm.xlu0 %3019, %v2419_v42   ;;  %v2208_v42 = vrot.slane %v4703_v24, 2 }
 0x21d   :  { %2425 = vst [vmem:[#allocation1 + $0x21] ss:$4 sm:$0xff] %v2184_v1  ;;  %v2207_v1 = vrot.slane %v4717_v62, 6 }
 0x21e   :  { %2426 = vst [vmem:[#allocation1 + $0x22] ss:$4 sm:$0xff] %v2185_v16 }
 0x21f   :  { %2427 = vst [vmem:[#allocation1 + $0x23] ss:$4 sm:$0xff] %v2186_v18  ;;  %v2210_v18 = vrot.slane %v4703_v24, 6 }
 0x222   :  { %v2428_v10 = vld.sshfl [vmem:[#allocation1] sm:$0xff pattern:$0x73625140] }
 0x223   :  { %2430 = vst [vmem:[#allocation1] ss:$4 sm:$0xff] %v5790_v32  ;;  %2701 = vperm.xlu1 %3017, %v2428_v10   ;;  %v2832_v32 = vlaneseq }
 0x224   :  { %2431 = vst [vmem:[#allocation1 + $0x1] ss:$4 sm:$0xff] %v2187_v56  ;;  %v2211_v56 = vrot.slane %v4735_v11, 2 }
 0x225   :  { %2432 = vst [vmem:[#allocation1 + $0x2] ss:$4 sm:$0xff] %v2188_v34  ;;  %v5109_v10 = vand.u32 127, %v2832_v32  ;;  %v2212_v34 = vrot.slane %v4735_v11, 4 }
 0x226   :  { %v2429_v45 = vld.sshfl [vmem:[#allocation1 + $0x20] sm:$0xff pattern:$0x73625140]  ;;  %2433 = vst [vmem:[#allocation1 + $0x3] ss:$4 sm:$0xff] %v2189_v5  ;;  %v2213_v5 = vrot.slane %v4735_v11, 6 }
 0x227   :  { %2434 = vst [vmem:[#allocation1 + $0x20] ss:$4 sm:$0xff] %v5791_v38  ;;  %2704 = vperm.xlu2 %3018, %v2429_v45   ;;  %v2214_v38 = vrot.slane %v4709_v21, 2 }
 0x228   :  { %2435 = vst [vmem:[#allocation1 + $0x21] ss:$4 sm:$0xff] %v2190_v50  ;;  %v5116_v50 = vadd.s32 4294967288, %v5109_v10 }
 0x229   :  { %2436 = vst [vmem:[#allocation1 + $0x22] ss:$4 sm:$0xff] %v2191_v22  ;;  %v2215_v22 = vrot.slane %v4709_v21, 4 }
 0x22a   :  { %2437 = vst [vmem:[#allocation1 + $0x23] ss:$4 sm:$0xff] %v2192_v26  ;;  %v2645_v45 = vpop.permute.xlu2 %2644  ;;  %v2216_v26 = vrot.slane %v4709_v21, 6 }
 0x22d   :  { %v2438_v53 = vld.sshfl [vmem:[#allocation1] sm:$0xff pattern:$0x73625140] }
 0x22e   :  { %2440 = vst [vmem:[#allocation1] ss:$4 sm:$0xff] %v4771_v27  ;;  %2707 = vperm.xlu0 %3019, %v2438_v53   ;;  %v2200_v27 = vrot.slane %v4796_v51, 4 }
 0x22f   :  { %2441 = vst [vmem:[#allocation1 + $0x1] ss:$4 sm:$0xff] %v2193_v43  ;;  %v2836_v43 = vperm.slane %v2645_v45, %v5116_v50 }
 0x230   :  { %2442 = vst [vmem:[#allocation1 + $0x2] ss:$4 sm:$0xff] %v2194_v40 }
 0x231   :  { %v2439_v39 = vld.sshfl [vmem:[#allocation1 + $0x20] sm:$0xff pattern:$0x73625140]  ;;  %2443 = vst [vmem:[#allocation1 + $0x3] ss:$4 sm:$0xff] %v2195_v2  ;;  %v2217_v2 = vrot.slane %v4329_v46, 2 }
 0x232   :  { %2444 = vst [vmem:[#allocation1 + $0x20] ss:$4 sm:$0xff] %v4763_v8  ;;  %2710 = vperm.xlu1 %3017, %v2439_v39   ;;  %v2203_v8 = vrot.slane %v4777_v48, 4  ;;  %v2218_v39 = vrot.slane %v4329_v46, 4 }
 0x233   :  { %2445 = vst [vmem:[#allocation1 + $0x21] ss:$4 sm:$0xff] %v2196_v58 }
 0x234   :  { %2446 = vst [vmem:[#allocation1 + $0x22] ss:$4 sm:$0xff] %v2197_v19  ;;  %v2654_v19 = vpop.permute.xlu2 %2653 }
 0x235   :  { %2447 = vst [vmem:[#allocation1 + $0x23] ss:$4 sm:$0xff] %v2198_v41  ;;  %v5129_v41 = vadd.s32 4294967264, %v5109_v10 }
 0x238   :  { %v2448_v52 = vld.sshfl [vmem:[#allocation1] sm:$0xff pattern:$0x73625140] }
 0x239   :  { %2450 = vst [vmem:[#allocation1] ss:$4 sm:$0xff] %v4796_v51  ;;  %2713 = vperm.xlu2 %3018, %v2448_v52   ;;  %v2206_v51 = vrot.slane %v4717_v62, 4  ;;  %v5135_v52 = vadd.s32 4294967280, %v5109_v10 }
 0x23a   :  { %2451 = vst [vmem:[#allocation1 + $0x1] ss:$4 sm:$0xff] %v2199_v9  ;;  %v5132_v9 = vadd.s32 4294967272, %v5109_v10 }
 0x23b   :  { %2452 = vst [vmem:[#allocation1 + $0x2] ss:$4 sm:$0xff] %v2200_v27  ;;  %v2220_v27 = vrot.slane %v4306_v57, 2 }
 0x23c   :  { %v2449_v59 = vld.sshfl [vmem:[#allocation1 + $0x20] sm:$0xff pattern:$0x73625140]  ;;  %2453 = vst [vmem:[#allocation1 + $0x3] ss:$4 sm:$0xff] %v2201_v3  ;;  %v2660_v32 = vpop.permute.xlu2 %2659 }
 0x23d   :  { %2454 = vst [vmem:[#allocation1 + $0x20] ss:$4 sm:$0xff] %v4777_v48  ;;  %2716 = vperm.xlu0 %3019, %v2449_v59   ;;  %v2209_v48 = vrot.slane %v4703_v24, 4 }
 0x23e   :  { %2455 = vst [vmem:[#allocation1 + $0x21] ss:$4 sm:$0xff] %v2202_v61 }
 0x23f   :  { %2456 = vst [vmem:[#allocation1 + $0x22] ss:$4 sm:$0xff] %v2203_v8  ;;  %v2221_v8 = vrot.slane %v4306_v57, 4 }
 0x240   :  { %2457 = vst [vmem:[#allocation1 + $0x23] ss:$4 sm:$0xff] %v2204_v12 }
 0x243   :  { %v2458_v49 = vld.sshfl [vmem:[#allocation1] sm:$0xff pattern:$0x73625140] }
 0x244   :  { %2460 = vst [vmem:[#allocation1] ss:$4 sm:$0xff] %v4717_v62  ;;  %2719 = vperm.xlu1 %3017, %v2458_v49   ;;  %v2648_v59 = vpop.permute.xlu0 %2647  ;;  %v2848_v49 = vperm.slane %v2654_v19, %v5129_v41 }
 0x245   :  { %2461 = vst [vmem:[#allocation1 + $0x1] ss:$4 sm:$0xff] %v2205_v23  ;;  %v2840_v12 = vperm.slane %v2648_v59, %v5135_v52  ;;  %v2222_v23 = vrot.slane %v4306_v57, 6  ;;  %v2232_v59 = vrot.slane %v4892_v54, 2 }
 0x246   :  { %2462 = vst [vmem:[#allocation1 + $0x2] ss:$4 sm:$0xff] %v2206_v51 }
 0x247   :  { %v2459_v16 = vld.sshfl [vmem:[#allocation1 + $0x20] sm:$0xff pattern:$0x73625140]  ;;  %2463 = vst [vmem:[#allocation1 + $0x3] ss:$4 sm:$0xff] %v2207_v1 }
 0x248   :  { %2464 = vst [vmem:[#allocation1 + $0x20] ss:$4 sm:$0xff] %v4703_v24  ;;  %2722 = vperm.xlu2 %3018, %v2459_v16   ;;  %v5148_v16 = vadd.s32 4294967248, %v5109_v10 }
 0x249   :  { %2465 = vst [vmem:[#allocation1 + $0x21] ss:$4 sm:$0xff] %v2208_v42 }
 0x24a   :  { %2466 = vst [vmem:[#allocation1 + $0x22] ss:$4 sm:$0xff] %v2209_v48  ;;  %v5792_v48 = vld [vmem:[#allocation26_spill] sm:$0xff] }
 0x24b   :  { %2467 = vst [vmem:[#allocation1 + $0x23] ss:$4 sm:$0xff] %v2210_v18  ;;  %v2223_v18 = vrot.slane %v5792_v48, 2 }
 0x24e   :  { %v2468_v62 = vld.sshfl [vmem:[#allocation1] sm:$0xff pattern:$0x73625140] }
 0x24f   :  { %2470 = vst [vmem:[#allocation1] ss:$4 sm:$0xff] %v4735_v11  ;;  %2725 = vperm.xlu0 %3019, %v2468_v62   ;;  %v2642_v11 = vpop.permute.xlu1 %2641  ;;  %v2224_v62 = vrot.slane %v5792_v48, 4 }
 0x250   :  { %2471 = vst [vmem:[#allocation1 + $0x1] ss:$4 sm:$0xff] %v2211_v56  ;;  %v2834_v53 = vperm.slane %v2642_v11, %v5109_v10  ;;  %v5152_v56 = vadd.s32 4294967256, %v5109_v10 }
 0x251   :  { %2472 = vst [vmem:[#allocation1 + $0x2] ss:$4 sm:$0xff] %v2212_v34 }
 0x252   :  { %v2469_v24 = vld.sshfl [vmem:[#allocation1 + $0x20] sm:$0xff pattern:$0x73625140]  ;;  %2473 = vst [vmem:[#allocation1 + $0x3] ss:$4 sm:$0xff] %v2213_v5  ;;  %v2838_v40 = vsel %vm2837_vm1, %v2836_v43, %v2834_v53  ;;  %v2225_v5 = vrot.slane %v5792_v48, 6 }
 0x253   :  { %2474 = vst [vmem:[#allocation1 + $0x20] ss:$4 sm:$0xff] %v4709_v21  ;;  %2728 = vperm.xlu1 %3017, %v2469_v24   ;;  %v2219_v21 = vrot.slane %v4329_v46, 6  ;;  %v2842_v51 = vsel %vm2841_vm2, %v2840_v12, %v2838_v40  ;;  %v5793_v24 = vld [vmem:[#allocation28_spill] sm:$0xff]  ;;  %v2233_v12 = vrot.slane %v4892_v54, 4 }
 0x254   :  { %2475 = vst [vmem:[#allocation1 + $0x21] ss:$4 sm:$0xff] %v2214_v38  ;;  %v2226_v45 = vrot.slane %v5793_v24, 2  ;;  %v2227_v43 = vrot.slane %v5793_v24, 4  ;;  %v2228_v40 = vrot.slane %v5793_v24, 6 }
 0x255   :  { %2476 = vst [vmem:[#allocation1 + $0x22] ss:$4 sm:$0xff] %v2215_v22  ;;  %v2856_v22 = vperm.slane %v2660_v32, %v5148_v16 }
 0x256   :  { %2477 = vst [vmem:[#allocation1 + $0x23] ss:$4 sm:$0xff] %v2216_v26 }
 0x257   :  { %v2651_v61 = vpop.permute.xlu1 %2650 }
 0x259   :  { %v2478_v58 = vld.sshfl [vmem:[#allocation1] sm:$0xff pattern:$0x73625140] }
 0x25a   :  { %2480 = vst [vmem:[#allocation1] ss:$4 sm:$0xff] %v4329_v46  ;;  %2731 = vperm.xlu2 %3018, %v2478_v58   ;;  %v2844_v46 = vperm.slane %v2651_v61, %v5132_v9  ;;  %v2663_v58 = vpop.permute.xlu0 %2662  ;;  %v2231_v61 = vrot.slane %v4908_v6, 6 }
 0x25b   :  { %2481 = vst [vmem:[#allocation1 + $0x1] ss:$4 sm:$0xff] %v2217_v2  ;;  %v5166_v2 = vadd.s32 4294967240, %v5109_v10 }
 0x25c   :  { %2482 = vst [vmem:[#allocation1 + $0x2] ss:$4 sm:$0xff] %v2218_v39  ;;  %v2846_v1 = vsel %vm2845_vm3, %v2844_v46, %v2842_v51  ;;  %v5176_v46 = vadd.s32 4294967224, %v5109_v10 }
 0x25d   :  { %v2479_v3 = vld.sshfl [vmem:[#allocation1 + $0x20] sm:$0xff pattern:$0x73625140]  ;;  %2483 = vst [vmem:[#allocation1 + $0x3] ss:$4 sm:$0xff] %v2219_v21  ;;  %v2850_v42 = vsel %vm2849_vm4, %v2848_v49, %v2846_v1  ;;  %v2860_v39 = vperm.slane %v2663_v58, %v5166_v2  ;;  %v2229_v21 = vrot.slane %v4908_v6, 2 }
 0x25e   :  { %2484 = vst [vmem:[#allocation1 + $0x20] ss:$4 sm:$0xff] %v4306_v57  ;;  %2734 = vperm.xlu0 %3019, %v2479_v3   ;;  %v2230_v3 = vrot.slane %v4908_v6, 4  ;;  %v5181_v49 = vadd.s32 4294967232, %v5109_v10 }
 0x25f   :  { %2485 = vst [vmem:[#allocation1 + $0x21] ss:$4 sm:$0xff] %v2220_v27  ;;  %v2657_v34 = vpop.permute.xlu1 %2656 }
 0x260   :  { %2486 = vst [vmem:[#allocation1 + $0x22] ss:$4 sm:$0xff] %v2221_v8  ;;  %v2852_v38 = vperm.slane %v2657_v34, %v5152_v56  ;;  %v5193_v34 = vadd.s32 4294967200, %v5109_v10 }
 0x261   :  { %2487 = vst [vmem:[#allocation1 + $0x23] ss:$4 sm:$0xff] %v2222_v23  ;;  %v2669_v23 = vpop.permute.xlu2 %2668 }
 0x262   :  { %v2854_v11 = vsel %vm2853_vm5, %v2852_v38, %v2850_v42  ;;  %v2868_v42 = vperm.slane %v2669_v23, %v5176_v46  ;;  %v5196_v38 = vadd.s32 4294967208, %v5109_v10 }
 0x263   :  { %v2858_v53 = vsel %vm2857_vm6, %v2856_v22, %v2854_v11  ;;  %v2672_v22 = vpop.permute.xlu0 %2671 }
 0x264   :  { %v2488_v57 = vld.sshfl [vmem:[#allocation1] sm:$0xff pattern:$0x73625140]  ;;  %v2862_v19 = vsel %vm2861_vm7, %v2860_v39, %v2858_v53  ;;  %v2239_v53 = vrot.slane %v4922_v20, 4 }
 0x265   :  { %2490 = vst [vmem:[#allocation1] ss:$4 sm:$0xff] %v5792_v48  ;;  %2737 = vperm.xlu1 %3017, %v2488_v57   ;;  %v2235_v57 = vrot.slane %v4916_v7, 2 }
 0x266   :  { %2491 = vst [vmem:[#allocation1 + $0x1] ss:$4 sm:$0xff] %v2223_v18 }
 0x267   :  { %2492 = vst [vmem:[#allocation1 + $0x2] ss:$4 sm:$0xff] %v2224_v62  ;;  %v2666_v51 = vpop.permute.xlu1 %2665  ;;  %v2236_v62 = vrot.slane %v4916_v7, 4 }
 0x268   :  { %v2489_v26 = vld.sshfl [vmem:[#allocation1 + $0x20] sm:$0xff pattern:$0x73625140]  ;;  %2493 = vst [vmem:[#allocation1 + $0x3] ss:$4 sm:$0xff] %v2225_v5  ;;  %v2864_v1 = vperm.slane %v2666_v51, %v5181_v49 }
 0x269   :  { %2494 = vst [vmem:[#allocation1 + $0x20] ss:$4 sm:$0xff] %v5793_v24  ;;  %2740 = vperm.xlu2 %3018, %v2489_v26   ;;  %v2678_v5 = vpop.permute.xlu2 %2677  ;;  %v5199_v24 = vadd.s32 4294967216, %v5109_v10  ;;  %v2238_v26 = vrot.slane %v4922_v20, 2 }
 0x26a   :  { %2495 = vst [vmem:[#allocation1 + $0x21] ss:$4 sm:$0xff] %v2226_v45  ;;  %v2866_v48 = vsel %vm2865_vm8, %v2864_v1, %v2862_v19  ;;  %v2880_v58 = vperm.slane %v2678_v5, %v5193_v34  ;;  %v2245_v1 = vrot.slane %v4843_v15, 4 }
 0x26b   :  { %2496 = vst [vmem:[#allocation1 + $0x22] ss:$4 sm:$0xff] %v2227_v43  ;;  %v2870_v18 = vsel %vm2869_vm9, %v2868_v42, %v2866_v48  ;;  %v2872_v43 = vperm.slane %v2672_v22, %v5199_v24  ;;  %v2246_v42 = vrot.slane %v4843_v15, 6  ;;  %v5225_v48 = vadd.s32 4294967176, %v5109_v10 }
 0x26c   :  { %2497 = vst [vmem:[#allocation1 + $0x23] ss:$4 sm:$0xff] %v2228_v40  ;;  %v2240_v40 = vrot.slane %v4922_v20, 6 }
 0x26d   :  { %v2874_v39 = vsel %vm2873_vm10, %v2872_v43, %v2870_v18  ;;  %v5228_v18 = vadd.s32 4294967184, %v5109_v10 }
 0x26f   :  { %v2498_v27 = vld.sshfl [vmem:[#allocation1] sm:$0xff pattern:$0x73625140]  ;;  %v2675_v45 = vpop.permute.xlu1 %2674 }
 0x270   :  { %2500 = vst [vmem:[#allocation1] ss:$4 sm:$0xff] %v4908_v6  ;;  %2743 = vperm.xlu0 %3019, %v2498_v27   ;;  %v2234_v6 = vrot.slane %v4892_v54, 6  ;;  %v5212_v27 = vadd.s32 4294967192, %v5109_v10 }
 0x271   :  { %2501 = vst [vmem:[#allocation1 + $0x1] ss:$4 sm:$0xff] %v2229_v21 }
 0x272   :  { %2502 = vst [vmem:[#allocation1 + $0x2] ss:$4 sm:$0xff] %v2230_v3  ;;  %v2241_v3 = vrot.slane %v4862_v17, 2 }
 0x273   :  { %v2499_v8 = vld.sshfl [vmem:[#allocation1 + $0x20] sm:$0xff pattern:$0x73625140]  ;;  %2503 = vst [vmem:[#allocation1 + $0x3] ss:$4 sm:$0xff] %v2231_v61 }
 0x274   :  { %2504 = vst [vmem:[#allocation1 + $0x20] ss:$4 sm:$0xff] %v4892_v54  ;;  %2746 = vperm.xlu1 %3017, %v2499_v8   ;;  %v2237_v54 = vrot.slane %v4916_v7, 6 }
 0x275   :  { %2505 = vst [vmem:[#allocation1 + $0x21] ss:$4 sm:$0xff] %v2232_v59  ;;  %v2242_v59 = vrot.slane %v4862_v17, 4 }
 0x276   :  { %2506 = vst [vmem:[#allocation1 + $0x22] ss:$4 sm:$0xff] %v2233_v12  ;;  %v2243_v12 = vrot.slane %v4862_v17, 6 }
 0x277   :  { %2507 = vst [vmem:[#allocation1 + $0x23] ss:$4 sm:$0xff] %v2234_v6  ;;  %v2244_v6 = vrot.slane %v4843_v15, 2 }
 0x27a   :  { %v2508_v32 = vld.sshfl [vmem:[#allocation1] sm:$0xff pattern:$0x73625140] }
 0x27b   :  { %2510 = vst [vmem:[#allocation1] ss:$4 sm:$0xff] %v4916_v7  ;;  %2749 = vperm.xlu2 %3018, %v2508_v32   ;;  %v2876_v7 = vperm.slane %v2675_v45, %v5196_v38  ;;  %v2248_v45 = vrot.slane %v4852_v31, 4 }
 0x27c   :  { %2511 = vst [vmem:[#allocation1 + $0x1] ss:$4 sm:$0xff] %v2235_v57  ;;  %v2684_v57 = vpop.permute.xlu1 %2683 }
 0x27d   :  { %2512 = vst [vmem:[#allocation1 + $0x2] ss:$4 sm:$0xff] %v2236_v62  ;;  %v2878_v19 = vsel %vm2877_vm11, %v2876_v7, %v2874_v39  ;;  %v2888_v32 = vperm.slane %v2684_v57, %v5228_v18  ;;  %v2252_v39 = vrot.slane %v4837_v0, 6 }
 0x27e   :  { %v2509_v11 = vld.sshfl [vmem:[#allocation1 + $0x20] sm:$0xff pattern:$0x73625140]  ;;  %2513 = vst [vmem:[#allocation1 + $0x3] ss:$4 sm:$0xff] %v2237_v54  ;;  %v2882_v21 = vsel %vm2881_vm12, %v2880_v58, %v2878_v19  ;;  %v2247_v54 = vrot.slane %v4852_v31, 2 }
 0x27f   :  { %2514 = vst [vmem:[#allocation1 + $0x20] ss:$4 sm:$0xff] %v4922_v20  ;;  %2752 = vperm.xlu0 %3019, %v2509_v11   ;;  %v2681_v20 = vpop.permute.xlu0 %2680  ;;  %v2250_v11 = vrot.slane %v4837_v0, 2 }
 0x280   :  { %2515 = vst [vmem:[#allocation1 + $0x21] ss:$4 sm:$0xff] %v2238_v26  ;;  %v2884_v8 = vperm.slane %v2681_v20, %v5212_v27  ;;  %v2249_v26 = vrot.slane %v4852_v31, 6  ;;  %v2253_v20 = vrot.slane %v4383_v33, 2 }
 0x281   :  { %2516 = vst [vmem:[#allocation1 + $0x22] ss:$4 sm:$0xff] %v2239_v53  ;;  %v2251_v53 = vrot.slane %v4837_v0, 4 }
 0x282   :  { %2517 = vst [vmem:[#allocation1 + $0x23] ss:$4 sm:$0xff] %v2240_v40  ;;  %v2886_v23 = vsel %vm2885_vm13, %v2884_v8, %v2882_v21  ;;  %v2254_v8 = vrot.slane %v4383_v33, 4 }
 0x284   :  { %v2693_v40 = vpop.permute.xlu1 %2692 }
 0x285   :  { %v2518_v61 = vld.sshfl [vmem:[#allocation1] sm:$0xff pattern:$0x73625140]  ;;  %v2896_v19 = vperm.slane %v2693_v40, %v5116_v50 }
 0x286   :  { %2520 = vst [vmem:[#allocation1] ss:$4 sm:$0xff] %v4862_v17  ;;  %2755 = vperm.xlu1 %3017, %v2518_v61   ;;  %v2687_v17 = vpop.permute.xlu2 %2686 }
 0x287   :  { %2521 = vst [vmem:[#allocation1 + $0x1] ss:$4 sm:$0xff] %v2241_v3  ;;  %v2892_v62 = vperm.slane %v2687_v17, %v5225_v48  ;;  %v2690_v58 = vpop.permute.xlu0 %2689  ;;  %v2258_v17 = vrot.slane %v4370_v44, 6 }
 0x288   :  { %2522 = vst [vmem:[#allocation1 + $0x2] ss:$4 sm:$0xff] %v2242_v59 }
 0x289   :  { %v2519_v51 = vld.sshfl [vmem:[#allocation1 + $0x20] sm:$0xff pattern:$0x73625140]  ;;  %2523 = vst [vmem:[#allocation1 + $0x3] ss:$4 sm:$0xff] %v2243_v12 }
 0x28a   :  { %2524 = vst [vmem:[#allocation1 + $0x20] ss:$4 sm:$0xff] %v4843_v15  ;;  %2758 = vperm.xlu2 %3018, %v2519_v51   ;;  %v2890_v15 = vsel %vm2889_vm14, %v2888_v32, %v2886_v23  ;;  %v5794_v32 = vld [vmem:[#allocation47_spill] sm:$0xff] }
 0x28b   :  { %2525 = vst [vmem:[#allocation1 + $0x21] ss:$4 sm:$0xff] %v2244_v6  ;;  %v5237_v22 = vsel %vm2893_vm15, %v2892_v62, %v2890_v15  ;;  %v2256_v6 = vrot.slane %v4370_v44, 2  ;;  %v2259_v62 = vrot.slane %v5794_v32, 2 }
 0x28c   :  { %2526 = vst [vmem:[#allocation1 + $0x22] ss:$4 sm:$0xff] %v2245_v1  ;;  %v2257_v1 = vrot.slane %v4370_v44, 4 }
 0x28d   :  { %2527 = vst [vmem:[#allocation1 + $0x23] ss:$4 sm:$0xff] %v2246_v42 }
 0x28e   :  { %v2696_v43 = vpop.permute.xlu2 %2695 }
 0x28f   :  { %v2898_v21 = vperm.slane %v2696_v43, %v5135_v52  ;;  %v2699_v12 = vpop.permute.xlu0 %2698 }
 0x290   :  { %v2528_v5 = vld.sshfl [vmem:[#allocation1] sm:$0xff pattern:$0x73625140]  ;;  %v2900_v23 = vperm.slane %v2699_v12, %v5132_v9  ;;  %v2268_v12 = vrot.slane %v5002_v47, 2 }
 0x291   :  { %2530 = vst [vmem:[#allocation1] ss:$4 sm:$0xff] %v4852_v31  ;;  %2761 = vperm.xlu0 %3019, %v2528_v5   ;;  %v2895_v31 = vperm.slane %v2690_v58, %v5109_v10  ;;  %v2260_v5 = vrot.slane %v5794_v32, 4 }
 0x292   :  { %2531 = vst [vmem:[#allocation1 + $0x1] ss:$4 sm:$0xff] %v2247_v54 }
 0x293   :  { %2532 = vst [vmem:[#allocation1 + $0x2] ss:$4 sm:$0xff] %v2248_v45  ;;  %v2897_v3 = vsel %vm2837_vm1, %v2896_v19, %v2895_v31  ;;  %v2261_v45 = vrot.slane %v5794_v32, 6 }
 0x294   :  { %v2529_v7 = vld.sshfl [vmem:[#allocation1 + $0x20] sm:$0xff pattern:$0x73625140]  ;;  %2533 = vst [vmem:[#allocation1 + $0x3] ss:$4 sm:$0xff] %v2249_v26  ;;  %v2899_v61 = vsel %vm2841_vm2, %v2898_v21, %v2897_v3  ;;  %v2265_v3 = vrot.slane %v5011_v14, 2 }
 0x295   :  { %2534 = vst [vmem:[#allocation1 + $0x20] ss:$4 sm:$0xff] %v4837_v0  ;;  %2764 = vperm.xlu1 %3017, %v2529_v7   ;;  %v2255_v0 = vrot.slane %v4383_v33, 6  ;;  %v2901_v42 = vsel %vm2845_vm3, %v2900_v23, %v2899_v61 }
 0x296   :  { %2535 = vst [vmem:[#allocation1 + $0x21] ss:$4 sm:$0xff] %v2250_v11  ;;  %v2705_v7 = vpop.permute.xlu2 %2704 }
 0x297   :  { %2536 = vst [vmem:[#allocation1 + $0x22] ss:$4 sm:$0xff] %v2251_v53  ;;  %v2904_v40 = vperm.slane %v2705_v7, %v5152_v56 }
 0x298   :  { %2537 = vst [vmem:[#allocation1 + $0x23] ss:$4 sm:$0xff] %v2252_v39 }
 0x29b   :  { %v2538_v59 = vld.sshfl [vmem:[#allocation1] sm:$0xff pattern:$0x73625140] }
 0x29c   :  { %2540 = vst [vmem:[#allocation1] ss:$4 sm:$0xff] %v4383_v33  ;;  %2767 = vperm.xlu2 %3018, %v2538_v59   ;;  %v2702_v33 = vpop.permute.xlu1 %2701 }
 0x29d   :  { %2541 = vst [vmem:[#allocation1 + $0x1] ss:$4 sm:$0xff] %v2253_v20  ;;  %v2902_v57 = vperm.slane %v2702_v33, %v5129_v41  ;;  %v2266_v20 = vrot.slane %v5011_v14, 4 }
 0x29e   :  { %2542 = vst [vmem:[#allocation1 + $0x2] ss:$4 sm:$0xff] %v2254_v8  ;;  %v2267_v8 = vrot.slane %v5011_v14, 6 }
 0x29f   :  { %v2539_v51 = vld.sshfl [vmem:[#allocation1 + $0x20] sm:$0xff pattern:$0x73625140]  ;;  %2543 = vst [vmem:[#allocation1 + $0x3] ss:$4 sm:$0xff] %v2255_v0  ;;  %v2903_v15 = vsel %vm2849_vm4, %v2902_v57, %v2901_v42  ;;  %v2271_v57 = vrot.slane %v5005_v13, 2 }
 0x2a0   :  { %2544 = vst [vmem:[#allocation1 + $0x20] ss:$4 sm:$0xff] %v4370_v44  ;;  %2770 = vperm.xlu0 %3019, %v2539_v51   ;;  %v5795_v44 = vld [vmem:[#allocation29_spill] sm:$0xff]  ;;  %v2905_v39 = vsel %vm2853_vm5, %v2904_v40, %v2903_v15  ;;  %v2708_v19 = vpop.permute.xlu0 %2707  ;;  %v2269_v51 = vrot.slane %v5002_v47, 4  ;;  %v2279_v40 = vrot.slane %v4977_v29, 6 }
 0x2a1   :  { %2545 = vst [vmem:[#allocation1 + $0x21] ss:$4 sm:$0xff] %v2256_v6  ;;  %v2262_v26 = vrot.slane %v5795_v44, 2  ;;  %v2263_v43 = vrot.slane %v5795_v44, 4  ;;  %v2264_v53 = vrot.slane %v5795_v44, 6  ;;  %v2906_v21 = vperm.slane %v2708_v19, %v5148_v16  ;;  %v2714_v6 = vpop.permute.xlu2 %2713 }
 0x2a2   :  { %2546 = vst [vmem:[#allocation1 + $0x22] ss:$4 sm:$0xff] %v2257_v1  ;;  %v2270_v1 = vrot.slane %v5002_v47, 6  ;;  %v2281_v19 = vrot.slane %v4962_v60, 4 }
 0x2a3   :  { %2547 = vst [vmem:[#allocation1 + $0x23] ss:$4 sm:$0xff] %v2258_v17  ;;  %v2907_v59 = vsel %vm2857_vm6, %v2906_v21, %v2905_v39 }
 0x2a4   :  { %v2711_v58 = vpop.permute.xlu1 %2710 }
 0x2a5   :  { %v2908_v31 = vperm.slane %v2711_v58, %v5166_v2 }
 0x2a6   :  { %v2548_v54 = vld.sshfl [vmem:[#allocation1] sm:$0xff pattern:$0x73625140] }
 0x2a7   :  { %2550 = vst [vmem:[#allocation1] ss:$4 sm:$0xff] %v5794_v32  ;;  %2773 = vperm.xlu1 %3017, %v2548_v54   ;;  %v2909_v0 = vsel %vm2861_vm7, %v2908_v31, %v2907_v59  ;;  %v2273_v54 = vrot.slane %v5005_v13, 6  ;;  %v2282_v31 = vrot.slane %v4962_v60, 6 }
 0x2a8   :  { %2551 = vst [vmem:[#allocation1 + $0x1] ss:$4 sm:$0xff] %v2259_v62  ;;  %v2272_v62 = vrot.slane %v5005_v13, 4 }
 0x2a9   :  { %2552 = vst [vmem:[#allocation1 + $0x2] ss:$4 sm:$0xff] %v2260_v5  ;;  %v2274_v5 = vrot.slane %v5014_v28, 2  ;;  %v2723_v58 = vpop.permute.xlu2 %2722 }
 0x2aa   :  { %v2549_v11 = vld.sshfl [vmem:[#allocation1 + $0x20] sm:$0xff pattern:$0x73625140]  ;;  %2553 = vst [vmem:[#allocation1 + $0x3] ss:$4 sm:$0xff] %v2261_v45  ;;  %v2275_v45 = vrot.slane %v5014_v28, 4  ;;  %v2916_v21 = vperm.slane %v2723_v58, %v5196_v38 }
 0x2ab   :  { %2554 = vst [vmem:[#allocation1 + $0x20] ss:$4 sm:$0xff] %v5795_v44  ;;  %2776 = vperm.xlu2 %3018, %v2549_v11   ;;  %v2276_v44 = vrot.slane %v5014_v28, 6 }
 0x2ac   :  { %2555 = vst [vmem:[#allocation1 + $0x21] ss:$4 sm:$0xff] %v2262_v26 }
 0x2ad   :  { %2556 = vst [vmem:[#allocation1 + $0x22] ss:$4 sm:$0xff] %v2263_v43  ;;  %v2278_v43 = vrot.slane %v4977_v29, 4 }
 0x2ae   :  { %2557 = vst [vmem:[#allocation1 + $0x23] ss:$4 sm:$0xff] %v2264_v53 }
 0x2af   :  { %v2717_v42 = vpop.permute.xlu0 %2716 }
 0x2b0   :  { %v2912_v33 = vperm.slane %v2717_v42, %v5176_v46  ;;  %v2287_v42 = vrot.slane %v4972_v30, 4 }
 0x2b1   :  { %v2558_v61 = vld.sshfl [vmem:[#allocation1] sm:$0xff pattern:$0x73625140] }
 0x2b2   :  { %2560 = vst [vmem:[#allocation1] ss:$4 sm:$0xff] %v5011_v14  ;;  %2779 = vperm.xlu0 %3019, %v2558_v61   ;;  %v2910_v14 = vperm.slane %v2714_v6, %v5181_v49 }
 0x2b3   :  { %2561 = vst [vmem:[#allocation1 + $0x1] ss:$4 sm:$0xff] %v2265_v3 }
 0x2b4   :  { %2562 = vst [vmem:[#allocation1 + $0x2] ss:$4 sm:$0xff] %v2266_v20  ;;  %v2911_v17 = vsel %vm2865_vm8, %v2910_v14, %v2909_v0  ;;  %v2732_v14 = vpop.permute.xlu2 %2731 }
 0x2b5   :  { %v2559_v23 = vld.sshfl [vmem:[#allocation1 + $0x20] sm:$0xff pattern:$0x73625140]  ;;  %2563 = vst [vmem:[#allocation1 + $0x3] ss:$4 sm:$0xff] %v2267_v8  ;;  %v2283_v8 = vrot.slane %v4980_v36, 2 }
 0x2b6   :  { %2564 = vst [vmem:[#allocation1 + $0x20] ss:$4 sm:$0xff] %v5002_v47  ;;  %2782 = vperm.xlu1 %3017, %v2559_v23   ;;  %v2913_v47 = vsel %vm2869_vm9, %v2912_v33, %v2911_v17  ;;  %v2720_v26 = vpop.permute.xlu1 %2719  ;;  %v2285_v23 = vrot.slane %v4980_v36, 6  ;;  %v2288_v17 = vrot.slane %v4972_v30, 6 }
 0x2b7   :  { %2565 = vst [vmem:[#allocation1 + $0x21] ss:$4 sm:$0xff] %v2268_v12  ;;  %v2914_v11 = vperm.slane %v2720_v26, %v5199_v24  ;;  %v2284_v12 = vrot.slane %v4980_v36, 4  ;;  %v2294_v26 = vrot.slane %v4523_v37, 6 }
 0x2b8   :  { %2566 = vst [vmem:[#allocation1 + $0x22] ss:$4 sm:$0xff] %v2269_v51  ;;  %v2286_v51 = vrot.slane %v4972_v30, 2 }
 0x2b9   :  { %2567 = vst [vmem:[#allocation1 + $0x23] ss:$4 sm:$0xff] %v2270_v1  ;;  %v2915_v53 = vsel %vm2873_vm10, %v2914_v11, %v2913_v47 }
 0x2ba   :  { %v2917_v3 = vsel %vm2877_vm11, %v2916_v21, %v2915_v53 }
 0x2bc   :  { %v2568_v32 = vld.sshfl [vmem:[#allocation1] sm:$0xff pattern:$0x73625140] }
 0x2bd   :  { %2785 = vperm.xlu2 %3018, %v2568_v32   ;;  %2570 = vst [vmem:[#allocation1] ss:$4 sm:$0xff] %v5005_v13  ;;  %v2277_v13 = vrot.slane %v4977_v29, 2 }
 0x2be   :  { %2571 = vst [vmem:[#allocation1 + $0x1] ss:$4 sm:$0xff] %v2271_v57 }
 0x2bf   :  { %2572 = vst [vmem:[#allocation1 + $0x2] ss:$4 sm:$0xff] %v2272_v62  ;;  %v2289_v62 = vrot.slane %v4513_v4, 2 }
 0x2c0   :  { %v2569_v15 = vld.sshfl [vmem:[#allocation1 + $0x20] sm:$0xff pattern:$0x73625140]  ;;  %2573 = vst [vmem:[#allocation1 + $0x3] ss:$4 sm:$0xff] %v2273_v54  ;;  %v2290_v54 = vrot.slane %v4513_v4, 4 }
 0x2c1   :  { %2788 = vperm.xlu0 %3019, %v2569_v15   ;;  %2574 = vst [vmem:[#allocation1 + $0x20] ss:$4 sm:$0xff] %v5014_v28  ;;  %v2280_v28 = vrot.slane %v4962_v60, 2  ;;  %v2726_v61 = vpop.permute.xlu0 %2725  ;;  %v2292_v15 = vrot.slane %v4523_v37, 2 }
 0x2c2   :  { %2575 = vst [vmem:[#allocation1 + $0x21] ss:$4 sm:$0xff] %v2274_v5  ;;  %v2918_v59 = vperm.slane %v2726_v61, %v5193_v34  ;;  %v2291_v5 = vrot.slane %v4513_v4, 6 }
 0x2c3   :  { %2576 = vst [vmem:[#allocation1 + $0x22] ss:$4 sm:$0xff] %v2275_v45  ;;  %v2741_v11 = vpop.permute.xlu2 %2740 }
 0x2c4   :  { %2577 = vst [vmem:[#allocation1 + $0x23] ss:$4 sm:$0xff] %v2276_v44  ;;  %v2293_v44 = vrot.slane %v4523_v37, 4 }
 0x2c7   :  { %v2578_v7 = vld.sshfl [vmem:[#allocation1] sm:$0xff pattern:$0x73625140] }
 0x2c8   :  { %2791 = vperm.xlu1 %3017, %v2578_v7   ;;  %2580 = vst [vmem:[#allocation1] ss:$4 sm:$0xff] %v4977_v29  ;;  %v2729_v29 = vpop.permute.xlu1 %2728 }
 0x2c9   :  { %2581 = vst [vmem:[#allocation1 + $0x1] ss:$4 sm:$0xff] %v2277_v13  ;;  %v2920_v20 = vperm.slane %v2729_v29, %v5212_v27 }
 0x2ca   :  { %2582 = vst [vmem:[#allocation1 + $0x2] ss:$4 sm:$0xff] %v2278_v43  ;;  %v5796_v43 = vld [vmem:[#allocation5_spill] sm:$0xff] }
 0x2cb   :  { %v2579_v39 = vld.sshfl [vmem:[#allocation1 + $0x20] sm:$0xff pattern:$0x73625140]  ;;  %2583 = vst [vmem:[#allocation1 + $0x3] ss:$4 sm:$0xff] %v2279_v40  ;;  %v2295_v53 = vrot.slane %v5796_v43, 2 }
 0x2cc   :  { %2794 = vperm.xlu2 %3018, %v2579_v39   ;;  %2584 = vst [vmem:[#allocation1 + $0x20] ss:$4 sm:$0xff] %v4962_v60  ;;  %v2919_v60 = vsel %vm2881_vm12, %v2918_v59, %v2917_v3  ;;  %v5797_v39 = vld [vmem:[#allocation33_spill] sm:$0xff]  ;;  %v2301_v3 = vrot.slane %v5052_v35, 2  ;;  %v2303_v59 = vrot.slane %v5052_v35, 6 }
 0x2cd   :  { %2585 = vst [vmem:[#allocation1 + $0x21] ss:$4 sm:$0xff] %v2280_v28  ;;  %v2921_v6 = vsel %vm2885_vm13, %v2920_v20, %v2919_v60  ;;  %v2296_v28 = vrot.slane %v5796_v43, 4  ;;  %v2299_v21 = vrot.slane %v5797_v39, 4  ;;  %v2300_v29 = vrot.slane %v5797_v39, 6 }
 0x2ce   :  { %2586 = vst [vmem:[#allocation1 + $0x22] ss:$4 sm:$0xff] %v2281_v19  ;;  %v2298_v19 = vrot.slane %v5797_v39, 2  ;;  %v2302_v20 = vrot.slane %v5052_v35, 4  ;;  %v2306_v60 = vrot.slane %v5043_v55, 6 }
 0x2cf   :  { %2587 = vst [vmem:[#allocation1 + $0x23] ss:$4 sm:$0xff] %v2282_v31 }
 0x2d0   :  { %v2735_v33 = vpop.permute.xlu0 %2734 }
 0x2d1   :  { %v2924_v32 = vperm.slane %v2735_v33, %v5225_v48 }
 0x2d2   :  { %v2588_v0 = vld.sshfl [vmem:[#allocation1] sm:$0xff pattern:$0x73625140] }
 0x2d3   :  { %2797 = vperm.xlu0 %3019, %v2588_v0   ;;  %2590 = vst [vmem:[#allocation1] ss:$4 sm:$0xff] %v4980_v36  ;;  %v2922_v36 = vperm.slane %v2732_v14, %v5228_v18  ;;  %v2310_v14 = vrot.slane %v5048_v63, 2 }
 0x2d4   :  { %2591 = vst [vmem:[#allocation1 + $0x1] ss:$4 sm:$0xff] %v2283_v8  ;;  %v2304_v8 = vrot.slane %v5043_v55, 2 }
 0x2d5   :  { %2592 = vst [vmem:[#allocation1 + $0x2] ss:$4 sm:$0xff] %v2284_v12  ;;  %v2923_v57 = vsel %vm2889_vm14, %v2922_v36, %v2921_v6  ;;  %v2305_v12 = vrot.slane %v5043_v55, 4  ;;  %v2312_v36 = vrot.slane %v5048_v63, 6  ;;  %v2750_v33 = vpop.permute.xlu2 %2749 }
 0x2d6   :  { %v2589_v1 = vld.sshfl [vmem:[#allocation1 + $0x20] sm:$0xff pattern:$0x73625140]  ;;  %2593 = vst [vmem:[#allocation1 + $0x3] ss:$4 sm:$0xff] %v2285_v23  ;;  %v2307_v23 = vrot.slane %v5057_v25, 2 }
 0x2d7   :  { %2800 = vperm.xlu1 %3017, %v2589_v1   ;;  %2594 = vst [vmem:[#allocation1 + $0x20] ss:$4 sm:$0xff] %v4972_v30  ;;  %v5326_v30 = vsel %vm2893_vm15, %v2924_v32, %v2923_v57  ;;  %v2738_v13 = vpop.permute.xlu1 %2737 }
 0x2d8   :  { %2595 = vst [vmem:[#allocation1 + $0x21] ss:$4 sm:$0xff] %v2286_v51  ;;  %v2926_v7 = vperm.slane %v2738_v13, %v5109_v10  ;;  %v2309_v51 = vrot.slane %v5057_v25, 6 }
 0x2d9   :  { %2596 = vst [vmem:[#allocation1 + $0x22] ss:$4 sm:$0xff] %v2287_v42 }
 0x2da   :  { %2597 = vst [vmem:[#allocation1 + $0x23] ss:$4 sm:$0xff] %v2288_v17 }
 0x2dd   :  { %v2598_v47 = vld.sshfl [vmem:[#allocation1] sm:$0xff pattern:$0x73625140] }
 0x2de   :  { %2803 = vperm.xlu2 %3018, %v2598_v47   ;;  %2600 = vst [vmem:[#allocation1] ss:$4 sm:$0xff] %v4513_v4  ;;  %v2927_v4 = vperm.slane %v2741_v11, %v5116_v50 }
 0x2df   :  { %2601 = vst [vmem:[#allocation1 + $0x1] ss:$4 sm:$0xff] %v2289_v62 }
 0x2e0   :  { %2602 = vst [vmem:[#allocation1 + $0x2] ss:$4 sm:$0xff] %v2290_v54  ;;  %v5339_v58 = vsel %vm2837_vm1, %v2927_v4, %v2926_v7 }
 0x2e1   :  { %v2599_v45 = vld.sshfl [vmem:[#allocation1 + $0x20] sm:$0xff pattern:$0x73625140]  ;;  %2603 = vst [vmem:[#allocation1 + $0x3] ss:$4 sm:$0xff] %v2291_v5 }
 0x2e2   :  { %2806 = vperm.xlu0 %3019, %v2599_v45   ;;  %2604 = vst [vmem:[#allocation1 + $0x20] ss:$4 sm:$0xff] %v4523_v37  ;;  %v2297_v37 = vrot.slane %v5796_v43, 6  ;;  %v2744_v1 = vpop.permute.xlu0 %2743 }
 0x2e3   :  { %2605 = vst [vmem:[#allocation1 + $0x21] ss:$4 sm:$0xff] %v2292_v15  ;;  %v2929_v62 = vperm.slane %v2744_v1, %v5135_v52 }
 0x2e4   :  { %2606 = vst [vmem:[#allocation1 + $0x22] ss:$4 sm:$0xff] %v2293_v44  ;;  %v2759_v5 = vpop.permute.xlu2 %2758 }
 0x2e5   :  { %2607 = vst [vmem:[#allocation1 + $0x23] ss:$4 sm:$0xff] %v2294_v26  ;;  %v2930_v15 = vsel %vm2841_vm2, %v2929_v62, %v5339_v58  ;;  %v2933_v26 = vperm.slane %v2750_v33, %v5129_v41 }
 0x2e6   :  { %v2747_v17 = vpop.permute.xlu1 %2746 }
 0x2e7   :  { %v2931_v54 = vperm.slane %v2747_v17, %v5132_v9 }
 0x2e8   :  { %v2608_v40 = vld.sshfl [vmem:[#allocation1] sm:$0xff pattern:$0x73625140] }
 0x2e9   :  { %2809 = vperm.xlu1 %3017, %v2608_v40   ;;  %2610 = vst [vmem:[#allocation1] ss:$4 sm:$0xff] %v5796_v43 }
 0x2ea   :  { %2611 = vst [vmem:[#allocation1 + $0x1] ss:$4 sm:$0xff] %v2295_v53 }
 0x2eb   :  { %2612 = vst [vmem:[#allocation1 + $0x2] ss:$4 sm:$0xff] %v2296_v28  ;;  %v2939_v28 = vperm.slane %v2759_v5, %v5166_v2 }
 0x2ec   :  { %v2609_v31 = vld.sshfl [vmem:[#allocation1 + $0x20] sm:$0xff pattern:$0x73625140]  ;;  %2613 = vst [vmem:[#allocation1 + $0x3] ss:$4 sm:$0xff] %v2297_v37 }
 0x2ed   :  { %2812 = vperm.xlu2 %3018, %v2609_v31   ;;  %2614 = vst [vmem:[#allocation1 + $0x20] ss:$4 sm:$0xff] %v5797_v39 }
 0x2ee   :  { %2615 = vst [vmem:[#allocation1 + $0x21] ss:$4 sm:$0xff] %v2298_v19 }
 0x2ef   :  { %2616 = vst [vmem:[#allocation1 + $0x22] ss:$4 sm:$0xff] %v2299_v21 }
 0x2f0   :  { %2617 = vst [vmem:[#allocation1 + $0x23] ss:$4 sm:$0xff] %v2300_v29 }
 0x2f1   :  { %v2753_v57 = vpop.permute.xlu0 %2752 }
 0x2f2   :  { %v2935_v44 = vperm.slane %v2753_v57, %v5152_v56 }
 0x2f3   :  { %v2618_v61 = vld.sshfl [vmem:[#allocation1] sm:$0xff pattern:$0x73625140] }
 0x2f4   :  { %2815 = vperm.xlu0 %3019, %v2618_v61   ;;  %2620 = vst [vmem:[#allocation1] ss:$4 sm:$0xff] %v5052_v35  ;;  %v2308_v35 = vrot.slane %v5057_v25, 4 }
 0x2f5   :  { %2621 = vst [vmem:[#allocation1 + $0x1] ss:$4 sm:$0xff] %v2301_v3 }
 0x2f6   :  { %2622 = vst [vmem:[#allocation1 + $0x2] ss:$4 sm:$0xff] %v2302_v20  ;;  %v2768_v43 = vpop.permute.xlu2 %2767 }
 0x2f7   :  { %v2619_v0 = vld.sshfl [vmem:[#allocation1 + $0x20] sm:$0xff pattern:$0x73625140]  ;;  %2623 = vst [vmem:[#allocation1 + $0x3] ss:$4 sm:$0xff] %v2303_v59  ;;  %v2945_v3 = vperm.slane %v2768_v43, %v5199_v24 }
 0x2f8   :  { %2818 = vperm.xlu1 %3017, %v2619_v0   ;;  %2624 = vst [vmem:[#allocation1 + $0x20] ss:$4 sm:$0xff] %v5043_v55  ;;  %v2311_v55 = vrot.slane %v5048_v63, 4  ;;  %v2756_v32 = vpop.permute.xlu1 %2755 }
 0x2f9   :  { %2625 = vst [vmem:[#allocation1 + $0x21] ss:$4 sm:$0xff] %v2304_v8  ;;  %v2937_v11 = vperm.slane %v2756_v32, %v5148_v16 }
 0x2fa   :  { %2626 = vst [vmem:[#allocation1 + $0x22] ss:$4 sm:$0xff] %v2305_v12 }
 0x2fb   :  { %2627 = vst [vmem:[#allocation1 + $0x23] ss:$4 sm:$0xff] %v2306_v60 }
 0x2fe   :  { %v2628_v6 = vld.sshfl [vmem:[#allocation1] sm:$0xff pattern:$0x73625140] }
 0x2ff   :  { %2821 = vperm.xlu2 %3018, %v2628_v6   ;;  %2630 = vst [vmem:[#allocation1] ss:$4 sm:$0xff] %v5057_v25 }
 0x300   :  { %2631 = vst [vmem:[#allocation1 + $0x1] ss:$4 sm:$0xff] %v2307_v23 }
 0x301   :  { %2632 = vst [vmem:[#allocation1 + $0x2] ss:$4 sm:$0xff] %v2308_v35 }
 0x302   :  { %v2629_v42 = vld.sshfl [vmem:[#allocation1 + $0x20] sm:$0xff pattern:$0x73625140]  ;;  %2633 = vst [vmem:[#allocation1 + $0x3] ss:$4 sm:$0xff] %v2309_v51 }
 0x303   :  { %2824 = vperm.xlu0 %3019, %v2629_v42   ;;  %2634 = vst [vmem:[#allocation1 + $0x20] ss:$4 sm:$0xff] %v5048_v63  ;;  %v2762_v45 = vpop.permute.xlu0 %2761  ;;  %v2932_v63 = vsel %vm2845_vm3, %v2931_v54, %v2930_v15 }
 0x304   :  { %2635 = vst [vmem:[#allocation1 + $0x21] ss:$4 sm:$0xff] %v2310_v14  ;;  %v2934_v4 = vsel %vm2849_vm4, %v2933_v26, %v2932_v63  ;;  %v2941_v40 = vperm.slane %v2762_v45, %v5181_v49 }
 0x305   :  { %2636 = vst [vmem:[#allocation1 + $0x22] ss:$4 sm:$0xff] %v2311_v55  ;;  %v2936_v7 = vsel %vm2853_vm5, %v2935_v44, %v2934_v4  ;;  %v2777_v20 = vpop.permute.xlu2 %2776 }
 0x306   :  { %2637 = vst [vmem:[#allocation1 + $0x23] ss:$4 sm:$0xff] %v2312_v36  ;;  %v2938_v53 = vsel %vm2857_vm6, %v2937_v11, %v2936_v7  ;;  %v2951_v60 = vperm.slane %v2777_v20, %v5212_v27 }
 0x307   :  { %v2765_v13 = vpop.permute.xlu1 %2764  ;;  %v2940_v37 = vsel %vm2861_vm7, %v2939_v28, %v2938_v53 }
 0x308   :  { %v2943_v58 = vperm.slane %v2765_v13, %v5176_v46  ;;  %v2942_v39 = vsel %vm2865_vm8, %v2941_v40, %v2940_v37 }
 0x309   :  { %v2638_v25 = vld.sshfl [vmem:[#allocation1] sm:$0xff pattern:$0x73625140] }
 0x30a   :  { %2827 = vperm.xlu1 %3017, %v2638_v25   ;;  %v2944_v21 = vsel %vm2869_vm9, %v2943_v58, %v2942_v39 }
 0x30b   :  { %v2946_v59 = vsel %vm2873_vm10, %v2945_v3, %v2944_v21 }
 0x30d   :  { %v2639_v47 = vld.sshfl [vmem:[#allocation1 + $0x20] sm:$0xff pattern:$0x73625140] }
 0x30e   :  { %2830 = vperm.xlu2 %3018, %v2639_v47  }
 0x312   :  { %v2771_v19 = vpop.permute.xlu0 %2770 }
 0x313   :  { %v2947_v29 = vperm.slane %v2771_v19, %v5196_v38 }
 0x315   :  { %v2948_v8 = vsel %vm2877_vm11, %v2947_v29, %v2946_v59 }
 0x317   :  { %v2786_v55 = vpop.permute.xlu2 %2785 }
 0x318   :  { %v2957_v54 = vperm.slane %v2786_v55, %v5109_v10 }
 0x319   :  { %v2774_v31 = vpop.permute.xlu1 %2773 }
 0x31a   :  { %v2949_v61 = vperm.slane %v2774_v31, %v5193_v34 }
 0x31c   :  { %v2950_v0 = vsel %vm2881_vm12, %v2949_v61, %v2948_v8 }
 0x31d   :  { %v2952_v6 = vsel %vm2885_vm13, %v2951_v60, %v2950_v0 }
 0x324   :  { %v2780_v12 = vpop.permute.xlu0 %2779 }
 0x325   :  { %v2953_v23 = vperm.slane %v2780_v12, %v5228_v18 }
 0x326   :  { %v2795_v36 = vpop.permute.xlu2 %2794 }
 0x327   :  { %v2954_v51 = vsel %vm2889_vm14, %v2953_v23, %v2952_v6  ;;  %v2962_v63 = vperm.slane %v2795_v36, %v5132_v9 }
 0x328   :  { %v2783_v35 = vpop.permute.xlu1 %2782 }
 0x329   :  { %v2955_v1 = vperm.slane %v2783_v35, %v5225_v48 }
 0x32b   :  { %v2956_v14 = vsel %vm2893_vm15, %v2955_v1, %v2954_v51 }
 0x32c   :  { %v2989_v42 = vsel %vm2988_vm0, %v2956_v14, %v5237_v22 }
 0x333   :  { %v2789_v17 = vpop.permute.xlu0 %2788 }
 0x334   :  { %v2958_v62 = vperm.slane %v2789_v17, %v5116_v50 }
 0x336   :  { %v2959_v15 = vsel %vm2837_vm1, %v2958_v62, %v2957_v54  ;;  %vm2992_vm1 = vcmask 1041408  }
 0x338   :  { %v2804_v57 = vpop.permute.xlu2 %2803 }
 0x339   :  { %v2968_v7 = vperm.slane %v2804_v57, %v5148_v16 }
 0x33a   :  { %v2792_v33 = vpop.permute.xlu1 %2791 }
 0x33b   :  { %v2960_v47 = vperm.slane %v2792_v33, %v5135_v52 }
 0x33d   :  { %v2961_v45 = vsel %vm2841_vm2, %v2960_v47, %v2959_v15 }
 0x33e   :  { %v2963_v13 = vsel %vm2845_vm3, %v2962_v63, %v2961_v45 }
 0x345   :  { %v2798_v25 = vpop.permute.xlu0 %2797 }
 0x346   :  { %v2964_v22 = vperm.slane %v2798_v25, %v5129_v41 }
 0x347   :  { %v2813_v44 = vpop.permute.xlu2 %2812 }
 0x348   :  { %v2965_v50 = vsel %vm2849_vm4, %v2964_v22, %v2963_v13  ;;  %v2974_v58 = vperm.slane %v2813_v44, %v5176_v46 }
 0x349   :  { %v2801_v32 = vpop.permute.xlu1 %2800 }
 0x34a   :  { %v2966_v11 = vperm.slane %v2801_v32, %v5152_v56 }
 0x34c   :  { %v2967_v10 = vsel %vm2853_vm5, %v2966_v11, %v2965_v50 }
 0x34d   :  { %v2969_v41 = vsel %vm2857_vm6, %v2968_v7, %v2967_v10 }
 0x354   :  { %v2807_v5 = vpop.permute.xlu0 %2806 }
 0x355   :  { %v2970_v4 = vperm.slane %v2807_v5, %v5166_v2 }
 0x357   :  { %v2971_v53 = vsel %vm2861_vm7, %v2970_v4, %v2969_v41 }
 0x359   :  { %v2822_v9 = vpop.permute.xlu2 %2821 }
 0x35a   :  { %v2980_v31 = vperm.slane %v2822_v9, %v5193_v34 }
 0x35b   :  { %v2810_v26 = vpop.permute.xlu1 %2809 }
 0x35c   :  { %v2972_v43 = vperm.slane %v2810_v26, %v5181_v49 }
 0x35e   :  { %v2973_v56 = vsel %vm2865_vm8, %v2972_v43, %v2971_v53 }
 0x35f   :  { %v2975_v2 = vsel %vm2869_vm9, %v2974_v58, %v2973_v56 }
 0x366   :  { %v2816_v52 = vpop.permute.xlu0 %2815 }
 0x367   :  { %v2976_v28 = vperm.slane %v2816_v52, %v5199_v24 }
 0x368   :  { %v2831_v21 = vpop.permute.xlu2 %2830 }
 0x369   :  { %v2977_v16 = vsel %vm2873_vm10, %v2976_v28, %v2975_v2  ;;  %v2986_v46 = vperm.slane %v2831_v21, %v5225_v48 }
 0x36a   :  { %v2819_v40 = vpop.permute.xlu1 %2818 }
 0x36b   :  { %v2978_v37 = vperm.slane %v2819_v40, %v5196_v38 }
 0x36d   :  { %v2979_v49 = vsel %vm2877_vm11, %v2978_v37, %v2977_v16 }
 0x36e   :  { %v2981_v3 = vsel %vm2881_vm12, %v2980_v31, %v2979_v49 }
 0x375   :  { %v2825_v39 = vpop.permute.xlu0 %2824 }
 0x376   :  { %v2982_v19 = vperm.slane %v2825_v39, %v5212_v27 }
 0x378   :  { %v2983_v38 = vsel %vm2885_vm13, %v2982_v19, %v2981_v3 }
 0x37c   :  { %v2828_v29 = vpop.permute.xlu1 %2827 }
 0x37d   :  { %v2984_v24 = vperm.slane %v2828_v29, %v5228_v18 }
 0x37f   :  { %v2985_v61 = vsel %vm2889_vm14, %v2984_v24, %v2983_v38 }
 0x380   :  { %v2987_v20 = vsel %vm2893_vm15, %v2986_v46, %v2985_v61 }
 0x381   :  { %v2990_v27 = vsel %vm2988_vm0, %v2987_v20, %v5326_v30 }
 0x382   :  { %v2991_v59 = vrot.slane %v2990_v27, 6 }
 0x384   :  { %v2993_v34 = vsel %vm2992_vm1, %v2989_v42, %v2991_v59 }
 0x385   :  { %2995 = vst [vmem:[%s5430_s1 + $0x2] sm:$0xf] %v2993_v34 }
 0x386   :  { %3002 = vsyncpa [#allocation3], 1 }

</bundles_post_ra>
